<compile_context>
chip_gen: v7x
topology: tpu7x:2x2x1
jax: 0.10.0
libtpu: 0.0.40
codegen_flags: <defaults>
</compile_context>

<pallas_src>
import jax
import jax.numpy as jnp
from jax import lax
from jax.experimental import pallas as pl
from jax.experimental.pallas import tpu as pltpu

K = 3            # kernel size
C_IN = 3         # ConvTranspose2d in_channels
C_OUT = 6        # ConvTranspose2d out_channels
PAD = 1          # padding
OUT_PAD = 1      # output_padding
# effective explicit padding for the equivalent forward conv
PAD_LO = K - 1 - PAD              # = 1
PAD_HI = K - 1 - PAD + OUT_PAD    # = 2


def _convt_hardsig_kernel(w_ref, b_ref, x_ref, o_ref, xp_ref):
    """One batch element per grid step, spatial-minor layout.

    w_ref : SMEM (K*K*C_IN*C_OUT,) flipped conv-transpose weight, pre-scaled by 1/6
    b_ref : SMEM (C_OUT,)          folded bias (b + 3) / 6
    x_ref : VMEM (1, C_IN, H, W)   raw NCHW input block
    o_ref : VMEM (1, C_OUT, Ho, Wo) NCHW output block
    xp_ref: VMEM (C_IN, Hp, Wp)    scratch holding the zero-padded input halo
    """
    H = x_ref.shape[2]
    W = x_ref.shape[3]
    Ho = o_ref.shape[2]
    Wo = o_ref.shape[3]

    # Fused zero padding (replaces wrapper-side jnp.pad + NCHW<->NHWC passes).
    xp_ref[...] = jnp.zeros_like(xp_ref)
    xp_ref[:, PAD_LO:PAD_LO + H, PAD_LO:PAD_LO + W] = x_ref[0]

    # 9 taps x 3 input channels: each shifted window is loaded once and feeds
    # 6 scalar-broadcast VPU FMAs (one per output channel).  No MXU: at
    # Cin=3/Cout=6 the matmul path would run at ~2% utilization.
    accs = [jnp.zeros((Ho, Wo), dtype=jnp.float32) for _ in range(C_OUT)]
    for kh in range(K):
        for kw in range(K):
            for ci in range(C_IN):
                patch = xp_ref[ci, kh:kh + Ho, kw:kw + Wo]
                base = ((kh * K + kw) * C_IN + ci) * C_OUT
                for co in range(C_OUT):
                    accs[co] = accs[co] + w_ref[base + co] * patch

    # Hard-sigmoid already folded into w/b: y = clip(acc + b', 0, 1).
    for co in range(C_OUT):
        o_ref[0, co] = jnp.clip(accs[co] + b_ref[co], 0.0, 1.0)


def conv_transpose_hardsigmoid(x_nchw, weight_t, bias):
    """x_nchw: (N, 3, H, W) float32
    weight_t: PyTorch ConvTranspose2d weight, shape (Cin, Cout, K, K)
    bias:     (Cout,)
    returns   (N, Cout, H+1, W+1) float32 (NCHW, same as the PyTorch module)
    """
    N, cin, H, W = x_nchw.shape
    assert cin == C_IN
    Ho, Wo = H + OUT_PAD, W + OUT_PAD        # (H-1)*1 - 2*1 + 3 + 1 = H + 1
    Hp, Wp = H + PAD_LO + PAD_HI, W + PAD_LO + PAD_HI

    # ConvTranspose weight (Cin, Cout, kh, kw) -> flipped fwd-conv weight
    # (kh, kw, Cin, Cout); fold the hard-sigmoid affine into the constants.
    w_conv = jnp.transpose(weight_t[:, :, ::-1, ::-1], (2, 3, 0, 1))
    w_flat = (w_conv * (1.0 / 6.0)).reshape(-1).astype(jnp.float32)
    b_fold = ((bias + 3.0) * (1.0 / 6.0)).astype(jnp.float32)

    return pl.pallas_call(
        _convt_hardsig_kernel,
        out_shape=jax.ShapeDtypeStruct((N, C_OUT, Ho, Wo), jnp.float32),
        grid_spec=pltpu.PrefetchScalarGridSpec(
            num_scalar_prefetch=0,
            grid=(N,),
            in_specs=[
                pl.BlockSpec(memory_space=pltpu.MemorySpace.SMEM),   # weights
                pl.BlockSpec(memory_space=pltpu.MemorySpace.SMEM),   # bias
                pl.BlockSpec((1, C_IN, H, W), lambda n: (n, 0, 0, 0)),
            ],
            out_specs=pl.BlockSpec((1, C_OUT, Ho, Wo), lambda n: (n, 0, 0, 0)),
            scratch_shapes=[pltpu.VMEM((C_IN, Hp, Wp), jnp.float32)],
        ),
        compiler_params=pltpu.CompilerParams(
            dimension_semantics=("parallel",)),
    )(w_flat, b_fold, x_nchw)


def _reference(x_nchw, weight_t, bias):
    """Pure-JAX reference of the same module (for an in-script sanity check)."""
    x_pad = jnp.pad(
        x_nchw, ((0, 0), (0, 0), (PAD_LO, PAD_HI), (PAD_LO, PAD_HI)))
    w_conv = jnp.transpose(weight_t[:, :, ::-1, ::-1], (2, 3, 0, 1))  # HWIO
    out = lax.conv_general_dilated(
        x_pad, w_conv, window_strides=(1, 1), padding="VALID",
        dimension_numbers=("NCHW", "HWIO", "NCHW"))
    out = out + bias[None, :, None, None]
    return jnp.clip(out + 3.0, 0.0, 6.0) / 6.0


if __name__ == "__main__":
    key = jax.random.PRNGKey(0)
    kx, kw, kb = jax.random.split(key, 3)

    # Small shapes consistent with the module (NCHW, 3 input channels).
    N, H, W = 2, 16, 16
    x1 = jax.random.normal(kx, (N, C_IN, H, W), dtype=jnp.float32)

    # Deterministic params matching ConvTranspose2d(3, 6, 3):
    # weight (in_channels, out_channels, kH, kW), bias (out_channels,)
    fan = C_IN * K * K
    bound = 1.0 / (fan ** 0.5)
    weight_t = jax.random.uniform(
        kw, (C_IN, C_OUT, K, K), jnp.float32, -bound, bound)
    bias = jax.random.uniform(kb, (C_OUT,), jnp.float32, -bound, bound)

    y = conv_transpose_hardsigmoid(x1, weight_t, bias)
    jax.block_until_ready(y)

    assert y.shape == (N, C_OUT, H + 1, W + 1), y.shape
    assert y.dtype == jnp.float32

    y_ref = _reference(x1, weight_t, bias)
    max_err = float(jnp.max(jnp.abs(y - y_ref)))
    assert jnp.allclose(y, y_ref, atol=2e-5, rtol=1e-5), max_err

    print("KERNEL_OK")
</pallas_src>

<mosaic_0001>
module attributes {stable_mosaic.version = 11 : i64} {
  func.func @_convt_hardsig_kernel(%arg0: i32, %arg1: memref<162xf32, #tpu.memory_space<smem>>, %arg2: memref<6xf32, #tpu.memory_space<smem>>, %arg3: memref<1x3x16x16xf32, #tpu.memory_space<vmem>>, %arg4: memref<1x6x17x17xf32, #tpu.memory_space<vmem>>, %arg5: memref<3x19x19xf32, #tpu.memory_space<vmem>>) attributes {dimension_semantics = [#tpu.dimension_semantics<parallel>], iteration_bounds = array<i64: 2>, scalar_prefetch = 0 : i64, scratch_operands = 1 : i64, tpu.core_type = #tpu.core_type<tc>, window_params = [{transform_indices = @transform_0, window_bounds = array<i64: 162>}, {transform_indices = @transform_1, window_bounds = array<i64: 6>}, {transform_indices = @transform_2, window_bounds = array<i64: 1, 3, 16, 16>}, {transform_indices = @transform_3, window_bounds = array<i64: 1, 6, 17, 17>}]} {
    %cst = arith.constant 0.000000e+00 : f32
    %0 = vector.broadcast %cst : f32 to vector<3x19x19xf32>
    %c0 = arith.constant 0 : index
    %c0_0 = arith.constant 0 : index
    %c0_1 = arith.constant 0 : index
    %1 = vector.load %arg5[%c0, %c0_0, %c0_1] : memref<3x19x19xf32, #tpu.memory_space<vmem>>, vector<3x19x19xf32>
    tpu.vector_store %arg5[%c0, %c0_0, %c0_1], %0 {strides = array<i32>} : memref<3x19x19xf32, #tpu.memory_space<vmem>>, vector<3x19x19xf32>,
    %c0_2 = arith.constant 0 : index
    %c0_3 = arith.constant 0 : index
    %c0_4 = arith.constant 0 : index
    %c0_5 = arith.constant 0 : index
    %2 = vector.load %arg3[%c0_2, %c0_3, %c0_4, %c0_5] : memref<1x3x16x16xf32, #tpu.memory_space<vmem>>, vector<1x3x16x16xf32>
    %3 = vector.shape_cast %2 : vector<1x3x16x16xf32> to vector<3x16x16xf32>
    %c0_6 = arith.constant 0 : index
    %c1 = arith.constant 1 : index
    %c1_7 = arith.constant 1 : index
    %4 = vector.load %arg5[%c0_6, %c1, %c1_7] : memref<3x19x19xf32, #tpu.memory_space<vmem>>, vector<3x16x16xf32>
    tpu.vector_store %arg5[%c0_6, %c1, %c1_7], %3 {strides = array<i32>} : memref<3x19x19xf32, #tpu.memory_space<vmem>>, vector<3x16x16xf32>,
    %cst_8 = arith.constant 0.000000e+00 : f32
    %5 = vector.broadcast %cst_8 : f32 to vector<17x17xf32>
    %cst_9 = arith.constant 0.000000e+00 : f32
    %6 = vector.broadcast %cst_9 : f32 to vector<17x17xf32>
    %cst_10 = arith.constant 0.000000e+00 : f32
    %7 = vector.broadcast %cst_10 : f32 to vector<17x17xf32>
    %cst_11 = arith.constant 0.000000e+00 : f32
    %8 = vector.broadcast %cst_11 : f32 to vector<17x17xf32>
    %cst_12 = arith.constant 0.000000e+00 : f32
    %9 = vector.broadcast %cst_12 : f32 to vector<17x17xf32>
    %cst_13 = arith.constant 0.000000e+00 : f32
    %10 = vector.broadcast %cst_13 : f32 to vector<17x17xf32>
    %c0_14 = arith.constant 0 : index
    %c0_15 = arith.constant 0 : index
    %c0_16 = arith.constant 0 : index
    %11 = vector.load %arg5[%c0_14, %c0_15, %c0_16] : memref<3x19x19xf32, #tpu.memory_space<vmem>>, vector<1x17x17xf32>
    %12 = vector.shape_cast %11 : vector<1x17x17xf32> to vector<17x17xf32>
    %c0_17 = arith.constant 0 : index
    %13 = memref.load %arg1[%c0_17] : memref<162xf32, #tpu.memory_space<smem>>
    %14 = vector.broadcast %13 : f32 to vector<17x17xf32>
    %15 = arith.mulf %14, %12 : vector<17x17xf32>
    %16 = arith.addf %5, %15 : vector<17x17xf32>
    %c1_18 = arith.constant 1 : index
    %17 = memref.load %arg1[%c1_18] : memref<162xf32, #tpu.memory_space<smem>>
    %18 = vector.broadcast %17 : f32 to vector<17x17xf32>
    %19 = arith.mulf %18, %12 : vector<17x17xf32>
    %20 = arith.addf %6, %19 : vector<17x17xf32>
    %c2 = arith.constant 2 : index
    %21 = memref.load %arg1[%c2] : memref<162xf32, #tpu.memory_space<smem>>
    %22 = vector.broadcast %21 : f32 to vector<17x17xf32>
    %23 = arith.mulf %22, %12 : vector<17x17xf32>
    %24 = arith.addf %7, %23 : vector<17x17xf32>
    %c3 = arith.constant 3 : index
    %25 = memref.load %arg1[%c3] : memref<162xf32, #tpu.memory_space<smem>>
    %26 = vector.broadcast %25 : f32 to vector<17x17xf32>
    %27 = arith.mulf %26, %12 : vector<17x17xf32>
    %28 = arith.addf %8, %27 : vector<17x17xf32>
    %c4 = arith.constant 4 : index
    %29 = memref.load %arg1[%c4] : memref<162xf32, #tpu.memory_space<smem>>
    %30 = vector.broadcast %29 : f32 to vector<17x17xf32>
    %31 = arith.mulf %30, %12 : vector<17x17xf32>
    %32 = arith.addf %9, %31 : vector<17x17xf32>
    %c5 = arith.constant 5 : index
    %33 = memref.load %arg1[%c5] : memref<162xf32, #tpu.memory_space<smem>>
    %34 = vector.broadcast %33 : f32 to vector<17x17xf32>
    %35 = arith.mulf %34, %12 : vector<17x17xf32>
    %36 = arith.addf %10, %35 : vector<17x17xf32>
    %c1_19 = arith.constant 1 : index
    %c0_20 = arith.constant 0 : index
    %c0_21 = arith.constant 0 : index
    %37 = vector.load %arg5[%c1_19, %c0_20, %c0_21] : memref<3x19x19xf32, #tpu.memory_space<vmem>>, vector<1x17x17xf32>
    %38 = vector.shape_cast %37 : vector<1x17x17xf32> to vector<17x17xf32>
    %c6 = arith.constant 6 : index
    %39 = memref.load %arg1[%c6] : memref<162xf32, #tpu.memory_space<smem>>
    %40 = vector.broadcast %39 : f32 to vector<17x17xf32>
    %41 = arith.mulf %40, %38 : vector<17x17xf32>
    %42 = arith.addf %16, %41 : vector<17x17xf32>
    %c7 = arith.constant 7 : index
    %43 = memref.load %arg1[%c7] : memref<162xf32, #tpu.memory_space<smem>>
    %44 = vector.broadcast %43 : f32 to vector<17x17xf32>
    %45 = arith.mulf %44, %38 : vector<17x17xf32>
    %46 = arith.addf %20, %45 : vector<17x17xf32>
    %c8 = arith.constant 8 : index
    %47 = memref.load %arg1[%c8] : memref<162xf32, #tpu.memory_space<smem>>
    %48 = vector.broadcast %47 : f32 to vector<17x17xf32>
    %49 = arith.mulf %48, %38 : vector<17x17xf32>
    %50 = arith.addf %24, %49 : vector<17x17xf32>
    %c9 = arith.constant 9 : index
    %51 = memref.load %arg1[%c9] : memref<162xf32, #tpu.memory_space<smem>>
    %52 = vector.broadcast %51 : f32 to vector<17x17xf32>
    %53 = arith.mulf %52, %38 : vector<17x17xf32>
    %54 = arith.addf %28, %53 : vector<17x17xf32>
    %c10 = arith.constant 10 : index
    %55 = memref.load %arg1[%c10] : memref<162xf32, #tpu.memory_space<smem>>
    %56 = vector.broadcast %55 : f32 to vector<17x17xf32>
    %57 = arith.mulf %56, %38 : vector<17x17xf32>
    %58 = arith.addf %32, %57 : vector<17x17xf32>
    %c11 = arith.constant 11 : index
    %59 = memref.load %arg1[%c11] : memref<162xf32, #tpu.memory_space<smem>>
    %60 = vector.broadcast %59 : f32 to vector<17x17xf32>
    %61 = arith.mulf %60, %38 : vector<17x17xf32>
    %62 = arith.addf %36, %61 : vector<17x17xf32>
    %c2_22 = arith.constant 2 : index
    %c0_23 = arith.constant 0 : index
    %c0_24 = arith.constant 0 : index
    %63 = vector.load %arg5[%c2_22, %c0_23, %c0_24] : memref<3x19x19xf32, #tpu.memory_space<vmem>>, vector<1x17x17xf32>
    %64 = vector.shape_cast %63 : vector<1x17x17xf32> to vector<17x17xf32>
    %c12 = arith.constant 12 : index
    %65 = memref.load %arg1[%c12] : memref<162xf32, #tpu.memory_space<smem>>
    %66 = vector.broadcast %65 : f32 to vector<17x17xf32>
    %67 = arith.mulf %66, %64 : vector<17x17xf32>
    %68 = arith.addf %42, %67 : vector<17x17xf32>
    %c13 = arith.constant 13 : index
    %69 = memref.load %arg1[%c13] : memref<162xf32, #tpu.memory_space<smem>>
    %70 = vector.broadcast %69 : f32 to vector<17x17xf32>
    %71 = arith.mulf %70, %64 : vector<17x17xf32>
    %72 = arith.addf %46, %71 : vector<17x17xf32>
    %c14 = arith.constant 14 : index
    %73 = memref.load %arg1[%c14] : memref<162xf32, #tpu.memory_space<smem>>
    %74 = vector.broadcast %73 : f32 to vector<17x17xf32>
    %75 = arith.mulf %74, %64 : vector<17x17xf32>
    %76 = arith.addf %50, %75 : vector<17x17xf32>
    %c15 = arith.constant 15 : index
    %77 = memref.load %arg1[%c15] : memref<162xf32, #tpu.memory_space<smem>>
    %78 = vector.broadcast %77 : f32 to vector<17x17xf32>
    %79 = arith.mulf %78, %64 : vector<17x17xf32>
    %80 = arith.addf %54, %79 : vector<17x17xf32>
    %c16 = arith.constant 16 : index
    %81 = memref.load %arg1[%c16] : memref<162xf32, #tpu.memory_space<smem>>
    %82 = vector.broadcast %81 : f32 to vector<17x17xf32>
    %83 = arith.mulf %82, %64 : vector<17x17xf32>
    %84 = arith.addf %58, %83 : vector<17x17xf32>
    %c17 = arith.constant 17 : index
    %85 = memref.load %arg1[%c17] : memref<162xf32, #tpu.memory_space<smem>>
    %86 = vector.broadcast %85 : f32 to vector<17x17xf32>
    %87 = arith.mulf %86, %64 : vector<17x17xf32>
    %88 = arith.addf %62, %87 : vector<17x17xf32>
    %c0_25 = arith.constant 0 : index
    %c0_26 = arith.constant 0 : index
    %c1_27 = arith.constant 1 : index
    %89 = vector.load %arg5[%c0_25, %c0_26, %c1_27] : memref<3x19x19xf32, #tpu.memory_space<vmem>>, vector<1x17x17xf32>
    %90 = vector.shape_cast %89 : vector<1x17x17xf32> to vector<17x17xf32>
    %c18 = arith.constant 18 : index
    %91 = memref.load %arg1[%c18] : memref<162xf32, #tpu.memory_space<smem>>
    %92 = vector.broadcast %91 : f32 to vector<17x17xf32>
    %93 = arith.mulf %92, %90 : vector<17x17xf32>
    %94 = arith.addf %68, %93 : vector<17x17xf32>
    %c19 = arith.constant 19 : index
    %95 = memref.load %arg1[%c19] : memref<162xf32, #tpu.memory_space<smem>>
    %96 = vector.broadcast %95 : f32 to vector<17x17xf32>
    %97 = arith.mulf %96, %90 : vector<17x17xf32>
    %98 = arith.addf %72, %97 : vector<17x17xf32>
    %c20 = arith.constant 20 : index
    %99 = memref.load %arg1[%c20] : memref<162xf32, #tpu.memory_space<smem>>
    %100 = vector.broadcast %99 : f32 to vector<17x17xf32>
    %101 = arith.mulf %100, %90 : vector<17x17xf32>
    %102 = arith.addf %76, %101 : vector<17x17xf32>
    %c21 = arith.constant 21 : index
    %103 = memref.load %arg1[%c21] : memref<162xf32, #tpu.memory_space<smem>>
    %104 = vector.broadcast %103 : f32 to vector<17x17xf32>
    %105 = arith.mulf %104, %90 : vector<17x17xf32>
    %106 = arith.addf %80, %105 : vector<17x17xf32>
    %c22 = arith.constant 22 : index
    %107 = memref.load %arg1[%c22] : memref<162xf32, #tpu.memory_space<smem>>
    %108 = vector.broadcast %107 : f32 to vector<17x17xf32>
    %109 = arith.mulf %108, %90 : vector<17x17xf32>
    %110 = arith.addf %84, %109 : vector<17x17xf32>
    %c23 = arith.constant 23 : index
    %111 = memref.load %arg1[%c23] : memref<162xf32, #tpu.memory_space<smem>>
    %112 = vector.broadcast %111 : f32 to vector<17x17xf32>
    %113 = arith.mulf %112, %90 : vector<17x17xf32>
    %114 = arith.addf %88, %113 : vector<17x17xf32>
    %c1_28 = arith.constant 1 : index
    %c0_29 = arith.constant 0 : index
    %c1_30 = arith.constant 1 : index
    %115 = vector.load %arg5[%c1_28, %c0_29, %c1_30] : memref<3x19x19xf32, #tpu.memory_space<vmem>>, vector<1x17x17xf32>
    %116 = vector.shape_cast %115 : vector<1x17x17xf32> to vector<17x17xf32>
    %c24 = arith.constant 24 : index
    %117 = memref.load %arg1[%c24] : memref<162xf32, #tpu.memory_space<smem>>
    %118 = vector.broadcast %117 : f32 to vector<17x17xf32>
    %119 = arith.mulf %118, %116 : vector<17x17xf32>
    %120 = arith.addf %94, %119 : vector<17x17xf32>
    %c25 = arith.constant 25 : index
    %121 = memref.load %arg1[%c25] : memref<162xf32, #tpu.memory_space<smem>>
    %122 = vector.broadcast %121 : f32 to vector<17x17xf32>
    %123 = arith.mulf %122, %116 : vector<17x17xf32>
    %124 = arith.addf %98, %123 : vector<17x17xf32>
    %c26 = arith.constant 26 : index
    %125 = memref.load %arg1[%c26] : memref<162xf32, #tpu.memory_space<smem>>
    %126 = vector.broadcast %125 : f32 to vector<17x17xf32>
    %127 = arith.mulf %126, %116 : vector<17x17xf32>
    %128 = arith.addf %102, %127 : vector<17x17xf32>
    %c27 = arith.constant 27 : index
    %129 = memref.load %arg1[%c27] : memref<162xf32, #tpu.memory_space<smem>>
    %130 = vector.broadcast %129 : f32 to vector<17x17xf32>
    %131 = arith.mulf %130, %116 : vector<17x17xf32>
    %132 = arith.addf %106, %131 : vector<17x17xf32>
    %c28 = arith.constant 28 : index
    %133 = memref.load %arg1[%c28] : memref<162xf32, #tpu.memory_space<smem>>
    %134 = vector.broadcast %133 : f32 to vector<17x17xf32>
    %135 = arith.mulf %134, %116 : vector<17x17xf32>
    %136 = arith.addf %110, %135 : vector<17x17xf32>
    %c29 = arith.constant 29 : index
    %137 = memref.load %arg1[%c29] : memref<162xf32, #tpu.memory_space<smem>>
    %138 = vector.broadcast %137 : f32 to vector<17x17xf32>
    %139 = arith.mulf %138, %116 : vector<17x17xf32>
    %140 = arith.addf %114, %139 : vector<17x17xf32>
    %c2_31 = arith.constant 2 : index
    %c0_32 = arith.constant 0 : index
    %c1_33 = arith.constant 1 : index
    %141 = vector.load %arg5[%c2_31, %c0_32, %c1_33] : memref<3x19x19xf32, #tpu.memory_space<vmem>>, vector<1x17x17xf32>
    %142 = vector.shape_cast %141 : vector<1x17x17xf32> to vector<17x17xf32>
    %c30 = arith.constant 30 : index
    %143 = memref.load %arg1[%c30] : memref<162xf32, #tpu.memory_space<smem>>
    %144 = vector.broadcast %143 : f32 to vector<17x17xf32>
    %145 = arith.mulf %144, %142 : vector<17x17xf32>
    %146 = arith.addf %120, %145 : vector<17x17xf32>
    %c31 = arith.constant 31 : index
    %147 = memref.load %arg1[%c31] : memref<162xf32, #tpu.memory_space<smem>>
    %148 = vector.broadcast %147 : f32 to vector<17x17xf32>
    %149 = arith.mulf %148, %142 : vector<17x17xf32>
    %150 = arith.addf %124, %149 : vector<17x17xf32>
    %c32 = arith.constant 32 : index
    %151 = memref.load %arg1[%c32] : memref<162xf32, #tpu.memory_space<smem>>
    %152 = vector.broadcast %151 : f32 to vector<17x17xf32>
    %153 = arith.mulf %152, %142 : vector<17x17xf32>
    %154 = arith.addf %128, %153 : vector<17x17xf32>
    %c33 = arith.constant 33 : index
    %155 = memref.load %arg1[%c33] : memref<162xf32, #tpu.memory_space<smem>>
    %156 = vector.broadcast %155 : f32 to vector<17x17xf32>
    %157 = arith.mulf %156, %142 : vector<17x17xf32>
    %158 = arith.addf %132, %157 : vector<17x17xf32>
    %c34 = arith.constant 34 : index
    %159 = memref.load %arg1[%c34] : memref<162xf32, #tpu.memory_space<smem>>
    %160 = vector.broadcast %159 : f32 to vector<17x17xf32>
    %161 = arith.mulf %160, %142 : vector<17x17xf32>
    %162 = arith.addf %136, %161 : vector<17x17xf32>
    %c35 = arith.constant 35 : index
    %163 = memref.load %arg1[%c35] : memref<162xf32, #tpu.memory_space<smem>>
    %164 = vector.broadcast %163 : f32 to vector<17x17xf32>
    %165 = arith.mulf %164, %142 : vector<17x17xf32>
    %166 = arith.addf %140, %165 : vector<17x17xf32>
    %c0_34 = arith.constant 0 : index
    %c0_35 = arith.constant 0 : index
    %c2_36 = arith.constant 2 : index
    %167 = vector.load %arg5[%c0_34, %c0_35, %c2_36] : memref<3x19x19xf32, #tpu.memory_space<vmem>>, vector<1x17x17xf32>
    %168 = vector.shape_cast %167 : vector<1x17x17xf32> to vector<17x17xf32>
    %c36 = arith.constant 36 : index
    %169 = memref.load %arg1[%c36] : memref<162xf32, #tpu.memory_space<smem>>
    %170 = vector.broadcast %169 : f32 to vector<17x17xf32>
    %171 = arith.mulf %170, %168 : vector<17x17xf32>
    %172 = arith.addf %146, %171 : vector<17x17xf32>
    %c37 = arith.constant 37 : index
    %173 = memref.load %arg1[%c37] : memref<162xf32, #tpu.memory_space<smem>>
    %174 = vector.broadcast %173 : f32 to vector<17x17xf32>
    %175 = arith.mulf %174, %168 : vector<17x17xf32>
    %176 = arith.addf %150, %175 : vector<17x17xf32>
    %c38 = arith.constant 38 : index
    %177 = memref.load %arg1[%c38] : memref<162xf32, #tpu.memory_space<smem>>
    %178 = vector.broadcast %177 : f32 to vector<17x17xf32>
    %179 = arith.mulf %178, %168 : vector<17x17xf32>
    %180 = arith.addf %154, %179 : vector<17x17xf32>
    %c39 = arith.constant 39 : index
    %181 = memref.load %arg1[%c39] : memref<162xf32, #tpu.memory_space<smem>>
    %182 = vector.broadcast %181 : f32 to vector<17x17xf32>
    %183 = arith.mulf %182, %168 : vector<17x17xf32>
    %184 = arith.addf %158, %183 : vector<17x17xf32>
    %c40 = arith.constant 40 : index
    %185 = memref.load %arg1[%c40] : memref<162xf32, #tpu.memory_space<smem>>
    %186 = vector.broadcast %185 : f32 to vector<17x17xf32>
    %187 = arith.mulf %186, %168 : vector<17x17xf32>
    %188 = arith.addf %162, %187 : vector<17x17xf32>
    %c41 = arith.constant 41 : index
    %189 = memref.load %arg1[%c41] : memref<162xf32, #tpu.memory_space<smem>>
    %190 = vector.broadcast %189 : f32 to vector<17x17xf32>
    %191 = arith.mulf %190, %168 : vector<17x17xf32>
    %192 = arith.addf %166, %191 : vector<17x17xf32>
    %c1_37 = arith.constant 1 : index
    %c0_38 = arith.constant 0 : index
    %c2_39 = arith.constant 2 : index
    %193 = vector.load %arg5[%c1_37, %c0_38, %c2_39] : memref<3x19x19xf32, #tpu.memory_space<vmem>>, vector<1x17x17xf32>
    %194 = vector.shape_cast %193 : vector<1x17x17xf32> to vector<17x17xf32>
    %c42 = arith.constant 42 : index
    %195 = memref.load %arg1[%c42] : memref<162xf32, #tpu.memory_space<smem>>
    %196 = vector.broadcast %195 : f32 to vector<17x17xf32>
    %197 = arith.mulf %196, %194 : vector<17x17xf32>
    %198 = arith.addf %172, %197 : vector<17x17xf32>
    %c43 = arith.constant 43 : index
    %199 = memref.load %arg1[%c43] : memref<162xf32, #tpu.memory_space<smem>>
    %200 = vector.broadcast %199 : f32 to vector<17x17xf32>
    %201 = arith.mulf %200, %194 : vector<17x17xf32>
    %202 = arith.addf %176, %201 : vector<17x17xf32>
    %c44 = arith.constant 44 : index
    %203 = memref.load %arg1[%c44] : memref<162xf32, #tpu.memory_space<smem>>
    %204 = vector.broadcast %203 : f32 to vector<17x17xf32>
    %205 = arith.mulf %204, %194 : vector<17x17xf32>
    %206 = arith.addf %180, %205 : vector<17x17xf32>
    %c45 = arith.constant 45 : index
    %207 = memref.load %arg1[%c45] : memref<162xf32, #tpu.memory_space<smem>>
    %208 = vector.broadcast %207 : f32 to vector<17x17xf32>
    %209 = arith.mulf %208, %194 : vector<17x17xf32>
    %210 = arith.addf %184, %209 : vector<17x17xf32>
    %c46 = arith.constant 46 : index
    %211 = memref.load %arg1[%c46] : memref<162xf32, #tpu.memory_space<smem>>
    %212 = vector.broadcast %211 : f32 to vector<17x17xf32>
    %213 = arith.mulf %212, %194 : vector<17x17xf32>
    %214 = arith.addf %188, %213 : vector<17x17xf32>
    %c47 = arith.constant 47 : index
    %215 = memref.load %arg1[%c47] : memref<162xf32, #tpu.memory_space<smem>>
    %216 = vector.broadcast %215 : f32 to vector<17x17xf32>
    %217 = arith.mulf %216, %194 : vector<17x17xf32>
    %218 = arith.addf %192, %217 : vector<17x17xf32>
    %c2_40 = arith.constant 2 : index
    %c0_41 = arith.constant 0 : index
    %c2_42 = arith.constant 2 : index
    %219 = vector.load %arg5[%c2_40, %c0_41, %c2_42] : memref<3x19x19xf32, #tpu.memory_space<vmem>>, vector<1x17x17xf32>
    %220 = vector.shape_cast %219 : vector<1x17x17xf32> to vector<17x17xf32>
    %c48 = arith.constant 48 : index
    %221 = memref.load %arg1[%c48] : memref<162xf32, #tpu.memory_space<smem>>
    %222 = vector.broadcast %221 : f32 to vector<17x17xf32>
    %223 = arith.mulf %222, %220 : vector<17x17xf32>
    %224 = arith.addf %198, %223 : vector<17x17xf32>
    %c49 = arith.constant 49 : index
    %225 = memref.load %arg1[%c49] : memref<162xf32, #tpu.memory_space<smem>>
    %226 = vector.broadcast %225 : f32 to vector<17x17xf32>
    %227 = arith.mulf %226, %220 : vector<17x17xf32>
    %228 = arith.addf %202, %227 : vector<17x17xf32>
    %c50 = arith.constant 50 : index
    %229 = memref.load %arg1[%c50] : memref<162xf32, #tpu.memory_space<smem>>
    %230 = vector.broadcast %229 : f32 to vector<17x17xf32>
    %231 = arith.mulf %230, %220 : vector<17x17xf32>
    %232 = arith.addf %206, %231 : vector<17x17xf32>
    %c51 = arith.constant 51 : index
    %233 = memref.load %arg1[%c51] : memref<162xf32, #tpu.memory_space<smem>>
    %234 = vector.broadcast %233 : f32 to vector<17x17xf32>
    %235 = arith.mulf %234, %220 : vector<17x17xf32>
    %236 = arith.addf %210, %235 : vector<17x17xf32>
    %c52 = arith.constant 52 : index
    %237 = memref.load %arg1[%c52] : memref<162xf32, #tpu.memory_space<smem>>
    %238 = vector.broadcast %237 : f32 to vector<17x17xf32>
    %239 = arith.mulf %238, %220 : vector<17x17xf32>
    %240 = arith.addf %214, %239 : vector<17x17xf32>
    %c53 = arith.constant 53 : index
    %241 = memref.load %arg1[%c53] : memref<162xf32, #tpu.memory_space<smem>>
    %242 = vector.broadcast %241 : f32 to vector<17x17xf32>
    %243 = arith.mulf %242, %220 : vector<17x17xf32>
    %244 = arith.addf %218, %243 : vector<17x17xf32>
    %c0_43 = arith.constant 0 : index
    %c1_44 = arith.constant 1 : index
    %c0_45 = arith.constant 0 : index
    %245 = vector.load %arg5[%c0_43, %c1_44, %c0_45] : memref<3x19x19xf32, #tpu.memory_space<vmem>>, vector<1x17x17xf32>
    %246 = vector.shape_cast %245 : vector<1x17x17xf32> to vector<17x17xf32>
    %c54 = arith.constant 54 : index
    %247 = memref.load %arg1[%c54] : memref<162xf32, #tpu.memory_space<smem>>
    %248 = vector.broadcast %247 : f32 to vector<17x17xf32>
    %249 = arith.mulf %248, %246 : vector<17x17xf32>
    %250 = arith.addf %224, %249 : vector<17x17xf32>
    %c55 = arith.constant 55 : index
    %251 = memref.load %arg1[%c55] : memref<162xf32, #tpu.memory_space<smem>>
    %252 = vector.broadcast %251 : f32 to vector<17x17xf32>
    %253 = arith.mulf %252, %246 : vector<17x17xf32>
    %254 = arith.addf %228, %253 : vector<17x17xf32>
    %c56 = arith.constant 56 : index
    %255 = memref.load %arg1[%c56] : memref<162xf32, #tpu.memory_space<smem>>
    %256 = vector.broadcast %255 : f32 to vector<17x17xf32>
    %257 = arith.mulf %256, %246 : vector<17x17xf32>
    %258 = arith.addf %232, %257 : vector<17x17xf32>
    %c57 = arith.constant 57 : index
    %259 = memref.load %arg1[%c57] : memref<162xf32, #tpu.memory_space<smem>>
    %260 = vector.broadcast %259 : f32 to vector<17x17xf32>
    %261 = arith.mulf %260, %246 : vector<17x17xf32>
    %262 = arith.addf %236, %261 : vector<17x17xf32>
    %c58 = arith.constant 58 : index
    %263 = memref.load %arg1[%c58] : memref<162xf32, #tpu.memory_space<smem>>
    %264 = vector.broadcast %263 : f32 to vector<17x17xf32>
    %265 = arith.mulf %264, %246 : vector<17x17xf32>
    %266 = arith.addf %240, %265 : vector<17x17xf32>
    %c59 = arith.constant 59 : index
    %267 = memref.load %arg1[%c59] : memref<162xf32, #tpu.memory_space<smem>>
    %268 = vector.broadcast %267 : f32 to vector<17x17xf32>
    %269 = arith.mulf %268, %246 : vector<17x17xf32>
    %270 = arith.addf %244, %269 : vector<17x17xf32>
    %c1_46 = arith.constant 1 : index
    %c1_47 = arith.constant 1 : index
    %c0_48 = arith.constant 0 : index
    %271 = vector.load %arg5[%c1_46, %c1_47, %c0_48] : memref<3x19x19xf32, #tpu.memory_space<vmem>>, vector<1x17x17xf32>
    %272 = vector.shape_cast %271 : vector<1x17x17xf32> to vector<17x17xf32>
    %c60 = arith.constant 60 : index
    %273 = memref.load %arg1[%c60] : memref<162xf32, #tpu.memory_space<smem>>
    %274 = vector.broadcast %273 : f32 to vector<17x17xf32>
    %275 = arith.mulf %274, %272 : vector<17x17xf32>
    %276 = arith.addf %250, %275 : vector<17x17xf32>
    %c61 = arith.constant 61 : index
    %277 = memref.load %arg1[%c61] : memref<162xf32, #tpu.memory_space<smem>>
    %278 = vector.broadcast %277 : f32 to vector<17x17xf32>
    %279 = arith.mulf %278, %272 : vector<17x17xf32>
    %280 = arith.addf %254, %279 : vector<17x17xf32>
    %c62 = arith.constant 62 : index
    %281 = memref.load %arg1[%c62] : memref<162xf32, #tpu.memory_space<smem>>
    %282 = vector.broadcast %281 : f32 to vector<17x17xf32>
    %283 = arith.mulf %282, %272 : vector<17x17xf32>
    %284 = arith.addf %258, %283 : vector<17x17xf32>
    %c63 = arith.constant 63 : index
    %285 = memref.load %arg1[%c63] : memref<162xf32, #tpu.memory_space<smem>>
    %286 = vector.broadcast %285 : f32 to vector<17x17xf32>
    %287 = arith.mulf %286, %272 : vector<17x17xf32>
    %288 = arith.addf %262, %287 : vector<17x17xf32>
    %c64 = arith.constant 64 : index
    %289 = memref.load %arg1[%c64] : memref<162xf32, #tpu.memory_space<smem>>
    %290 = vector.broadcast %289 : f32 to vector<17x17xf32>
    %291 = arith.mulf %290, %272 : vector<17x17xf32>
    %292 = arith.addf %266, %291 : vector<17x17xf32>
    %c65 = arith.constant 65 : index
    %293 = memref.load %arg1[%c65] : memref<162xf32, #tpu.memory_space<smem>>
    %294 = vector.broadcast %293 : f32 to vector<17x17xf32>
    %295 = arith.mulf %294, %272 : vector<17x17xf32>
    %296 = arith.addf %270, %295 : vector<17x17xf32>
    %c2_49 = arith.constant 2 : index
    %c1_50 = arith.constant 1 : index
    %c0_51 = arith.constant 0 : index
    %297 = vector.load %arg5[%c2_49, %c1_50, %c0_51] : memref<3x19x19xf32, #tpu.memory_space<vmem>>, vector<1x17x17xf32>
    %298 = vector.shape_cast %297 : vector<1x17x17xf32> to vector<17x17xf32>
    %c66 = arith.constant 66 : index
    %299 = memref.load %arg1[%c66] : memref<162xf32, #tpu.memory_space<smem>>
    %300 = vector.broadcast %299 : f32 to vector<17x17xf32>
    %301 = arith.mulf %300, %298 : vector<17x17xf32>
    %302 = arith.addf %276, %301 : vector<17x17xf32>
    %c67 = arith.constant 67 : index
    %303 = memref.load %arg1[%c67] : memref<162xf32, #tpu.memory_space<smem>>
    %304 = vector.broadcast %303 : f32 to vector<17x17xf32>
    %305 = arith.mulf %304, %298 : vector<17x17xf32>
    %306 = arith.addf %280, %305 : vector<17x17xf32>
    %c68 = arith.constant 68 : index
    %307 = memref.load %arg1[%c68] : memref<162xf32, #tpu.memory_space<smem>>
    %308 = vector.broadcast %307 : f32 to vector<17x17xf32>
    %309 = arith.mulf %308, %298 : vector<17x17xf32>
    %310 = arith.addf %284, %309 : vector<17x17xf32>
    %c69 = arith.constant 69 : index
    %311 = memref.load %arg1[%c69] : memref<162xf32, #tpu.memory_space<smem>>
    %312 = vector.broadcast %311 : f32 to vector<17x17xf32>
    %313 = arith.mulf %312, %298 : vector<17x17xf32>
    %314 = arith.addf %288, %313 : vector<17x17xf32>
    %c70 = arith.constant 70 : index
    %315 = memref.load %arg1[%c70] : memref<162xf32, #tpu.memory_space<smem>>
    %316 = vector.broadcast %315 : f32 to vector<17x17xf32>
    %317 = arith.mulf %316, %298 : vector<17x17xf32>
    %318 = arith.addf %292, %317 : vector<17x17xf32>
    %c71 = arith.constant 71 : index
    %319 = memref.load %arg1[%c71] : memref<162xf32, #tpu.memory_space<smem>>
    %320 = vector.broadcast %319 : f32 to vector<17x17xf32>
    %321 = arith.mulf %320, %298 : vector<17x17xf32>
    %322 = arith.addf %296, %321 : vector<17x17xf32>
    %c0_52 = arith.constant 0 : index
    %c1_53 = arith.constant 1 : index
    %c1_54 = arith.constant 1 : index
    %323 = vector.load %arg5[%c0_52, %c1_53, %c1_54] : memref<3x19x19xf32, #tpu.memory_space<vmem>>, vector<1x17x17xf32>
    %324 = vector.shape_cast %323 : vector<1x17x17xf32> to vector<17x17xf32>
    %c72 = arith.constant 72 : index
    %325 = memref.load %arg1[%c72] : memref<162xf32, #tpu.memory_space<smem>>
    %326 = vector.broadcast %325 : f32 to vector<17x17xf32>
    %327 = arith.mulf %326, %324 : vector<17x17xf32>
    %328 = arith.addf %302, %327 : vector<17x17xf32>
    %c73 = arith.constant 73 : index
    %329 = memref.load %arg1[%c73] : memref<162xf32, #tpu.memory_space<smem>>
    %330 = vector.broadcast %329 : f32 to vector<17x17xf32>
    %331 = arith.mulf %330, %324 : vector<17x17xf32>
    %332 = arith.addf %306, %331 : vector<17x17xf32>
    %c74 = arith.constant 74 : index
    %333 = memref.load %arg1[%c74] : memref<162xf32, #tpu.memory_space<smem>>
    %334 = vector.broadcast %333 : f32 to vector<17x17xf32>
    %335 = arith.mulf %334, %324 : vector<17x17xf32>
    %336 = arith.addf %310, %335 : vector<17x17xf32>
    %c75 = arith.constant 75 : index
    %337 = memref.load %arg1[%c75] : memref<162xf32, #tpu.memory_space<smem>>
    %338 = vector.broadcast %337 : f32 to vector<17x17xf32>
    %339 = arith.mulf %338, %324 : vector<17x17xf32>
    %340 = arith.addf %314, %339 : vector<17x17xf32>
    %c76 = arith.constant 76 : index
    %341 = memref.load %arg1[%c76] : memref<162xf32, #tpu.memory_space<smem>>
    %342 = vector.broadcast %341 : f32 to vector<17x17xf32>
    %343 = arith.mulf %342, %324 : vector<17x17xf32>
    %344 = arith.addf %318, %343 : vector<17x17xf32>
    %c77 = arith.constant 77 : index
    %345 = memref.load %arg1[%c77] : memref<162xf32, #tpu.memory_space<smem>>
    %346 = vector.broadcast %345 : f32 to vector<17x17xf32>
    %347 = arith.mulf %346, %324 : vector<17x17xf32>
    %348 = arith.addf %322, %347 : vector<17x17xf32>
    %c1_55 = arith.constant 1 : index
    %c1_56 = arith.constant 1 : index
    %c1_57 = arith.constant 1 : index
    %349 = vector.load %arg5[%c1_55, %c1_56, %c1_57] : memref<3x19x19xf32, #tpu.memory_space<vmem>>, vector<1x17x17xf32>
    %350 = vector.shape_cast %349 : vector<1x17x17xf32> to vector<17x17xf32>
    %c78 = arith.constant 78 : index
    %351 = memref.load %arg1[%c78] : memref<162xf32, #tpu.memory_space<smem>>
    %352 = vector.broadcast %351 : f32 to vector<17x17xf32>
    %353 = arith.mulf %352, %350 : vector<17x17xf32>
    %354 = arith.addf %328, %353 : vector<17x17xf32>
    %c79 = arith.constant 79 : index
    %355 = memref.load %arg1[%c79] : memref<162xf32, #tpu.memory_space<smem>>
    %356 = vector.broadcast %355 : f32 to vector<17x17xf32>
    %357 = arith.mulf %356, %350 : vector<17x17xf32>
    %358 = arith.addf %332, %357 : vector<17x17xf32>
    %c80 = arith.constant 80 : index
    %359 = memref.load %arg1[%c80] : memref<162xf32, #tpu.memory_space<smem>>
    %360 = vector.broadcast %359 : f32 to vector<17x17xf32>
    %361 = arith.mulf %360, %350 : vector<17x17xf32>
    %362 = arith.addf %336, %361 : vector<17x17xf32>
    %c81 = arith.constant 81 : index
    %363 = memref.load %arg1[%c81] : memref<162xf32, #tpu.memory_space<smem>>
    %364 = vector.broadcast %363 : f32 to vector<17x17xf32>
    %365 = arith.mulf %364, %350 : vector<17x17xf32>
    %366 = arith.addf %340, %365 : vector<17x17xf32>
    %c82 = arith.constant 82 : index
    %367 = memref.load %arg1[%c82] : memref<162xf32, #tpu.memory_space<smem>>
    %368 = vector.broadcast %367 : f32 to vector<17x17xf32>
    %369 = arith.mulf %368, %350 : vector<17x17xf32>
    %370 = arith.addf %344, %369 : vector<17x17xf32>
    %c83 = arith.constant 83 : index
    %371 = memref.load %arg1[%c83] : memref<162xf32, #tpu.memory_space<smem>>
    %372 = vector.broadcast %371 : f32 to vector<17x17xf32>
    %373 = arith.mulf %372, %350 : vector<17x17xf32>
    %374 = arith.addf %348, %373 : vector<17x17xf32>
    %c2_58 = arith.constant 2 : index
    %c1_59 = arith.constant 1 : index
    %c1_60 = arith.constant 1 : index
    %375 = vector.load %arg5[%c2_58, %c1_59, %c1_60] : memref<3x19x19xf32, #tpu.memory_space<vmem>>, vector<1x17x17xf32>
    %376 = vector.shape_cast %375 : vector<1x17x17xf32> to vector<17x17xf32>
    %c84 = arith.constant 84 : index
    %377 = memref.load %arg1[%c84] : memref<162xf32, #tpu.memory_space<smem>>
    %378 = vector.broadcast %377 : f32 to vector<17x17xf32>
    %379 = arith.mulf %378, %376 : vector<17x17xf32>
    %380 = arith.addf %354, %379 : vector<17x17xf32>
    %c85 = arith.constant 85 : index
    %381 = memref.load %arg1[%c85] : memref<162xf32, #tpu.memory_space<smem>>
    %382 = vector.broadcast %381 : f32 to vector<17x17xf32>
    %383 = arith.mulf %382, %376 : vector<17x17xf32>
    %384 = arith.addf %358, %383 : vector<17x17xf32>
    %c86 = arith.constant 86 : index
    %385 = memref.load %arg1[%c86] : memref<162xf32, #tpu.memory_space<smem>>
    %386 = vector.broadcast %385 : f32 to vector<17x17xf32>
    %387 = arith.mulf %386, %376 : vector<17x17xf32>
    %388 = arith.addf %362, %387 : vector<17x17xf32>
    %c87 = arith.constant 87 : index
    %389 = memref.load %arg1[%c87] : memref<162xf32, #tpu.memory_space<smem>>
    %390 = vector.broadcast %389 : f32 to vector<17x17xf32>
    %391 = arith.mulf %390, %376 : vector<17x17xf32>
    %392 = arith.addf %366, %391 : vector<17x17xf32>
    %c88 = arith.constant 88 : index
    %393 = memref.load %arg1[%c88] : memref<162xf32, #tpu.memory_space<smem>>
    %394 = vector.broadcast %393 : f32 to vector<17x17xf32>
    %395 = arith.mulf %394, %376 : vector<17x17xf32>
    %396 = arith.addf %370, %395 : vector<17x17xf32>
    %c89 = arith.constant 89 : index
    %397 = memref.load %arg1[%c89] : memref<162xf32, #tpu.memory_space<smem>>
    %398 = vector.broadcast %397 : f32 to vector<17x17xf32>
    %399 = arith.mulf %398, %376 : vector<17x17xf32>
    %400 = arith.addf %374, %399 : vector<17x17xf32>
    %c0_61 = arith.constant 0 : index
    %c1_62 = arith.constant 1 : index
    %c2_63 = arith.constant 2 : index
    %401 = vector.load %arg5[%c0_61, %c1_62, %c2_63] : memref<3x19x19xf32, #tpu.memory_space<vmem>>, vector<1x17x17xf32>
    %402 = vector.shape_cast %401 : vector<1x17x17xf32> to vector<17x17xf32>
    %c90 = arith.constant 90 : index
    %403 = memref.load %arg1[%c90] : memref<162xf32, #tpu.memory_space<smem>>
    %404 = vector.broadcast %403 : f32 to vector<17x17xf32>
    %405 = arith.mulf %404, %402 : vector<17x17xf32>
    %406 = arith.addf %380, %405 : vector<17x17xf32>
    %c91 = arith.constant 91 : index
    %407 = memref.load %arg1[%c91] : memref<162xf32, #tpu.memory_space<smem>>
    %408 = vector.broadcast %407 : f32 to vector<17x17xf32>
    %409 = arith.mulf %408, %402 : vector<17x17xf32>
    %410 = arith.addf %384, %409 : vector<17x17xf32>
    %c92 = arith.constant 92 : index
    %411 = memref.load %arg1[%c92] : memref<162xf32, #tpu.memory_space<smem>>
    %412 = vector.broadcast %411 : f32 to vector<17x17xf32>
    %413 = arith.mulf %412, %402 : vector<17x17xf32>
    %414 = arith.addf %388, %413 : vector<17x17xf32>
    %c93 = arith.constant 93 : index
    %415 = memref.load %arg1[%c93] : memref<162xf32, #tpu.memory_space<smem>>
    %416 = vector.broadcast %415 : f32 to vector<17x17xf32>
    %417 = arith.mulf %416, %402 : vector<17x17xf32>
    %418 = arith.addf %392, %417 : vector<17x17xf32>
    %c94 = arith.constant 94 : index
    %419 = memref.load %arg1[%c94] : memref<162xf32, #tpu.memory_space<smem>>
    %420 = vector.broadcast %419 : f32 to vector<17x17xf32>
    %421 = arith.mulf %420, %402 : vector<17x17xf32>
    %422 = arith.addf %396, %421 : vector<17x17xf32>
    %c95 = arith.constant 95 : index
    %423 = memref.load %arg1[%c95] : memref<162xf32, #tpu.memory_space<smem>>
    %424 = vector.broadcast %423 : f32 to vector<17x17xf32>
    %425 = arith.mulf %424, %402 : vector<17x17xf32>
    %426 = arith.addf %400, %425 : vector<17x17xf32>
    %c1_64 = arith.constant 1 : index
    %c1_65 = arith.constant 1 : index
    %c2_66 = arith.constant 2 : index
    %427 = vector.load %arg5[%c1_64, %c1_65, %c2_66] : memref<3x19x19xf32, #tpu.memory_space<vmem>>, vector<1x17x17xf32>
    %428 = vector.shape_cast %427 : vector<1x17x17xf32> to vector<17x17xf32>
    %c96 = arith.constant 96 : index
    %429 = memref.load %arg1[%c96] : memref<162xf32, #tpu.memory_space<smem>>
    %430 = vector.broadcast %429 : f32 to vector<17x17xf32>
    %431 = arith.mulf %430, %428 : vector<17x17xf32>
    %432 = arith.addf %406, %431 : vector<17x17xf32>
    %c97 = arith.constant 97 : index
    %433 = memref.load %arg1[%c97] : memref<162xf32, #tpu.memory_space<smem>>
    %434 = vector.broadcast %433 : f32 to vector<17x17xf32>
    %435 = arith.mulf %434, %428 : vector<17x17xf32>
    %436 = arith.addf %410, %435 : vector<17x17xf32>
    %c98 = arith.constant 98 : index
    %437 = memref.load %arg1[%c98] : memref<162xf32, #tpu.memory_space<smem>>
    %438 = vector.broadcast %437 : f32 to vector<17x17xf32>
    %439 = arith.mulf %438, %428 : vector<17x17xf32>
    %440 = arith.addf %414, %439 : vector<17x17xf32>
    %c99 = arith.constant 99 : index
    %441 = memref.load %arg1[%c99] : memref<162xf32, #tpu.memory_space<smem>>
    %442 = vector.broadcast %441 : f32 to vector<17x17xf32>
    %443 = arith.mulf %442, %428 : vector<17x17xf32>
    %444 = arith.addf %418, %443 : vector<17x17xf32>
    %c100 = arith.constant 100 : index
    %445 = memref.load %arg1[%c100] : memref<162xf32, #tpu.memory_space<smem>>
    %446 = vector.broadcast %445 : f32 to vector<17x17xf32>
    %447 = arith.mulf %446, %428 : vector<17x17xf32>
    %448 = arith.addf %422, %447 : vector<17x17xf32>
    %c101 = arith.constant 101 : index
    %449 = memref.load %arg1[%c101] : memref<162xf32, #tpu.memory_space<smem>>
    %450 = vector.broadcast %449 : f32 to vector<17x17xf32>
    %451 = arith.mulf %450, %428 : vector<17x17xf32>
    %452 = arith.addf %426, %451 : vector<17x17xf32>
    %c2_67 = arith.constant 2 : index
    %c1_68 = arith.constant 1 : index
    %c2_69 = arith.constant 2 : index
    %453 = vector.load %arg5[%c2_67, %c1_68, %c2_69] : memref<3x19x19xf32, #tpu.memory_space<vmem>>, vector<1x17x17xf32>
    %454 = vector.shape_cast %453 : vector<1x17x17xf32> to vector<17x17xf32>
    %c102 = arith.constant 102 : index
    %455 = memref.load %arg1[%c102] : memref<162xf32, #tpu.memory_space<smem>>
    %456 = vector.broadcast %455 : f32 to vector<17x17xf32>
    %457 = arith.mulf %456, %454 : vector<17x17xf32>
    %458 = arith.addf %432, %457 : vector<17x17xf32>
    %c103 = arith.constant 103 : index
    %459 = memref.load %arg1[%c103] : memref<162xf32, #tpu.memory_space<smem>>
    %460 = vector.broadcast %459 : f32 to vector<17x17xf32>
    %461 = arith.mulf %460, %454 : vector<17x17xf32>
    %462 = arith.addf %436, %461 : vector<17x17xf32>
    %c104 = arith.constant 104 : index
    %463 = memref.load %arg1[%c104] : memref<162xf32, #tpu.memory_space<smem>>
    %464 = vector.broadcast %463 : f32 to vector<17x17xf32>
    %465 = arith.mulf %464, %454 : vector<17x17xf32>
    %466 = arith.addf %440, %465 : vector<17x17xf32>
    %c105 = arith.constant 105 : index
    %467 = memref.load %arg1[%c105] : memref<162xf32, #tpu.memory_space<smem>>
    %468 = vector.broadcast %467 : f32 to vector<17x17xf32>
    %469 = arith.mulf %468, %454 : vector<17x17xf32>
    %470 = arith.addf %444, %469 : vector<17x17xf32>
    %c106 = arith.constant 106 : index
    %471 = memref.load %arg1[%c106] : memref<162xf32, #tpu.memory_space<smem>>
    %472 = vector.broadcast %471 : f32 to vector<17x17xf32>
    %473 = arith.mulf %472, %454 : vector<17x17xf32>
    %474 = arith.addf %448, %473 : vector<17x17xf32>
    %c107 = arith.constant 107 : index
    %475 = memref.load %arg1[%c107] : memref<162xf32, #tpu.memory_space<smem>>
    %476 = vector.broadcast %475 : f32 to vector<17x17xf32>
    %477 = arith.mulf %476, %454 : vector<17x17xf32>
    %478 = arith.addf %452, %477 : vector<17x17xf32>
    %c0_70 = arith.constant 0 : index
    %c2_71 = arith.constant 2 : index
    %c0_72 = arith.constant 0 : index
    %479 = vector.load %arg5[%c0_70, %c2_71, %c0_72] : memref<3x19x19xf32, #tpu.memory_space<vmem>>, vector<1x17x17xf32>
    %480 = vector.shape_cast %479 : vector<1x17x17xf32> to vector<17x17xf32>
    %c108 = arith.constant 108 : index
    %481 = memref.load %arg1[%c108] : memref<162xf32, #tpu.memory_space<smem>>
    %482 = vector.broadcast %481 : f32 to vector<17x17xf32>
    %483 = arith.mulf %482, %480 : vector<17x17xf32>
    %484 = arith.addf %458, %483 : vector<17x17xf32>
    %c109 = arith.constant 109 : index
    %485 = memref.load %arg1[%c109] : memref<162xf32, #tpu.memory_space<smem>>
    %486 = vector.broadcast %485 : f32 to vector<17x17xf32>
    %487 = arith.mulf %486, %480 : vector<17x17xf32>
    %488 = arith.addf %462, %487 : vector<17x17xf32>
    %c110 = arith.constant 110 : index
    %489 = memref.load %arg1[%c110] : memref<162xf32, #tpu.memory_space<smem>>
    %490 = vector.broadcast %489 : f32 to vector<17x17xf32>
    %491 = arith.mulf %490, %480 : vector<17x17xf32>
    %492 = arith.addf %466, %491 : vector<17x17xf32>
    %c111 = arith.constant 111 : index
    %493 = memref.load %arg1[%c111] : memref<162xf32, #tpu.memory_space<smem>>
    %494 = vector.broadcast %493 : f32 to vector<17x17xf32>
    %495 = arith.mulf %494, %480 : vector<17x17xf32>
    %496 = arith.addf %470, %495 : vector<17x17xf32>
    %c112 = arith.constant 112 : index
    %497 = memref.load %arg1[%c112] : memref<162xf32, #tpu.memory_space<smem>>
    %498 = vector.broadcast %497 : f32 to vector<17x17xf32>
    %499 = arith.mulf %498, %480 : vector<17x17xf32>
    %500 = arith.addf %474, %499 : vector<17x17xf32>
    %c113 = arith.constant 113 : index
    %501 = memref.load %arg1[%c113] : memref<162xf32, #tpu.memory_space<smem>>
    %502 = vector.broadcast %501 : f32 to vector<17x17xf32>
    %503 = arith.mulf %502, %480 : vector<17x17xf32>
    %504 = arith.addf %478, %503 : vector<17x17xf32>
    %c1_73 = arith.constant 1 : index
    %c2_74 = arith.constant 2 : index
    %c0_75 = arith.constant 0 : index
    %505 = vector.load %arg5[%c1_73, %c2_74, %c0_75] : memref<3x19x19xf32, #tpu.memory_space<vmem>>, vector<1x17x17xf32>
    %506 = vector.shape_cast %505 : vector<1x17x17xf32> to vector<17x17xf32>
    %c114 = arith.constant 114 : index
    %507 = memref.load %arg1[%c114] : memref<162xf32, #tpu.memory_space<smem>>
    %508 = vector.broadcast %507 : f32 to vector<17x17xf32>
    %509 = arith.mulf %508, %506 : vector<17x17xf32>
    %510 = arith.addf %484, %509 : vector<17x17xf32>
    %c115 = arith.constant 115 : index
    %511 = memref.load %arg1[%c115] : memref<162xf32, #tpu.memory_space<smem>>
    %512 = vector.broadcast %511 : f32 to vector<17x17xf32>
    %513 = arith.mulf %512, %506 : vector<17x17xf32>
    %514 = arith.addf %488, %513 : vector<17x17xf32>
    %c116 = arith.constant 116 : index
    %515 = memref.load %arg1[%c116] : memref<162xf32, #tpu.memory_space<smem>>
    %516 = vector.broadcast %515 : f32 to vector<17x17xf32>
    %517 = arith.mulf %516, %506 : vector<17x17xf32>
    %518 = arith.addf %492, %517 : vector<17x17xf32>
    %c117 = arith.constant 117 : index
    %519 = memref.load %arg1[%c117] : memref<162xf32, #tpu.memory_space<smem>>
    %520 = vector.broadcast %519 : f32 to vector<17x17xf32>
    %521 = arith.mulf %520, %506 : vector<17x17xf32>
    %522 = arith.addf %496, %521 : vector<17x17xf32>
    %c118 = arith.constant 118 : index
    %523 = memref.load %arg1[%c118] : memref<162xf32, #tpu.memory_space<smem>>
    %524 = vector.broadcast %523 : f32 to vector<17x17xf32>
    %525 = arith.mulf %524, %506 : vector<17x17xf32>
    %526 = arith.addf %500, %525 : vector<17x17xf32>
    %c119 = arith.constant 119 : index
    %527 = memref.load %arg1[%c119] : memref<162xf32, #tpu.memory_space<smem>>
    %528 = vector.broadcast %527 : f32 to vector<17x17xf32>
    %529 = arith.mulf %528, %506 : vector<17x17xf32>
    %530 = arith.addf %504, %529 : vector<17x17xf32>
    %c2_76 = arith.constant 2 : index
    %c2_77 = arith.constant 2 : index
    %c0_78 = arith.constant 0 : index
    %531 = vector.load %arg5[%c2_76, %c2_77, %c0_78] : memref<3x19x19xf32, #tpu.memory_space<vmem>>, vector<1x17x17xf32>
    %532 = vector.shape_cast %531 : vector<1x17x17xf32> to vector<17x17xf32>
    %c120 = arith.constant 120 : index
    %533 = memref.load %arg1[%c120] : memref<162xf32, #tpu.memory_space<smem>>
    %534 = vector.broadcast %533 : f32 to vector<17x17xf32>
    %535 = arith.mulf %534, %532 : vector<17x17xf32>
    %536 = arith.addf %510, %535 : vector<17x17xf32>
    %c121 = arith.constant 121 : index
    %537 = memref.load %arg1[%c121] : memref<162xf32, #tpu.memory_space<smem>>
    %538 = vector.broadcast %537 : f32 to vector<17x17xf32>
    %539 = arith.mulf %538, %532 : vector<17x17xf32>
    %540 = arith.addf %514, %539 : vector<17x17xf32>
    %c122 = arith.constant 122 : index
    %541 = memref.load %arg1[%c122] : memref<162xf32, #tpu.memory_space<smem>>
    %542 = vector.broadcast %541 : f32 to vector<17x17xf32>
    %543 = arith.mulf %542, %532 : vector<17x17xf32>
    %544 = arith.addf %518, %543 : vector<17x17xf32>
    %c123 = arith.constant 123 : index
    %545 = memref.load %arg1[%c123] : memref<162xf32, #tpu.memory_space<smem>>
    %546 = vector.broadcast %545 : f32 to vector<17x17xf32>
    %547 = arith.mulf %546, %532 : vector<17x17xf32>
    %548 = arith.addf %522, %547 : vector<17x17xf32>
    %c124 = arith.constant 124 : index
    %549 = memref.load %arg1[%c124] : memref<162xf32, #tpu.memory_space<smem>>
    %550 = vector.broadcast %549 : f32 to vector<17x17xf32>
    %551 = arith.mulf %550, %532 : vector<17x17xf32>
    %552 = arith.addf %526, %551 : vector<17x17xf32>
    %c125 = arith.constant 125 : index
    %553 = memref.load %arg1[%c125] : memref<162xf32, #tpu.memory_space<smem>>
    %554 = vector.broadcast %553 : f32 to vector<17x17xf32>
    %555 = arith.mulf %554, %532 : vector<17x17xf32>
    %556 = arith.addf %530, %555 : vector<17x17xf32>
    %c0_79 = arith.constant 0 : index
    %c2_80 = arith.constant 2 : index
    %c1_81 = arith.constant 1 : index
    %557 = vector.load %arg5[%c0_79, %c2_80, %c1_81] : memref<3x19x19xf32, #tpu.memory_space<vmem>>, vector<1x17x17xf32>
    %558 = vector.shape_cast %557 : vector<1x17x17xf32> to vector<17x17xf32>
    %c126 = arith.constant 126 : index
    %559 = memref.load %arg1[%c126] : memref<162xf32, #tpu.memory_space<smem>>
    %560 = vector.broadcast %559 : f32 to vector<17x17xf32>
    %561 = arith.mulf %560, %558 : vector<17x17xf32>
    %562 = arith.addf %536, %561 : vector<17x17xf32>
    %c127 = arith.constant 127 : index
    %563 = memref.load %arg1[%c127] : memref<162xf32, #tpu.memory_space<smem>>
    %564 = vector.broadcast %563 : f32 to vector<17x17xf32>
    %565 = arith.mulf %564, %558 : vector<17x17xf32>
    %566 = arith.addf %540, %565 : vector<17x17xf32>
    %c128 = arith.constant 128 : index
    %567 = memref.load %arg1[%c128] : memref<162xf32, #tpu.memory_space<smem>>
    %568 = vector.broadcast %567 : f32 to vector<17x17xf32>
    %569 = arith.mulf %568, %558 : vector<17x17xf32>
    %570 = arith.addf %544, %569 : vector<17x17xf32>
    %c129 = arith.constant 129 : index
    %571 = memref.load %arg1[%c129] : memref<162xf32, #tpu.memory_space<smem>>
    %572 = vector.broadcast %571 : f32 to vector<17x17xf32>
    %573 = arith.mulf %572, %558 : vector<17x17xf32>
    %574 = arith.addf %548, %573 : vector<17x17xf32>
    %c130 = arith.constant 130 : index
    %575 = memref.load %arg1[%c130] : memref<162xf32, #tpu.memory_space<smem>>
    %576 = vector.broadcast %575 : f32 to vector<17x17xf32>
    %577 = arith.mulf %576, %558 : vector<17x17xf32>
    %578 = arith.addf %552, %577 : vector<17x17xf32>
    %c131 = arith.constant 131 : index
    %579 = memref.load %arg1[%c131] : memref<162xf32, #tpu.memory_space<smem>>
    %580 = vector.broadcast %579 : f32 to vector<17x17xf32>
    %581 = arith.mulf %580, %558 : vector<17x17xf32>
    %582 = arith.addf %556, %581 : vector<17x17xf32>
    %c1_82 = arith.constant 1 : index
    %c2_83 = arith.constant 2 : index
    %c1_84 = arith.constant 1 : index
    %583 = vector.load %arg5[%c1_82, %c2_83, %c1_84] : memref<3x19x19xf32, #tpu.memory_space<vmem>>, vector<1x17x17xf32>
    %584 = vector.shape_cast %583 : vector<1x17x17xf32> to vector<17x17xf32>
    %c132 = arith.constant 132 : index
    %585 = memref.load %arg1[%c132] : memref<162xf32, #tpu.memory_space<smem>>
    %586 = vector.broadcast %585 : f32 to vector<17x17xf32>
    %587 = arith.mulf %586, %584 : vector<17x17xf32>
    %588 = arith.addf %562, %587 : vector<17x17xf32>
    %c133 = arith.constant 133 : index
    %589 = memref.load %arg1[%c133] : memref<162xf32, #tpu.memory_space<smem>>
    %590 = vector.broadcast %589 : f32 to vector<17x17xf32>
    %591 = arith.mulf %590, %584 : vector<17x17xf32>
    %592 = arith.addf %566, %591 : vector<17x17xf32>
    %c134 = arith.constant 134 : index
    %593 = memref.load %arg1[%c134] : memref<162xf32, #tpu.memory_space<smem>>
    %594 = vector.broadcast %593 : f32 to vector<17x17xf32>
    %595 = arith.mulf %594, %584 : vector<17x17xf32>
    %596 = arith.addf %570, %595 : vector<17x17xf32>
    %c135 = arith.constant 135 : index
    %597 = memref.load %arg1[%c135] : memref<162xf32, #tpu.memory_space<smem>>
    %598 = vector.broadcast %597 : f32 to vector<17x17xf32>
    %599 = arith.mulf %598, %584 : vector<17x17xf32>
    %600 = arith.addf %574, %599 : vector<17x17xf32>
    %c136 = arith.constant 136 : index
    %601 = memref.load %arg1[%c136] : memref<162xf32, #tpu.memory_space<smem>>
    %602 = vector.broadcast %601 : f32 to vector<17x17xf32>
    %603 = arith.mulf %602, %584 : vector<17x17xf32>
    %604 = arith.addf %578, %603 : vector<17x17xf32>
    %c137 = arith.constant 137 : index
    %605 = memref.load %arg1[%c137] : memref<162xf32, #tpu.memory_space<smem>>
    %606 = vector.broadcast %605 : f32 to vector<17x17xf32>
    %607 = arith.mulf %606, %584 : vector<17x17xf32>
    %608 = arith.addf %582, %607 : vector<17x17xf32>
    %c2_85 = arith.constant 2 : index
    %c2_86 = arith.constant 2 : index
    %c1_87 = arith.constant 1 : index
    %609 = vector.load %arg5[%c2_85, %c2_86, %c1_87] : memref<3x19x19xf32, #tpu.memory_space<vmem>>, vector<1x17x17xf32>
    %610 = vector.shape_cast %609 : vector<1x17x17xf32> to vector<17x17xf32>
    %c138 = arith.constant 138 : index
    %611 = memref.load %arg1[%c138] : memref<162xf32, #tpu.memory_space<smem>>
    %612 = vector.broadcast %611 : f32 to vector<17x17xf32>
    %613 = arith.mulf %612, %610 : vector<17x17xf32>
    %614 = arith.addf %588, %613 : vector<17x17xf32>
    %c139 = arith.constant 139 : index
    %615 = memref.load %arg1[%c139] : memref<162xf32, #tpu.memory_space<smem>>
    %616 = vector.broadcast %615 : f32 to vector<17x17xf32>
    %617 = arith.mulf %616, %610 : vector<17x17xf32>
    %618 = arith.addf %592, %617 : vector<17x17xf32>
    %c140 = arith.constant 140 : index
    %619 = memref.load %arg1[%c140] : memref<162xf32, #tpu.memory_space<smem>>
    %620 = vector.broadcast %619 : f32 to vector<17x17xf32>
    %621 = arith.mulf %620, %610 : vector<17x17xf32>
    %622 = arith.addf %596, %621 : vector<17x17xf32>
    %c141 = arith.constant 141 : index
    %623 = memref.load %arg1[%c141] : memref<162xf32, #tpu.memory_space<smem>>
    %624 = vector.broadcast %623 : f32 to vector<17x17xf32>
    %625 = arith.mulf %624, %610 : vector<17x17xf32>
    %626 = arith.addf %600, %625 : vector<17x17xf32>
    %c142 = arith.constant 142 : index
    %627 = memref.load %arg1[%c142] : memref<162xf32, #tpu.memory_space<smem>>
    %628 = vector.broadcast %627 : f32 to vector<17x17xf32>
    %629 = arith.mulf %628, %610 : vector<17x17xf32>
    %630 = arith.addf %604, %629 : vector<17x17xf32>
    %c143 = arith.constant 143 : index
    %631 = memref.load %arg1[%c143] : memref<162xf32, #tpu.memory_space<smem>>
    %632 = vector.broadcast %631 : f32 to vector<17x17xf32>
    %633 = arith.mulf %632, %610 : vector<17x17xf32>
    %634 = arith.addf %608, %633 : vector<17x17xf32>
    %c0_88 = arith.constant 0 : index
    %c2_89 = arith.constant 2 : index
    %c2_90 = arith.constant 2 : index
    %635 = vector.load %arg5[%c0_88, %c2_89, %c2_90] : memref<3x19x19xf32, #tpu.memory_space<vmem>>, vector<1x17x17xf32>
    %636 = vector.shape_cast %635 : vector<1x17x17xf32> to vector<17x17xf32>
    %c144 = arith.constant 144 : index
    %637 = memref.load %arg1[%c144] : memref<162xf32, #tpu.memory_space<smem>>
    %638 = vector.broadcast %637 : f32 to vector<17x17xf32>
    %639 = arith.mulf %638, %636 : vector<17x17xf32>
    %640 = arith.addf %614, %639 : vector<17x17xf32>
    %c145 = arith.constant 145 : index
    %641 = memref.load %arg1[%c145] : memref<162xf32, #tpu.memory_space<smem>>
    %642 = vector.broadcast %641 : f32 to vector<17x17xf32>
    %643 = arith.mulf %642, %636 : vector<17x17xf32>
    %644 = arith.addf %618, %643 : vector<17x17xf32>
    %c146 = arith.constant 146 : index
    %645 = memref.load %arg1[%c146] : memref<162xf32, #tpu.memory_space<smem>>
    %646 = vector.broadcast %645 : f32 to vector<17x17xf32>
    %647 = arith.mulf %646, %636 : vector<17x17xf32>
    %648 = arith.addf %622, %647 : vector<17x17xf32>
    %c147 = arith.constant 147 : index
    %649 = memref.load %arg1[%c147] : memref<162xf32, #tpu.memory_space<smem>>
    %650 = vector.broadcast %649 : f32 to vector<17x17xf32>
    %651 = arith.mulf %650, %636 : vector<17x17xf32>
    %652 = arith.addf %626, %651 : vector<17x17xf32>
    %c148 = arith.constant 148 : index
    %653 = memref.load %arg1[%c148] : memref<162xf32, #tpu.memory_space<smem>>
    %654 = vector.broadcast %653 : f32 to vector<17x17xf32>
    %655 = arith.mulf %654, %636 : vector<17x17xf32>
    %656 = arith.addf %630, %655 : vector<17x17xf32>
    %c149 = arith.constant 149 : index
    %657 = memref.load %arg1[%c149] : memref<162xf32, #tpu.memory_space<smem>>
    %658 = vector.broadcast %657 : f32 to vector<17x17xf32>
    %659 = arith.mulf %658, %636 : vector<17x17xf32>
    %660 = arith.addf %634, %659 : vector<17x17xf32>
    %c1_91 = arith.constant 1 : index
    %c2_92 = arith.constant 2 : index
    %c2_93 = arith.constant 2 : index
    %661 = vector.load %arg5[%c1_91, %c2_92, %c2_93] : memref<3x19x19xf32, #tpu.memory_space<vmem>>, vector<1x17x17xf32>
    %662 = vector.shape_cast %661 : vector<1x17x17xf32> to vector<17x17xf32>
    %c150 = arith.constant 150 : index
    %663 = memref.load %arg1[%c150] : memref<162xf32, #tpu.memory_space<smem>>
    %664 = vector.broadcast %663 : f32 to vector<17x17xf32>
    %665 = arith.mulf %664, %662 : vector<17x17xf32>
    %666 = arith.addf %640, %665 : vector<17x17xf32>
    %c151 = arith.constant 151 : index
    %667 = memref.load %arg1[%c151] : memref<162xf32, #tpu.memory_space<smem>>
    %668 = vector.broadcast %667 : f32 to vector<17x17xf32>
    %669 = arith.mulf %668, %662 : vector<17x17xf32>
    %670 = arith.addf %644, %669 : vector<17x17xf32>
    %c152 = arith.constant 152 : index
    %671 = memref.load %arg1[%c152] : memref<162xf32, #tpu.memory_space<smem>>
    %672 = vector.broadcast %671 : f32 to vector<17x17xf32>
    %673 = arith.mulf %672, %662 : vector<17x17xf32>
    %674 = arith.addf %648, %673 : vector<17x17xf32>
    %c153 = arith.constant 153 : index
    %675 = memref.load %arg1[%c153] : memref<162xf32, #tpu.memory_space<smem>>
    %676 = vector.broadcast %675 : f32 to vector<17x17xf32>
    %677 = arith.mulf %676, %662 : vector<17x17xf32>
    %678 = arith.addf %652, %677 : vector<17x17xf32>
    %c154 = arith.constant 154 : index
    %679 = memref.load %arg1[%c154] : memref<162xf32, #tpu.memory_space<smem>>
    %680 = vector.broadcast %679 : f32 to vector<17x17xf32>
    %681 = arith.mulf %680, %662 : vector<17x17xf32>
    %682 = arith.addf %656, %681 : vector<17x17xf32>
    %c155 = arith.constant 155 : index
    %683 = memref.load %arg1[%c155] : memref<162xf32, #tpu.memory_space<smem>>
    %684 = vector.broadcast %683 : f32 to vector<17x17xf32>
    %685 = arith.mulf %684, %662 : vector<17x17xf32>
    %686 = arith.addf %660, %685 : vector<17x17xf32>
    %c2_94 = arith.constant 2 : index
    %c2_95 = arith.constant 2 : index
    %c2_96 = arith.constant 2 : index
    %687 = vector.load %arg5[%c2_94, %c2_95, %c2_96] : memref<3x19x19xf32, #tpu.memory_space<vmem>>, vector<1x17x17xf32>
    %688 = vector.shape_cast %687 : vector<1x17x17xf32> to vector<17x17xf32>
    %c156 = arith.constant 156 : index
    %689 = memref.load %arg1[%c156] : memref<162xf32, #tpu.memory_space<smem>>
    %690 = vector.broadcast %689 : f32 to vector<17x17xf32>
    %691 = arith.mulf %690, %688 : vector<17x17xf32>
    %692 = arith.addf %666, %691 : vector<17x17xf32>
    %c157 = arith.constant 157 : index
    %693 = memref.load %arg1[%c157] : memref<162xf32, #tpu.memory_space<smem>>
    %694 = vector.broadcast %693 : f32 to vector<17x17xf32>
    %695 = arith.mulf %694, %688 : vector<17x17xf32>
    %696 = arith.addf %670, %695 : vector<17x17xf32>
    %c158 = arith.constant 158 : index
    %697 = memref.load %arg1[%c158] : memref<162xf32, #tpu.memory_space<smem>>
    %698 = vector.broadcast %697 : f32 to vector<17x17xf32>
    %699 = arith.mulf %698, %688 : vector<17x17xf32>
    %700 = arith.addf %674, %699 : vector<17x17xf32>
    %c159 = arith.constant 159 : index
    %701 = memref.load %arg1[%c159] : memref<162xf32, #tpu.memory_space<smem>>
    %702 = vector.broadcast %701 : f32 to vector<17x17xf32>
    %703 = arith.mulf %702, %688 : vector<17x17xf32>
    %704 = arith.addf %678, %703 : vector<17x17xf32>
    %c160 = arith.constant 160 : index
    %705 = memref.load %arg1[%c160] : memref<162xf32, #tpu.memory_space<smem>>
    %706 = vector.broadcast %705 : f32 to vector<17x17xf32>
    %707 = arith.mulf %706, %688 : vector<17x17xf32>
    %708 = arith.addf %682, %707 : vector<17x17xf32>
    %c161 = arith.constant 161 : index
    %709 = memref.load %arg1[%c161] : memref<162xf32, #tpu.memory_space<smem>>
    %710 = vector.broadcast %709 : f32 to vector<17x17xf32>
    %711 = arith.mulf %710, %688 : vector<17x17xf32>
    %712 = arith.addf %686, %711 : vector<17x17xf32>
    %c0_97 = arith.constant 0 : index
    %713 = memref.load %arg2[%c0_97] : memref<6xf32, #tpu.memory_space<smem>>
    %714 = vector.broadcast %713 : f32 to vector<17x17xf32>
    %715 = arith.addf %692, %714 : vector<17x17xf32>
    %cst_98 = arith.constant 0.000000e+00 : f32
    %cst_99 = arith.constant 1.000000e+00 : f32
    %716 = vector.broadcast %cst_98 : f32 to vector<17x17xf32>
    %717 = arith.maximumf %716, %715 : vector<17x17xf32>
    %718 = vector.broadcast %cst_99 : f32 to vector<17x17xf32>
    %719 = arith.minimumf %718, %717 : vector<17x17xf32>
    %c0_100 = arith.constant 0 : index
    %c0_101 = arith.constant 0 : index
    %c0_102 = arith.constant 0 : index
    %c0_103 = arith.constant 0 : index
    %720 = vector.load %arg4[%c0_100, %c0_101, %c0_102, %c0_103] : memref<1x6x17x17xf32, #tpu.memory_space<vmem>>, vector<1x1x17x17xf32>
    %721 = vector.shape_cast %720 : vector<1x1x17x17xf32> to vector<17x17xf32>
    %722 = vector.shape_cast %719 : vector<17x17xf32> to vector<1x1x17x17xf32>
    tpu.vector_store %arg4[%c0_100, %c0_101, %c0_102, %c0_103], %722 {strides = array<i32>} : memref<1x6x17x17xf32, #tpu.memory_space<vmem>>, vector<1x1x17x17xf32>,
    %c1_104 = arith.constant 1 : index
    %723 = memref.load %arg2[%c1_104] : memref<6xf32, #tpu.memory_space<smem>>
    %724 = vector.broadcast %723 : f32 to vector<17x17xf32>
    %725 = arith.addf %696, %724 : vector<17x17xf32>
    %cst_105 = arith.constant 0.000000e+00 : f32
    %cst_106 = arith.constant 1.000000e+00 : f32
    %726 = vector.broadcast %cst_105 : f32 to vector<17x17xf32>
    %727 = arith.maximumf %726, %725 : vector<17x17xf32>
    %728 = vector.broadcast %cst_106 : f32 to vector<17x17xf32>
    %729 = arith.minimumf %728, %727 : vector<17x17xf32>
    %c0_107 = arith.constant 0 : index
    %c1_108 = arith.constant 1 : index
    %c0_109 = arith.constant 0 : index
    %c0_110 = arith.constant 0 : index
    %730 = vector.load %arg4[%c0_107, %c1_108, %c0_109, %c0_110] : memref<1x6x17x17xf32, #tpu.memory_space<vmem>>, vector<1x1x17x17xf32>
    %731 = vector.shape_cast %730 : vector<1x1x17x17xf32> to vector<17x17xf32>
    %732 = vector.shape_cast %729 : vector<17x17xf32> to vector<1x1x17x17xf32>
    tpu.vector_store %arg4[%c0_107, %c1_108, %c0_109, %c0_110], %732 {strides = array<i32>} : memref<1x6x17x17xf32, #tpu.memory_space<vmem>>, vector<1x1x17x17xf32>,
    %c2_111 = arith.constant 2 : index
    %733 = memref.load %arg2[%c2_111] : memref<6xf32, #tpu.memory_space<smem>>
    %734 = vector.broadcast %733 : f32 to vector<17x17xf32>
    %735 = arith.addf %700, %734 : vector<17x17xf32>
    %cst_112 = arith.constant 0.000000e+00 : f32
    %cst_113 = arith.constant 1.000000e+00 : f32
    %736 = vector.broadcast %cst_112 : f32 to vector<17x17xf32>
    %737 = arith.maximumf %736, %735 : vector<17x17xf32>
    %738 = vector.broadcast %cst_113 : f32 to vector<17x17xf32>
    %739 = arith.minimumf %738, %737 : vector<17x17xf32>
    %c0_114 = arith.constant 0 : index
    %c2_115 = arith.constant 2 : index
    %c0_116 = arith.constant 0 : index
    %c0_117 = arith.constant 0 : index
    %740 = vector.load %arg4[%c0_114, %c2_115, %c0_116, %c0_117] : memref<1x6x17x17xf32, #tpu.memory_space<vmem>>, vector<1x1x17x17xf32>
    %741 = vector.shape_cast %740 : vector<1x1x17x17xf32> to vector<17x17xf32>
    %742 = vector.shape_cast %739 : vector<17x17xf32> to vector<1x1x17x17xf32>
    tpu.vector_store %arg4[%c0_114, %c2_115, %c0_116, %c0_117], %742 {strides = array<i32>} : memref<1x6x17x17xf32, #tpu.memory_space<vmem>>, vector<1x1x17x17xf32>,
    %c3_118 = arith.constant 3 : index
    %743 = memref.load %arg2[%c3_118] : memref<6xf32, #tpu.memory_space<smem>>
    %744 = vector.broadcast %743 : f32 to vector<17x17xf32>
    %745 = arith.addf %704, %744 : vector<17x17xf32>
    %cst_119 = arith.constant 0.000000e+00 : f32
    %cst_120 = arith.constant 1.000000e+00 : f32
    %746 = vector.broadcast %cst_119 : f32 to vector<17x17xf32>
    %747 = arith.maximumf %746, %745 : vector<17x17xf32>
    %748 = vector.broadcast %cst_120 : f32 to vector<17x17xf32>
    %749 = arith.minimumf %748, %747 : vector<17x17xf32>
    %c0_121 = arith.constant 0 : index
    %c3_122 = arith.constant 3 : index
    %c0_123 = arith.constant 0 : index
    %c0_124 = arith.constant 0 : index
    %750 = vector.load %arg4[%c0_121, %c3_122, %c0_123, %c0_124] : memref<1x6x17x17xf32, #tpu.memory_space<vmem>>, vector<1x1x17x17xf32>
    %751 = vector.shape_cast %750 : vector<1x1x17x17xf32> to vector<17x17xf32>
    %752 = vector.shape_cast %749 : vector<17x17xf32> to vector<1x1x17x17xf32>
    tpu.vector_store %arg4[%c0_121, %c3_122, %c0_123, %c0_124], %752 {strides = array<i32>} : memref<1x6x17x17xf32, #tpu.memory_space<vmem>>, vector<1x1x17x17xf32>,
    %c4_125 = arith.constant 4 : index
    %753 = memref.load %arg2[%c4_125] : memref<6xf32, #tpu.memory_space<smem>>
    %754 = vector.broadcast %753 : f32 to vector<17x17xf32>
    %755 = arith.addf %708, %754 : vector<17x17xf32>
    %cst_126 = arith.constant 0.000000e+00 : f32
    %cst_127 = arith.constant 1.000000e+00 : f32
    %756 = vector.broadcast %cst_126 : f32 to vector<17x17xf32>
    %757 = arith.maximumf %756, %755 : vector<17x17xf32>
    %758 = vector.broadcast %cst_127 : f32 to vector<17x17xf32>
    %759 = arith.minimumf %758, %757 : vector<17x17xf32>
    %c0_128 = arith.constant 0 : index
    %c4_129 = arith.constant 4 : index
    %c0_130 = arith.constant 0 : index
    %c0_131 = arith.constant 0 : index
    %760 = vector.load %arg4[%c0_128, %c4_129, %c0_130, %c0_131] : memref<1x6x17x17xf32, #tpu.memory_space<vmem>>, vector<1x1x17x17xf32>
    %761 = vector.shape_cast %760 : vector<1x1x17x17xf32> to vector<17x17xf32>
    %762 = vector.shape_cast %759 : vector<17x17xf32> to vector<1x1x17x17xf32>
    tpu.vector_store %arg4[%c0_128, %c4_129, %c0_130, %c0_131], %762 {strides = array<i32>} : memref<1x6x17x17xf32, #tpu.memory_space<vmem>>, vector<1x1x17x17xf32>,
    %c5_132 = arith.constant 5 : index
    %763 = memref.load %arg2[%c5_132] : memref<6xf32, #tpu.memory_space<smem>>
    %764 = vector.broadcast %763 : f32 to vector<17x17xf32>
    %765 = arith.addf %712, %764 : vector<17x17xf32>
    %cst_133 = arith.constant 0.000000e+00 : f32
    %cst_134 = arith.constant 1.000000e+00 : f32
    %766 = vector.broadcast %cst_133 : f32 to vector<17x17xf32>
    %767 = arith.maximumf %766, %765 : vector<17x17xf32>
    %768 = vector.broadcast %cst_134 : f32 to vector<17x17xf32>
    %769 = arith.minimumf %768, %767 : vector<17x17xf32>
    %c0_135 = arith.constant 0 : index
    %c5_136 = arith.constant 5 : index
    %c0_137 = arith.constant 0 : index
    %c0_138 = arith.constant 0 : index
    %770 = vector.load %arg4[%c0_135, %c5_136, %c0_137, %c0_138] : memref<1x6x17x17xf32, #tpu.memory_space<vmem>>, vector<1x1x17x17xf32>
    %771 = vector.shape_cast %770 : vector<1x1x17x17xf32> to vector<17x17xf32>
    %772 = vector.shape_cast %769 : vector<17x17xf32> to vector<1x1x17x17xf32>
    tpu.vector_store %arg4[%c0_135, %c5_136, %c0_137, %c0_138], %772 {strides = array<i32>} : memref<1x6x17x17xf32, #tpu.memory_space<vmem>>, vector<1x1x17x17xf32>,
    return
  }
  func.func @transform_0(%arg0: i32) -> i32 {
    %c0_i32 = arith.constant 0 : i32
    %c0_i32_0 = arith.constant 0 : i32
    return %c0_i32 : i32
  }
  func.func @transform_1(%arg0: i32) -> i32 {
    %c0_i32 = arith.constant 0 : i32
    %c0_i32_0 = arith.constant 0 : i32
    return %c0_i32 : i32
  }
  func.func @transform_2(%arg0: i32) -> (i32, i32, i32, i32) {
    %c0_i32 = arith.constant 0 : i32
    %c0_i32_0 = arith.constant 0 : i32
    %c0_i32_1 = arith.constant 0 : i32
    %c0_i32_2 = arith.constant 0 : i32
    return %arg0, %c0_i32, %c0_i32_0, %c0_i32_1 : i32, i32, i32, i32
  }
  func.func @transform_3(%arg0: i32) -> (i32, i32, i32, i32) {
    %c0_i32 = arith.constant 0 : i32
    %c0_i32_0 = arith.constant 0 : i32
    %c0_i32_1 = arith.constant 0 : i32
    %c0_i32_2 = arith.constant 0 : i32
    return %arg0, %c0_i32, %c0_i32_0, %c0_i32_1 : i32, i32, i32, i32
  }
}

</mosaic_0001>

<bundles_post_ra>
// kernel: tpu_custom_call.1
= control target key start
LH: loop header
LB: loop body
LE: loop exit
PB: predicated region body
PF: predicated region fallthrough
CT: control target
= control target key end

     0   :  { %s6217_s0 = inlined_call_operand.hbm [shape: f32[162], index: 0, kind: input, shape index: {}]   ;;  %s6218_s1 = inlined_call_operand.vmem [shape: f32[6], index: 1, kind: input, shape index: {}]   ;;  %s6219_s2 = inlined_call_operand.hbm [shape: f32[2,3,16,16], index: 2, kind: input, shape index: {}]   ;;  %s6220_s3 = inlined_call_operand.vmem [shape: f32[2,6,17,17], index: 3, kind: output, shape index: {}]  }
   0x1   :  { %6277 = sst [smem:[#allocation188_spill]] %s6217_s0 }
   0x2   :  { %8 = vsyncpa [#allocation5], 0 }
   0x3   :  { %9 = vsyncpa [#allocation6], 0 }
   0x4   :  { %10 = vsyncpa [#allocation4], 0 }
   0x5   :  { %12 = vsyncpa [#allocation4 + $0x1], 0  ;;  %s3473_s12 = smov 0   ;;  %s3475_s13 = smov 0  }
   0x6   :  { %s3477_s14 = smov 0   ;;  %s3479_s15 = smov 0  }
   0x7 LB: > { %s3492_s16 = sadd.s32 4294967295, %s3442_s15   ;;  %s3495_s17 = sadd.s32 1, %s3442_s15   ;;  %s3442_s15 = sphi %s3479_s15, %s6727_s15   ;;  %s3438_s14 = sphi %s3477_s14, %s6726_s14   ;;  %s3434_s13 = sphi %s3475_s13, %s6725_s13   ;;  %s3430_s12 = sphi %s3473_s12, %s6724_s12  }
   0x8   : > { %s64_s18 = ssub.s32 %s3442_s15, %s3495_s17  ;;  %s67_s19 = sadd.s32 1, %s3438_s14 }
   0x9   : > { %p65_p0 = scmp.eq.s32.totalorder %s64_s18, 0  ;;  %p74_p1 = scmp.ne.s32.totalorder %s3438_s14, %s3434_s13 }
   0xa   : > { %p75_p2 = scmp.eq.s32.totalorder %s3442_s15, 0  ;;  %p80_p3 = scmp.ne.s32.totalorder %s3434_s13, %s3430_s12 }
   0xb   : > { %s3505_s20 = scalar_select %p65_p0, %s3438_s14, %s67_s19  }
   0xc   : > { %p76_p4 = por %p75_p2, %p74_p1  ;;  %p6221_p5 = scmp.eq.s32.totalorder %s3492_s16, 0 }
   0xd   : > { %p3068_p6 = scmp.ge.s32.totalorder %s3442_s15, 1  ;;  %p117_p7 = scmp.lt.s32.totalorder %s3442_s15, 3 }
   0xe   : > { %p3512_p8 = por %p6221_p5, %p80_p3  ;;  %p3287_p10 = scmp.lt.s32.totalorder %s3442_s15, 2 }
   0xf   : > { %p3516_p9 = pnand %p3068_p6, %p117_p7  ;;  %s139_s25 = sshll.u32 %s6218_s1, 4  ;;  %s140_s25 = int_to_ptr.vmem [resolvable:$true] %s139_s25 }
  0x10   : > { %s6278_s21 = scalar_select %p3512_p8, 1, 0 }
  0x11   : > { %p3274_p11 = pneg %p3516_p9  ;;  %p3526_p12 = pnand %p3287_p10, %p76_p4 }
  0x12   : > { %s150_s28 = sand.u32 1, %s3438_s14   ;;  %s6282_s0 = sld [smem:[#allocation188_spill]] }
  0x13   : > { %p3532_p13 = pnand %p3274_p11, %p6221_p5 }
  0x15   : > { %p3344_p1 = pneg %p3532_p13 }
  0x18   : > { %s3342_s4 = scalar_lea.hbm %s6282_s0, 32 }
  0x19   : > { %p3343_p0 = scmp.ne.s32.totalorder %s6282_s0, %s3342_s4  ;;  %p3349_p4 = scmp.lt.u32.totalorder %s3342_s4, %s6282_s0 }
  0x1b   : > { %p3345_p2 = pnand %p3344_p1, %p3343_p0 }
  0x1d   : > { %p3346_p3 = pneg %p3345_p2 }
  0x1f   : > { %p3351_p6 = pnand %p3349_p4, %p3346_p3 }
  0x21   : > { %3354 = shalt.err (!%p3351_p6)
}
  0x22   : > { %s3444_s9 = smov [#allocation3]   ;;  %s3355_s12 = scalar_lea.vmem %s140_s25, 16 }
  0x23   : > { %3277 = dma.hbm_to_smem (!%p3532_p13), %s6282_s0, 32, %s3444_s9, [#allocation5]  }
  0x24   : > { %p3356_p7 = scmp.ne.s32.totalorder %s140_s25, %s3355_s12  ;;  %p3363_p5 = scmp.lt.s32.totalorder %s140_s25, %s140_s25 }
  0x25   : > { %p3364_p0 = scmp.lt.s32.totalorder %s3355_s12, %s3355_s12 }
  0x26   : > { %p3358_p10 = pnand %p3356_p7, %p3344_p1 }
  0x27   : > { %p3365_p2 = por %p3364_p0, %p3363_p5 }
  0x28   : > { %p3359_p11 = pneg %p3358_p10 }
  0x2a   : > { %p3366_p8 = pnand %p3365_p2, %p3359_p11 }
  0x2c   : > { %3369 = shalt.err (!%p3366_p8)
}
  0x2d   : > { %s3445_s18 = smov [#allocation7]   ;;  %s3260_s19 = smul.u32 48, %s150_s28 }
  0x2e   : > { %3280 = dma.vmem_to_smem (!%p3532_p13), %s140_s25, 16, %s3445_s18, [#allocation6]  }
  0x2f   : > { %s3261_s23 = smul.u32 768, %s3442_s15  ;;  %s154_s4 = scalar_lea.vmem [#allocation8], %s3260_s19 }
  0x30   : > { %s161_s5 = sshll.u32 %s154_s4, 4  ;;  %s3563_s27 = scalar_lea.sflag [#allocation4], %s150_s28  ;;  %s3561_s5 = int_to_ptr.vmem [resolvable:$true] %s161_s5 }
  0x31   : > { %s3559_s30 = scalar_lea.hbm %s6219_s2, %s3261_s23  ;;  %p3372_p8 = pneg %p3526_p12 }
  0x32   : > { %s3370_s6 = scalar_lea.hbm %s3559_s30, 768  ;;  %s3375_s7 = scalar_lea.hbm %s6219_s2, 1536 }
  0x33   : > { %p3371_p5 = scmp.ne.s32.totalorder %s3559_s30, %s3370_s6  ;;  %p3376_p3 = scmp.lt.u32.totalorder %s3559_s30, %s6219_s2 }
  0x34   : > { %p3377_p4 = scmp.lt.u32.totalorder %s3375_s7, %s3370_s6  ;;  %p3379_p7 = scmp.lt.u32.totalorder %s3370_s6, %s3559_s30 }
  0x35   : > { %p3373_p13 = pnand %p3372_p8, %p3371_p5 }
  0x36   : > { %p3378_p6 = por %p3377_p4, %p3376_p3 }
  0x37   : > { %p3374_p1 = pneg %p3373_p13 }
  0x38   : > { %p3380_p10 = por %p3379_p7, %p3378_p6 }
  0x3a   : > { %p3381_p11 = pnand %p3380_p10, %p3374_p1 }
  0x3c   : > { %3384 = shalt.err (!%p3381_p11)
}
  0x3d   : > { %s3385_s28 = scalar_lea.vmem %s3561_s5, 768  ;;  %s3446_s10 = smov [#allocation8]  }
  0x3e   : > { %p3386_p0 = scmp.ne.s32.totalorder %s3561_s5, %s3385_s28  ;;  %s3390_s11 = sshll.u32 %s3446_s10, 4  ;;  %s3391_s11 = int_to_ptr.vmem [resolvable:$false] %s3390_s11 }
  0x3f   : > { %s3392_s12 = scalar_lea.vmem %s3391_s11, 1536  ;;  %p3393_p13 = scmp.lt.s32.totalorder %s3561_s5, %s3391_s11 }
  0x40   : > { %p3388_p2 = pnand %p3386_p0, %p3372_p8  ;;  %p3394_p3 = scmp.lt.s32.totalorder %s3392_s12, %s3385_s28 }
  0x42   : > { %p3389_p5 = pneg %p3388_p2  ;;  %p3395_p4 = por %p3394_p3, %p3393_p13 }
  0x44   : > { %p3396_p6 = pnand %p3395_p4, %p3389_p5 }
  0x46   : > { %3399 = shalt.err (!%p3396_p6)
}
  0x47   : > { %s3447_s18 = smov 128   ;;  %s3448_s19 = smov 8  }
  0x48   : > { %3284 = dma.hbm_to_vmem [thread:$0]  (!%p3526_p12), %s3559_s30, 768, %s3561_s5, %s3563_s27, %s3447_s18, %s3447_s18, %s3448_s19  }
  0x49   : > { %173 = sbr.rel (%p3516_p9) target bundleno = 1000 (0x3e8), region = 32 }
  0x50   : > { %p6283_p8 = scmp.eq.s32.totalorder %s3492_s16, 0 }
  0x52   : > { %3417 = dma.done.wait (%p6283_p8), [#allocation5], 32   ;;  %p6284_p1 = pmov %p6283_p8 }
  0x54   : > { %3419 = vsyncadd (%p6284_p1), [#allocation5], 4294967264  ;;  %p6285_p7 = pmov %p6284_p1 }
  0x55   : > { %p6286_p10 = pmov %p6284_p1 }
  0x56   : > { %3421 = dma.done.wait (%p6285_p7), [#allocation6], 16  }
  0x57   : > { %3423 = vsyncadd (%p6286_p10), [#allocation6], 4294967280  ;;  %s183_s23 = sand.u32 1, %s3434_s13   ;;  %p6287_p12 = scmp.ne.s32.totalorder %s6278_s21, 0 }
  0x58   : > { %s3262_s26 = smul.u32 48, %s183_s23  ;;  %s184_s24 = scalar_lea.sflag [#allocation4], %s183_s23 }
  0x5a   : > { %s187_s29 = scalar_lea.vmem [#allocation8], %s3262_s26 }
  0x5b   : > { %3425 = dma.done.wait (%p6287_p12), %s184_s24, 768  }
  0x5c   : > { %3427 = vsyncadd (%p6287_p12), %s184_s24, 4294966528 }
  0x5d   : > { %192 = sfence }
  0x5e   : > { %v229_v0 = vld [vmem:[%s187_s29 + $0x10] sm:$0xff]  ;;  %v227_v1 = vld [vmem:[%s187_s29] sm:$0xff]  ;;  %vm216_vm0 = vcmask 154624   ;;  %s3449_s22 = smov 1   ;;  %vm219_vm1 = vcmask 149504   ;;  %v230_v2 = vld [vmem:[%s187_s29 + $0x18] sm:$0xff] }
  0x5f   : > { %243 = vrot.lane.b32.xlu1 %v229_v0, %s3449_s22  ;;  %239 = vrot.lane.b32.xlu0 %v227_v1, %s3449_s22  ;;  %v228_v3 = vld [vmem:[%s187_s29 + $0x8] sm:$0xff]  ;;  %v3450_v4 = vmov 0.0   ;;  %v231_v6 = vld [vmem:[%s187_s29 + $0x20] sm:$0xff]  ;;  %vm257_vm2 = vcmask 138248   ;;  %s3094_s21 = sld [smem:[#allocation3 + $0x12]]  ;;  %s3610_s30 = sld [smem:[#allocation3 + $0x13]] }
  0x60   : > { %221 = vst.msk [vmem:[#allocation2 + $0x18] sm:$0xff] %vm216_vm0, %v3450_v4  ;;  %222 = vst.msk [vmem:[#allocation2 + $0x20] sm:$0xff] %vm216_vm0, %v3450_v4  ;;  %v232_v5 = vld [vmem:[%s187_s29 + $0x28] sm:$0xff]  ;;  %s3612_s4 = sld [smem:[#allocation3 + $0x14]]  ;;  %s3614_s5 = sld [smem:[#allocation3 + $0x15]]  ;;  %vm2896_vm3 = vcmask 138240  }
  0x61   : > { %217 = vst.msk [vmem:[#allocation2] sm:$0xff] %vm216_vm0, %v3450_v4  ;;  %218 = vst.msk [vmem:[#allocation2 + $0x8] sm:$0xff] %vm216_vm0, %v3450_v4  ;;  %s3616_s27 = sld [smem:[#allocation3 + $0x16]]  ;;  %s3618_s6 = sld [smem:[#allocation3 + $0x17]]  ;;  %vm2899_vm4 = vcmask 131072  }
  0x62   : > { %224 = vst.msk [vmem:[#allocation2 + $0x30] sm:$0xff] %vm216_vm0, %v3450_v4  ;;  %225 = vst.msk [vmem:[#allocation2 + $0x38] sm:$0xff] %vm216_vm0, %v3450_v4  ;;  %s3622_s15 = sld [smem:[#allocation3]]  ;;  %s3624_s25 = sld [smem:[#allocation3 + $0x6]] }
  0x63   : > { %223 = vst.msk [vmem:[#allocation2 + $0x28] sm:$0x7] %vm219_vm1, %v3450_v4  ;;  %220 = vst.msk [vmem:[#allocation2 + $0x10] sm:$0x7] %vm219_vm1, %v3450_v4  ;;  %245 = vrot.lane.b32.xlu1 %v230_v2, %s3449_s22  ;;  %241 = vrot.lane.b32.xlu0 %v228_v3, %s3449_s22  ;;  %s3629_s7 = sld [smem:[#allocation3 + $0xc]]  ;;  %s3631_s8 = sld [smem:[#allocation3 + $0x1]] }
  0x64   : > { %226 = vst.msk [vmem:[#allocation2 + $0x40] sm:$0x7] %vm219_vm1, %v3450_v4  ;;  %s3633_s9 = sld [smem:[#allocation3 + $0x7]]  ;;  %s3635_s28 = sld [smem:[#allocation3 + $0x2]] }
  0x65   : > { %v420_v11 = vstv %s3094_s21  ;;  %s3451_s10 = smov 127   ;;  %s3638_s11 = sld [smem:[#allocation3 + $0xd]]  ;;  %v440_v20 = vstv %s3610_s30 }
  0x66   : > { %s3640_s12 = sld [smem:[#allocation3 + $0x8]]  ;;  %s3642_s18 = sld [smem:[#allocation3 + $0x3]]  ;;  %v460_v22 = vstv %s3612_s4  ;;  %v3676_v26 = vstv %s3614_s5 }
  0x67   : > { %249 = vrot.lane.b32.xlu1 %v232_v5, %s3449_s22  ;;  %247 = vrot.lane.b32.xlu0 %v231_v6, %s3449_s22  ;;  %s3644_s19 = sld [smem:[#allocation3 + $0x9]]  ;;  %s3648_s23 = sld [smem:[#allocation3 + $0x4]]  ;;  %v3679_v27 = vstv %s3616_s27  ;;  %v3682_v28 = vstv %s3618_s6 }
  0x68   : > { %s3650_s26 = sld [smem:[#allocation3 + $0xa]]  ;;  %s3655_s24 = sld [smem:[#allocation3 + $0xe]]  ;;  %v268_v23 = vstv %s3622_s15  ;;  %v320_v24 = vstv %s3624_s25 }
  0x69   : > { %s3657_s29 = sld [smem:[#allocation3 + $0x5]]  ;;  %s3661_s22 = sld [smem:[#allocation3 + $0xf]]  ;;  %v372_v30 = vstv %s3629_s7  ;;  %v276_v31 = vstv %s3631_s8 }
  0x6a   : > { %s3663_s21 = sld [smem:[#allocation3 + $0xb]]  ;;  %s3666_s0 = sld [smem:[#allocation3 + $0x18]]  ;;  %v328_v32 = vstv %s3633_s9  ;;  %v3692_v35 = vstv %s3635_s28 }
  0x6b   : > { %v380_v39 = vstv %s3638_s11  ;;  %s3741_s30 = sld [smem:[#allocation3 + $0x10]]  ;;  %s3855_s4 = sld [smem:[#allocation3 + $0x19]] }
  0x6c   : > { %v3695_v36 = vstv %s3640_s12  ;;  %v3704_v40 = vstv %s3642_s18  ;;  %s3102_s5 = sld [smem:[#allocation3 + $0x1a]]  ;;  %s3103_s27 = sld [smem:[#allocation3 + $0x1b]] }
  0x6d   : > { %v3707_v41 = vstv %s3644_s19  ;;  %v3718_v46 = vstv %s3648_s23  ;;  %s3104_s6 = sld [smem:[#allocation3 + $0x1c]]  ;;  %s3105_s15 = sld [smem:[#allocation3 + $0x1d]] }
  0x6e   : > { %v3715_v45 = vstv %s3655_s24  ;;  %v3721_v47 = vstv %s3650_s26  ;;  %s3106_s25 = sld [smem:[#allocation3 + $0x1e]]  ;;  %s3107_s7 = sld [smem:[#allocation3 + $0x1f]] }
  0x6f   : > { %v3727_v50 = vstv %s3661_s22  ;;  %v3730_v51 = vstv %s3657_s29  ;;  %s3108_s8 = sld [smem:[#allocation3 + $0x20]]  ;;  %s3109_s9 = sld [smem:[#allocation3 + $0x21]] }
  0x70   : > { %v3733_v52 = vstv %s3663_s21  ;;  %v3737_v53 = vstv %s3666_s0  ;;  %s3760_s0 = sld [smem:[#allocation3 + $0x11]]  ;;  %s3110_s28 = sld [smem:[#allocation3 + $0x22]] }
  0x71   : > { %s3111_s11 = sld [smem:[#allocation3 + $0x23]]  ;;  %s3112_s12 = sld [smem:[#allocation3 + $0x24]] }
  0x72   : > { %s3113_s18 = sld [smem:[#allocation3 + $0x25]]  ;;  %s3114_s19 = sld [smem:[#allocation3 + $0x26]] }
  0x73   : > { %s3452_s23 = smov 126   ;;  %s3115_s26 = sld [smem:[#allocation3 + $0x27]] }
  0x74   : > { %s3116_s24 = sld [smem:[#allocation3 + $0x28]]  ;;  %s3117_s29 = sld [smem:[#allocation3 + $0x29]] }
  0x75   : > { %s3118_s22 = sld [smem:[#allocation3 + $0x2a]]  ;;  %s3119_s21 = sld [smem:[#allocation3 + $0x2b]] }
  0x76   : > { %p211_p9 = scmp.lt.s32.totalorder %s3492_s16, 1 }
  0x78   : > { %s6729_s16 = smov (!%p211_p9, %s3492_s16), 1 }
  0xd1   : > { %v244_v7 = vpop.permute.xlu1 %243  ;;  %v240_v8 = vpop.permute.xlu0 %239 }
  0xd2   : > { %260 = vst.msk [vmem:[#allocation2 + $0x19] sm:$0xff] %vm257_vm2, %v244_v7  ;;  %258 = vst.msk [vmem:[#allocation2 + $0x1] sm:$0xff] %vm257_vm2, %v240_v8 }
  0xd5   : > { %v246_v9 = vpop.permute.xlu1 %245  ;;  %v242_v10 = vpop.permute.xlu0 %241 }
  0xd6   : > { %261 = vst.msk [vmem:[#allocation2 + $0x21] sm:$0xff] %vm257_vm2, %v246_v9  ;;  %259 = vst.msk [vmem:[#allocation2 + $0x9] sm:$0xff] %vm257_vm2, %v242_v10 }
  0xd9   : > { %v3620_v12 = vld [vmem:[#allocation2] sm:$0xff]  ;;  %v250_v13 = vpop.permute.xlu1 %249  ;;  %v248_v14 = vpop.permute.xlu0 %247  ;;  %v3668_v21 = vld [vmem:[#allocation2 + $0x18] sm:$0xff] }
  0xda   : > { %263 = vst.msk [vmem:[#allocation2 + $0x39] sm:$0xff] %vm257_vm2, %v250_v13  ;;  %262 = vst.msk [vmem:[#allocation2 + $0x31] sm:$0xff] %vm257_vm2, %v248_v14  ;;  %v421_v15 = vmul.f32 %v420_v11, %v3620_v12  ;;  %v441_v25 = vmul.f32 %v440_v20, %v3620_v12  ;;  %v321_v33 = vmul.f32 %v320_v24, %v3668_v21 }
  0xdb   : > { %v269_v34 = vmul.f32 %v268_v23, %v3620_v12  ;;  %v461_v49 = vmul.f32 %v460_v22, %v3620_v12  ;;  %v329_v3 = vmul.f32 %v328_v32, %v3668_v21  ;;  %v277_v5 = vmul.f32 %v276_v31, %v3620_v12 }
  0xdc   : > { %427 = vrot.lane.b32.xlu0 %v421_v15, %s3451_s10  ;;  %v481_v9 = vmul.f32 %v3676_v26, %v3620_v12 }
  0xdd   : > { %v3646_v16 = vld [vmem:[#allocation2 + $0x8] sm:$0xff]  ;;  %v3652_v17 = vld [vmem:[#allocation2 + $0x10] sm:$0x1]  ;;  %v3697_v37 = vld [vmem:[#allocation2 + $0x20] sm:$0xff]  ;;  %v324_v55 = vadd.f32 %v321_v33, %v269_v34  ;;  %v332_v14 = vadd.f32 %v329_v3, %v277_v5 }
  0xde   : > { %v422_v18 = vmul.f32 %v420_v11, %v3646_v16  ;;  %v423_v19 = vmul.f32 %v420_v11, %v3652_v17  ;;  %v442_v29 = vmul.f32 %v440_v20, %v3646_v16  ;;  %v3709_v42 = vld [vmem:[#allocation2 + $0x28] sm:$0x1]  ;;  %v443_v44 = vmul.f32 %v440_v20, %v3652_v17 }
  0xdf   : > { %v322_v56 = vmul.f32 %v320_v24, %v3697_v37  ;;  %v270_v58 = vmul.f32 %v268_v23, %v3646_v16  ;;  %v271_v59 = vmul.f32 %v268_v23, %v3652_v17  ;;  %v323_v60 = vmul.f32 %v320_v24, %v3709_v42 }
  0xe0   : > { %429 = vrot.lane.b32.xlu1 %v422_v18, %s3451_s10  ;;  %431 = vrot.lane.b32.xlu0 %v423_v19, %s3451_s10  ;;  %v462_v61 = vmul.f32 %v460_v22, %v3646_v16  ;;  %v463_v62 = vmul.f32 %v460_v22, %v3652_v17  ;;  %v278_v6 = vmul.f32 %v276_v31, %v3646_v16 }
  0xe1   : > { %v3699_v38 = vld [vmem:[#allocation2 + $0x30] sm:$0xff]  ;;  %v3711_v43 = vld [vmem:[#allocation2 + $0x38] sm:$0xff]  ;;  %v3723_v48 = vld [vmem:[#allocation2 + $0x40] sm:$0x1]  ;;  %v325_v1 = vadd.f32 %v322_v56, %v270_v58  ;;  %v326_v2 = vadd.f32 %v323_v60, %v271_v59  ;;  %v330_v7 = vmul.f32 %v328_v32, %v3697_v37  ;;  %v482_v10 = vmul.f32 %v3676_v26, %v3646_v16 }
  0xe2   : > { %v373_v54 = vmul.f32 %v372_v30, %v3699_v38  ;;  %v374_v57 = vmul.f32 %v372_v30, %v3711_v43  ;;  %v375_v0 = vmul.f32 %v372_v30, %v3723_v48  ;;  %v381_v4 = vmul.f32 %v380_v39, %v3699_v38 }
  0xe3   : > { %v382_v8 = vmul.f32 %v380_v39, %v3711_v43  ;;  %v333_v15 = vadd.f32 %v330_v7, %v278_v6  ;;  %v279_v18 = vmul.f32 %v276_v31, %v3652_v17  ;;  %v331_v19 = vmul.f32 %v328_v32, %v3709_v42 }
  0xe4   : > { %447 = vrot.lane.b32.xlu1 %v441_v25, %s3451_s10  ;;  %449 = vrot.lane.b32.xlu0 %v442_v29, %s3451_s10  ;;  %v3750_v63 = vadd.f32 %v373_v54, %v324_v55  ;;  %v3767_v11 = vadd.f32 %v374_v57, %v325_v1  ;;  %v3769_v13 = vadd.f32 %v375_v0, %v326_v2  ;;  %v404_v31 = vstv %s3741_s30  ;;  %s3120_s30 = sld [smem:[#allocation3 + $0x2c]] }
  0xe5   : > { %v383_v20 = vmul.f32 %v380_v39, %v3723_v48  ;;  %v337_v22 = vmul.f32 %v3695_v36, %v3668_v21  ;;  %v389_v23 = vmul.f32 %v3715_v45, %v3699_v38  ;;  %v285_v24 = vmul.f32 %v3692_v35, %v3620_v12 }
  0xe6   : > { %6288 = vst [vmem:[#allocation12_spill] sm:$0xff] %v3769_v13  ;;  %v3781_v25 = vadd.f32 %v381_v4, %v332_v14  ;;  %v3783_v29 = vadd.f32 %v382_v8, %v333_v15  ;;  %v334_v30 = vadd.f32 %v331_v19, %v279_v18  ;;  %v483_v32 = vmul.f32 %v3676_v26, %v3652_v17 }
  0xe7   : > { %v340_v33 = vadd.f32 %v337_v22, %v285_v24  ;;  %v286_v34 = vmul.f32 %v3692_v35, %v3646_v16  ;;  %v338_v39 = vmul.f32 %v3695_v36, %v3697_v37  ;;  %v287_v54 = vmul.f32 %v3692_v35, %v3652_v17 }
  0xe8   : > { %451 = vrot.lane.b32.xlu1 %v443_v44, %s3451_s10  ;;  %467 = vrot.lane.b32.xlu0 %v461_v49, %s3451_s10  ;;  %v3793_v44 = vadd.f32 %v383_v20, %v334_v30  ;;  %v390_v49 = vmul.f32 %v3715_v45, %v3711_v43  ;;  %v339_v55 = vmul.f32 %v3695_v36, %v3709_v42 }
  0xe9   : > { %v501_v26 = vmul.f32 %v3679_v27, %v3620_v12  ;;  %v3803_v56 = vadd.f32 %v389_v23, %v340_v33  ;;  %v341_v57 = vadd.f32 %v338_v39, %v286_v34  ;;  %v391_v58 = vmul.f32 %v3715_v45, %v3723_v48 }
  0xea   : > { %6289 = vst [vmem:[#allocation13_spill] sm:$0xff] %v3793_v44  ;;  %v342_v59 = vadd.f32 %v339_v55, %v287_v54  ;;  %v345_v60 = vmul.f32 %v3707_v41, %v3668_v21  ;;  %v397_v35 = vmul.f32 %v3727_v50, %v3699_v38  ;;  %v294_v45 = vmul.f32 %v3704_v40, %v3646_v16 }
  0xeb   : > { %v3814_v36 = vadd.f32 %v390_v49, %v341_v57  ;;  %v346_v0 = vmul.f32 %v3707_v41, %v3697_v37  ;;  %v502_v1 = vmul.f32 %v3679_v27, %v3646_v16  ;;  %v503_v2 = vmul.f32 %v3679_v27, %v3652_v17 }
  0xec   : > { %469 = vrot.lane.b32.xlu1 %v462_v61, %s3451_s10  ;;  %471 = vrot.lane.b32.xlu0 %v463_v62, %s3451_s10  ;;  %v412_v61 = vstv %s3760_s0  ;;  %v293_v62 = vmul.f32 %v3704_v40, %v3620_v12  ;;  %v3826_v3 = vadd.f32 %v391_v58, %v342_v59  ;;  %v398_v4 = vmul.f32 %v3727_v50, %v3711_v43  ;;  %s3121_s0 = sld [smem:[#allocation3 + $0x2d]] }
  0xed   : > { %v349_v6 = vadd.f32 %v346_v0, %v294_v45  ;;  %v295_v7 = vmul.f32 %v3704_v40, %v3652_v17  ;;  %v347_v8 = vmul.f32 %v3707_v41, %v3709_v42  ;;  %v353_v27 = vmul.f32 %v3721_v47, %v3668_v21 }
  0xee   : > { %6290 = vst [vmem:[#allocation14_spill] sm:$0xff] %v3826_v3  ;;  %v348_v5 = vadd.f32 %v345_v60, %v293_v62  ;;  %v301_v14 = vmul.f32 %v3718_v46, %v3620_v12  ;;  %v521_v40 = vmul.f32 %v3682_v28, %v3620_v12  ;;  %v302_v20 = vmul.f32 %v3718_v46, %v3646_v16 }
  0xef   : > { %v3847_v41 = vadd.f32 %v398_v4, %v349_v6  ;;  %v350_v18 = vadd.f32 %v347_v8, %v295_v7  ;;  %v354_v22 = vmul.f32 %v3721_v47, %v3697_v37  ;;  %v406_v24 = vmul.f32 %v404_v31, %v3711_v43 }
  0xf0   : > { %487 = vrot.lane.b32.xlu1 %v481_v9, %s3451_s10  ;;  %489 = vrot.lane.b32.xlu0 %v482_v10, %s3451_s10  ;;  %v399_v9 = vmul.f32 %v3727_v50, %v3723_v48  ;;  %v405_v10 = vmul.f32 %v404_v31, %v3699_v38  ;;  %v3845_v15 = vadd.f32 %v397_v35, %v348_v5  ;;  %v560_v7 = vstv %s3855_s4  ;;  %s3122_s4 = sld [smem:[#allocation3 + $0x2e]] }
  0xf1   : > { %v522_v50 = vmul.f32 %v3682_v28, %v3646_v16  ;;  %v356_v19 = vadd.f32 %v353_v27, %v301_v14  ;;  %v303_v30 = vmul.f32 %v3718_v46, %v3652_v17  ;;  %v541_v33 = vmul.f32 %v3737_v53, %v3668_v21 }
  0xf2   : > { %v3857_v23 = vadd.f32 %v399_v9, %v350_v18  ;;  %v357_v39 = vadd.f32 %v354_v22, %v302_v20  ;;  %v407_v49 = vmul.f32 %v404_v31, %v3723_v48  ;;  %v523_v54 = vmul.f32 %v3682_v28, %v3652_v17 }
  0xf3   : > { %v3867_v34 = vadd.f32 %v405_v10, %v356_v19  ;;  %v361_v46 = vmul.f32 %v3733_v52, %v3668_v21  ;;  %v309_v57 = vmul.f32 %v3730_v51, %v3620_v12  ;;  %v310_v58 = vmul.f32 %v3730_v51, %v3646_v16 }
  0xf4   : > { %491 = vrot.lane.b32.xlu1 %v483_v32, %s3451_s10  ;;  %507 = vrot.lane.b32.xlu0 %v501_v26, %s3451_s10  ;;  %6291 = vst [vmem:[#allocation15_spill] sm:$0xff] %v3857_v23  ;;  %v355_v32 = vmul.f32 %v3721_v47, %v3709_v42  ;;  %v413_v47 = vmul.f32 %v412_v61, %v3699_v38  ;;  %v600_v14 = vstv %s3103_s27  ;;  %s3124_s27 = sld [smem:[#allocation3 + $0x30]] }
  0xf5   : > { %6292 = vst [vmem:[#allocation16_spill] sm:$0xff] %v3867_v34  ;;  %v3876_v26 = vadd.f32 %v406_v24, %v357_v39  ;;  %v362_v31 = vmul.f32 %v3733_v52, %v3697_v37  ;;  %v414_v28 = vmul.f32 %v412_v61, %v3711_v43  ;;  %v364_v60 = vadd.f32 %v361_v46, %v309_v57 }
  0xf6   : > { %v358_v55 = vadd.f32 %v355_v32, %v303_v30  ;;  %v311_v62 = vmul.f32 %v3730_v51, %v3652_v17  ;;  %v363_v45 = vmul.f32 %v3733_v52, %v3709_v42  ;;  %v543_v0 = vmul.f32 %v3737_v53, %v3709_v42 }
  0xf7   : > { %6293 = vst [vmem:[#allocation17_spill] sm:$0xff] %v3876_v26  ;;  %v365_v35 = vadd.f32 %v362_v31, %v310_v58  ;;  %v3898_v4 = vadd.f32 %v413_v47, %v364_v60  ;;  %v561_v52 = vmul.f32 %v560_v7, %v3668_v21  ;;  %v562_v8 = vmul.f32 %v560_v7, %v3697_v37 }
  0xf8   : > { %509 = vrot.lane.b32.xlu1 %v502_v1, %s3451_s10  ;;  %511 = vrot.lane.b32.xlu0 %v503_v2, %s3451_s10  ;;  %v3884_v59 = vadd.f32 %v407_v49, %v358_v55  ;;  %v415_v1 = vmul.f32 %v412_v61, %v3723_v48  ;;  %v542_v2 = vmul.f32 %v3737_v53, %v3697_v37  ;;  %v580_v53 = vstv %s3102_s5  ;;  %s3123_s5 = sld [smem:[#allocation3 + $0x2f]] }
  0xf9   : > { %6295 = vst [vmem:[#allocation19_spill] sm:$0xff] %v3898_v4  ;;  %v3900_v5 = vadd.f32 %v414_v28, %v365_v35  ;;  %v366_v6 = vadd.f32 %v363_v45, %v311_v62  ;;  %v563_v61 = vmul.f32 %v560_v7, %v3709_v42  ;;  %v581_v9 = vmul.f32 %v580_v53, %v3668_v21 }
  0xfa   : > { %6294 = vst [vmem:[#allocation18_spill] sm:$0xff] %v3884_v59  ;;  %v582_v27 = vmul.f32 %v580_v53, %v3697_v37  ;;  %v583_v10 = vmul.f32 %v580_v53, %v3709_v42  ;;  %v602_v18 = vmul.f32 %v600_v14, %v3697_v37  ;;  %v603_v19 = vmul.f32 %v600_v14, %v3709_v42 }
  0xfb   : > { %6296 = vst [vmem:[#allocation20_spill] sm:$0xff] %v3900_v5  ;;  %v3904_v51 = vadd.f32 %v415_v1, %v366_v6  ;;  %v640_v30 = vstv %s3105_s15  ;;  %v680_v47 = vstv %s3107_s7  ;;  %v700_v31 = vstv %s3108_s8  ;;  %s3126_s15 = sld [smem:[#allocation3 + $0x32]]  ;;  %s3128_s7 = sld [smem:[#allocation3 + $0x34]] }
  0xfc   : > { %527 = vrot.lane.b32.xlu1 %v521_v40, %s3451_s10  ;;  %529 = vrot.lane.b32.xlu0 %v522_v50, %s3451_s10  ;;  %v601_v40 = vmul.f32 %v600_v14, %v3668_v21  ;;  %v620_v50 = vstv %s3104_s6  ;;  %v641_v32 = vmul.f32 %v640_v30, %v3668_v21  ;;  %v642_v39 = vmul.f32 %v640_v30, %v3697_v37  ;;  %s3125_s6 = sld [smem:[#allocation3 + $0x31]]  ;;  %s3129_s8 = sld [smem:[#allocation3 + $0x35]] }
  0xfd   : > { %6297 = vst [vmem:[#allocation21_spill] sm:$0xff] %v3904_v51  ;;  %v621_v20 = vmul.f32 %v620_v50, %v3668_v21  ;;  %v622_v22 = vmul.f32 %v620_v50, %v3697_v37  ;;  %v623_v24 = vmul.f32 %v620_v50, %v3709_v42  ;;  %v681_v57 = vmul.f32 %v680_v47, %v3699_v38 }
  0xfe   : > { %v682_v58 = vmul.f32 %v680_v47, %v3711_v43  ;;  %v683_v28 = vmul.f32 %v680_v47, %v3723_v48  ;;  %v701_v60 = vmul.f32 %v700_v31, %v3699_v38  ;;  %v702_v35 = vmul.f32 %v700_v31, %v3711_v43 }
  0xff   : > { %v703_v62 = vmul.f32 %v700_v31, %v3723_v48  ;;  %v720_v45 = vstv %s3109_s9  ;;  %v760_v53 = vstv %s3111_s11  ;;  %v800_v50 = vstv %s3113_s18  ;;  %s3148_s9 = sld [smem:[#allocation3 + $0x48]]  ;;  %s3150_s11 = sld [smem:[#allocation3 + $0x4a]] }
 0x100   : > { %531 = vrot.lane.b32.xlu1 %v523_v54, %s3451_s10  ;;  %547 = vrot.lane.b32.xlu0 %v541_v33, %s3451_s10  ;;  %v660_v33 = vstv %s3106_s25  ;;  %v643_v54 = vmul.f32 %v640_v30, %v3709_v42  ;;  %v722_v1 = vmul.f32 %v720_v45, %v3711_v43  ;;  %v723_v6 = vmul.f32 %v720_v45, %v3723_v48  ;;  %s3127_s25 = sld [smem:[#allocation3 + $0x33]]  ;;  %s3152_s18 = sld [smem:[#allocation3 + $0x4c]] }
 0x101   : > { %v661_v49 = vmul.f32 %v660_v33, %v3699_v38  ;;  %v662_v55 = vmul.f32 %v660_v33, %v3711_v43  ;;  %v663_v46 = vmul.f32 %v660_v33, %v3723_v48  ;;  %v840_v47 = vstv %s3115_s26  ;;  %s3154_s26 = sld [smem:[#allocation3 + $0x4e]] }
 0x102   : > { %v1100_v44 = vstv %s3128_s7  ;;  %s3160_s7 = sld [smem:[#allocation3 + $0x54]] }
 0x104   : > { %549 = vrot.lane.b32.xlu1 %v542_v2, %s3451_s10  ;;  %551 = vrot.lane.b32.xlu0 %v543_v0, %s3451_s10  ;;  %v721_v0 = vmul.f32 %v720_v45, %v3699_v38  ;;  %v740_v2 = vstv %s3110_s28  ;;  %s3149_s28 = sld [smem:[#allocation3 + $0x49]] }
 0x105   : > { %v741_v7 = vmul.f32 %v740_v2, %v3699_v38  ;;  %v1333_v59 = vstv %s3150_s11  ;;  %s4341_s11 = sld [smem:[#allocation3 + $0x55]] }
 0x106   : > { %v1373_v13 = vstv %s3152_s18  ;;  %s4347_s18 = sld [smem:[#allocation3 + $0x56]] }
 0x108   : > { %567 = vrot.lane.b32.xlu1 %v561_v52, %s3451_s10  ;;  %569 = vrot.lane.b32.xlu0 %v562_v8, %s3451_s10  ;;  %v742_v52 = vmul.f32 %v740_v2, %v3711_v43  ;;  %v743_v8 = vmul.f32 %v740_v2, %v3723_v48  ;;  %v1533_v26 = vstv %s3160_s7  ;;  %s3170_s7 = sld [smem:[#allocation3 + $0x5e]] }
 0x10b   : > { %v1553_v34 = vstv %s4341_s11  ;;  %s3174_s11 = sld [smem:[#allocation3 + $0x62]] }
 0x10c   : > { %571 = vrot.lane.b32.xlu1 %v563_v61, %s3451_s10  ;;  %587 = vrot.lane.b32.xlu0 %v581_v9, %s3451_s10  ;;  %v761_v61 = vmul.f32 %v760_v53, %v3699_v38  ;;  %v762_v9 = vmul.f32 %v760_v53, %v3711_v43 }
 0x110   : > { %589 = vrot.lane.b32.xlu1 %v582_v27, %s3451_s10  ;;  %591 = vrot.lane.b32.xlu0 %v583_v10, %s3451_s10  ;;  %v780_v27 = vstv %s3112_s12  ;;  %v763_v10 = vmul.f32 %v760_v53, %v3723_v48  ;;  %s3151_s12 = sld [smem:[#allocation3 + $0x4b]] }
 0x111   : > { %v781_v14 = vmul.f32 %v780_v27, %v3620_v12 }
 0x114   : > { %607 = vrot.lane.b32.xlu1 %v601_v40, %s3451_s10  ;;  %609 = vrot.lane.b32.xlu0 %v602_v18, %s3451_s10  ;;  %v782_v40 = vmul.f32 %v780_v27, %v3646_v16  ;;  %v783_v18 = vmul.f32 %v780_v27, %v3652_v17  ;;  %v900_v27 = vstv %s3118_s22  ;;  %s3157_s22 = sld [smem:[#allocation3 + $0x51]] }
 0x118   : > { %611 = vrot.lane.b32.xlu1 %v603_v19, %s3451_s10  ;;  %627 = vrot.lane.b32.xlu0 %v621_v20, %s3451_s10  ;;  %v801_v20 = vmul.f32 %v800_v50, %v3620_v12 }
 0x11c   : > { %629 = vrot.lane.b32.xlu1 %v622_v22, %s3451_s10  ;;  %631 = vrot.lane.b32.xlu0 %v623_v24, %s3451_s10  ;;  %v802_v22 = vmul.f32 %v800_v50, %v3646_v16  ;;  %v820_v24 = vstv %s3114_s19  ;;  %s3153_s19 = sld [smem:[#allocation3 + $0x4d]] }
 0x120   : > { %647 = vrot.lane.b32.xlu1 %v641_v32, %s3451_s10  ;;  %649 = vrot.lane.b32.xlu0 %v642_v39, %s3451_s10  ;;  %v803_v32 = vmul.f32 %v800_v50, %v3652_v17  ;;  %v821_v39 = vmul.f32 %v820_v24, %v3620_v12 }
 0x124   : > { %651 = vrot.lane.b32.xlu1 %v643_v54, %s3451_s10  ;;  %667 = vrot.lane.b32.xlu0 %v661_v49, %s3451_s10  ;;  %v822_v54 = vmul.f32 %v820_v24, %v3646_v16 }
 0x128   : > { %669 = vrot.lane.b32.xlu1 %v662_v55, %s3451_s10  ;;  %671 = vrot.lane.b32.xlu0 %v663_v46, %s3451_s10  ;;  %v823_v46 = vmul.f32 %v820_v24, %v3652_v17 }
 0x12c   : > { %687 = vrot.lane.b32.xlu1 %v681_v57, %s3451_s10  ;;  %689 = vrot.lane.b32.xlu0 %v682_v58, %s3451_s10  ;;  %v841_v58 = vmul.f32 %v840_v47, %v3620_v12 }
 0x130   : > { %691 = vrot.lane.b32.xlu1 %v683_v28, %s3451_s10  ;;  %707 = vrot.lane.b32.xlu0 %v701_v60, %s3451_s10  ;;  %v842_v28 = vmul.f32 %v840_v47, %v3646_v16  ;;  %v860_v60 = vstv %s3116_s24  ;;  %s3155_s24 = sld [smem:[#allocation3 + $0x4f]] }
 0x131   : > { %v862_v2 = vmul.f32 %v860_v60, %v3646_v16 }
 0x134   : > { %709 = vrot.lane.b32.xlu1 %v702_v35, %s3451_s10  ;;  %711 = vrot.lane.b32.xlu0 %v703_v62, %s3451_s10  ;;  %v843_v62 = vmul.f32 %v840_v47, %v3652_v17 }
 0x138   : > { %727 = vrot.lane.b32.xlu1 %v721_v0, %s3451_s10  ;;  %729 = vrot.lane.b32.xlu0 %v722_v1, %s3451_s10  ;;  %v861_v0 = vmul.f32 %v860_v60, %v3620_v12 }
 0x13c   : > { %731 = vrot.lane.b32.xlu1 %v723_v6, %s3451_s10  ;;  %747 = vrot.lane.b32.xlu0 %v741_v7, %s3451_s10  ;;  %v863_v7 = vmul.f32 %v860_v60, %v3652_v17 }
 0x140   : > { %749 = vrot.lane.b32.xlu1 %v742_v52, %s3451_s10  ;;  %751 = vrot.lane.b32.xlu0 %v743_v8, %s3451_s10  ;;  %v880_v52 = vstv %s3117_s29  ;;  %s3156_s29 = sld [smem:[#allocation3 + $0x50]] }
 0x141   : > { %v881_v53 = vmul.f32 %v880_v52, %v3620_v12 }
 0x144   : > { %767 = vrot.lane.b32.xlu1 %v761_v61, %s3451_s10  ;;  %769 = vrot.lane.b32.xlu0 %v762_v9, %s3451_s10  ;;  %v882_v9 = vmul.f32 %v880_v52, %v3646_v16  ;;  %v902_v16 = vmul.f32 %v900_v27, %v3697_v37 }
 0x148   : > { %771 = vrot.lane.b32.xlu1 %v763_v10, %s3451_s10  ;;  %787 = vrot.lane.b32.xlu0 %v781_v14, %s3452_s23  ;;  %v883_v14 = vmul.f32 %v880_v52, %v3652_v17 }
 0x14c   : > { %789 = vrot.lane.b32.xlu1 %v782_v40, %s3452_s23  ;;  %791 = vrot.lane.b32.xlu0 %v783_v18, %s3452_s23  ;;  %v901_v18 = vmul.f32 %v900_v27, %v3668_v21 }
 0x14e   : > { %v3979_v19 = vpop.permute.xlu0 %427 }
 0x150   : > { %807 = vrot.lane.b32.xlu1 %v801_v20, %s3452_s23  ;;  %809 = vrot.lane.b32.xlu0 %v802_v22, %s3452_s23  ;;  %v903_v20 = vmul.f32 %v900_v27, %v3709_v42  ;;  %v920_v22 = vstv %s3119_s21  ;;  %s3158_s21 = sld [smem:[#allocation3 + $0x52]] }
 0x151   : > { %v921_v24 = vmul.f32 %v920_v22, %v3668_v21  ;;  %v923_v47 = vmul.f32 %v920_v22, %v3709_v42 }
 0x152   : > { %v3985_v30 = vpop.permute.xlu1 %429  ;;  %v3988_v33 = vpop.permute.xlu0 %431 }
 0x153   : > { %6298 = vst [vmem:[#allocation22_spill] sm:$0xff] %v3988_v33 }
 0x154   : > { %811 = vrot.lane.b32.xlu1 %v803_v32, %s3452_s23  ;;  %827 = vrot.lane.b32.xlu0 %v821_v39, %s3452_s23  ;;  %v922_v39 = vmul.f32 %v920_v22, %v3697_v37 }
 0x156   : > { %v3993_v49 = vpop.permute.xlu1 %447  ;;  %v3996_v55 = vpop.permute.xlu0 %449 }
 0x158   : > { %829 = vrot.lane.b32.xlu1 %v822_v54, %s3452_s23  ;;  %831 = vrot.lane.b32.xlu0 %v823_v46, %s3452_s23  ;;  %v940_v54 = vstv %s3120_s30  ;;  %s3159_s30 = sld [smem:[#allocation3 + $0x53]] }
 0x15a   : > { %v4001_v57 = vpop.permute.xlu1 %451  ;;  %v4004_v31 = vpop.permute.xlu0 %467 }
 0x15b   : > { %6299 = vst [vmem:[#allocation23_spill] sm:$0xff] %v4001_v57  ;;  %v1080_v57 = vstv %s3127_s25  ;;  %s4327_s25 = sld [smem:[#allocation3 + $0x3b]] }
 0x15c   : > { %847 = vrot.lane.b32.xlu1 %v841_v58, %s3452_s23  ;;  %849 = vrot.lane.b32.xlu0 %v842_v28, %s3452_s23  ;;  %v941_v28 = vmul.f32 %v940_v54, %v3668_v21 }
 0x15e   : > { %v4009_v35 = vpop.permute.xlu1 %469  ;;  %v4012_v45 = vpop.permute.xlu0 %471 }
 0x15f   : > { %6300 = vst [vmem:[#allocation24_spill] sm:$0xff] %v4012_v45 }
 0x160   : > { %851 = vrot.lane.b32.xlu1 %v843_v62, %s3452_s23  ;;  %867 = vrot.lane.b32.xlu0 %v861_v0, %s3452_s23  ;;  %v942_v62 = vmul.f32 %v940_v54, %v3697_v37 }
 0x162   : > { %v4017_v1 = vpop.permute.xlu1 %487  ;;  %v4020_v6 = vpop.permute.xlu0 %489 }
 0x164   : > { %869 = vrot.lane.b32.xlu1 %v862_v2, %s3452_s23  ;;  %871 = vrot.lane.b32.xlu0 %v863_v7, %s3452_s23  ;;  %v943_v2 = vmul.f32 %v940_v54, %v3709_v42  ;;  %v960_v7 = vstv %s3121_s0  ;;  %s4309_s0 = sld [smem:[#allocation3 + $0x36]] }
 0x165   : > { %v962_v27 = vmul.f32 %v960_v7, %v3697_v37 }
 0x166   : > { %v4025_v8 = vpop.permute.xlu1 %491  ;;  %v4028_v61 = vpop.permute.xlu0 %507 }
 0x167   : > { %6301 = vst [vmem:[#allocation25_spill] sm:$0xff] %v4025_v8  ;;  %6302 = vst [vmem:[#allocation26_spill] sm:$0xff] %v4028_v61  ;;  %v4394_v61 = vld [vmem:[#allocation2 + $0x41] sm:$0x1] }
 0x168   : > { %887 = vrot.lane.b32.xlu1 %v881_v53, %s3452_s23  ;;  %889 = vrot.lane.b32.xlu0 %v882_v9, %s3452_s23  ;;  %v961_v53 = vmul.f32 %v960_v7, %v3668_v21 }
 0x16a   : > { %v4033_v10 = vpop.permute.xlu1 %509  ;;  %v4036_v40 = vpop.permute.xlu0 %511 }
 0x16b   : > { %6303 = vst [vmem:[#allocation27_spill] sm:$0xff] %v4033_v10  ;;  %6304 = vst [vmem:[#allocation28_spill] sm:$0xff] %v4036_v40  ;;  %v4372_v10 = vld [vmem:[#allocation2 + $0x31] sm:$0xff] }
 0x16c   : > { %891 = vrot.lane.b32.xlu1 %v883_v14, %s3452_s23  ;;  %907 = vrot.lane.b32.xlu0 %v901_v18, %s3452_s23  ;;  %v980_v14 = vstv %s3122_s4  ;;  %s4312_s4 = sld [smem:[#allocation3 + $0x37]] }
 0x16d   : > { %v981_v22 = vmul.f32 %v980_v14, %v3668_v21 }
 0x16e   : > { %v4041_v12 = vpop.permute.xlu1 %527  ;;  %v4044_v50 = vpop.permute.xlu0 %529 }
 0x16f   : > { %6305 = vst [vmem:[#allocation29_spill] sm:$0xff] %v4041_v12  ;;  %6306 = vst [vmem:[#allocation30_spill] sm:$0xff] %v4044_v50  ;;  %v1413_v50 = vstv %s3154_s26  ;;  %s4353_s26 = sld [smem:[#allocation3 + $0x57]] }
 0x170   : > { %909 = vrot.lane.b32.xlu1 %v902_v16, %s3452_s23  ;;  %911 = vrot.lane.b32.xlu0 %v903_v20, %s3452_s23  ;;  %v963_v16 = vmul.f32 %v960_v7, %v3709_v42 }
 0x172   : > { %v4049_v17 = vpop.permute.xlu1 %531  ;;  %v4052_v32 = vpop.permute.xlu0 %547 }
 0x173   : > { %6307 = vst [vmem:[#allocation31_spill] sm:$0xff] %v4049_v17  ;;  %v1293_v17 = vstv %s3148_s9  ;;  %s4334_s9 = sld [smem:[#allocation3 + $0x3d]] }
 0x174   : > { %927 = vrot.lane.b32.xlu1 %v921_v24, %s3452_s23  ;;  %929 = vrot.lane.b32.xlu0 %v922_v39, %s3452_s23  ;;  %v982_v39 = vmul.f32 %v980_v14, %v3697_v37 }
 0x176   : > { %v4057_v46 = vpop.permute.xlu1 %549  ;;  %v4060_v58 = vpop.permute.xlu0 %551 }
 0x177   : > { %6308 = vst [vmem:[#allocation32_spill] sm:$0xff] %v4060_v58  ;;  %v4175_v58 = vld [vmem:[#allocation2 + $0x1] sm:$0xff] }
 0x178   : > { %931 = vrot.lane.b32.xlu1 %v923_v47, %s3452_s23  ;;  %947 = vrot.lane.b32.xlu0 %v941_v28, %s3452_s23  ;;  %v983_v47 = vmul.f32 %v980_v14, %v3709_v42  ;;  %v1000_v28 = vstv %s3123_s5  ;;  %s4314_s5 = sld [smem:[#allocation3 + $0x38]] }
 0x17a   : > { %v4065_v60 = vpop.permute.xlu1 %567  ;;  %v4068_v0 = vpop.permute.xlu0 %569 }
 0x17c   : > { %949 = vrot.lane.b32.xlu1 %v942_v62, %s3452_s23  ;;  %951 = vrot.lane.b32.xlu0 %v943_v2, %s3452_s23  ;;  %v1001_v2 = vmul.f32 %v1000_v28, %v3668_v21 }
 0x17e   : > { %v4073_v52 = vpop.permute.xlu1 %571  ;;  %v4076_v9 = vpop.permute.xlu0 %587 }
 0x17f   : > { %6309 = vst [vmem:[#allocation33_spill] sm:$0xff] %v4073_v52 }
 0x180   : > { %967 = vrot.lane.b32.xlu1 %v961_v53, %s3452_s23  ;;  %969 = vrot.lane.b32.xlu0 %v962_v27, %s3452_s23  ;;  %v1002_v53 = vmul.f32 %v1000_v28, %v3697_v37  ;;  %v1020_v27 = vstv %s3124_s27  ;;  %s4318_s27 = sld [smem:[#allocation3 + $0x39]] }
 0x181   : > { %v1022_v37 = vmul.f32 %v1020_v27, %v3711_v43 }
 0x182   : > { %v4081_v18 = vpop.permute.xlu1 %589  ;;  %v4084_v20 = vpop.permute.xlu0 %591 }
 0x183   : > { %6310 = vst [vmem:[#allocation34_spill] sm:$0xff] %v4084_v20  ;;  %v1060_v20 = vstv %s3126_s15  ;;  %s4325_s15 = sld [smem:[#allocation3 + $0x5a]] }
 0x184   : > { %971 = vrot.lane.b32.xlu1 %v963_v16, %s3452_s23  ;;  %987 = vrot.lane.b32.xlu0 %v981_v22, %s3452_s23  ;;  %v1003_v16 = vmul.f32 %v1000_v28, %v3709_v42 }
 0x186   : > { %v4089_v24 = vpop.permute.xlu1 %607  ;;  %v4092_v54 = vpop.permute.xlu0 %609 }
 0x187   : > { %6311 = vst [vmem:[#allocation35_spill] sm:$0xff] %v4089_v24  ;;  %6312 = vst [vmem:[#allocation36_spill] sm:$0xff] %v4092_v54 }
 0x188   : > { %989 = vrot.lane.b32.xlu1 %v982_v39, %s3452_s23  ;;  %991 = vrot.lane.b32.xlu0 %v983_v47, %s3452_s23  ;;  %v1021_v39 = vmul.f32 %v1020_v27, %v3699_v38 }
 0x18a   : > { %v4097_v62 = vpop.permute.xlu1 %611  ;;  %v4100_v7 = vpop.permute.xlu0 %627 }
 0x18b   : > { %6313 = vst [vmem:[#allocation37_spill] sm:$0xff] %v4097_v62  ;;  %6314 = vst [vmem:[#allocation38_spill] sm:$0xff] %v4100_v7  ;;  %v1120_v62 = vstv %s3129_s8  ;;  %s4330_s8 = sld [smem:[#allocation3 + $0x3c]]  ;;  %v4382_v7 = vld [vmem:[#allocation2 + $0x39] sm:$0xff] }
 0x18c   : > { %1007 = vrot.lane.b32.xlu1 %v1001_v2, %s3452_s23  ;;  %1009 = vrot.lane.b32.xlu0 %v1002_v53, %s3452_s23  ;;  %v1023_v2 = vmul.f32 %v1020_v27, %v3723_v48  ;;  %v1040_v53 = vstv %s3125_s6  ;;  %s4320_s6 = sld [smem:[#allocation3 + $0x3a]] }
 0x18d   : > { %v1041_v28 = vmul.f32 %v1040_v53, %v3699_v38 }
 0x18e   : > { %v4105_v14 = vpop.permute.xlu1 %629  ;;  %v4108_v22 = vpop.permute.xlu0 %631 }
 0x18f   : > { %6315 = vst [vmem:[#allocation39_spill] sm:$0xff] %v4105_v14  ;;  %6316 = vst [vmem:[#allocation40_spill] sm:$0xff] %v4108_v22  ;;  %v1493_v14 = vstv %s3158_s21  ;;  %s4478_s21 = sld [smem:[#allocation3 + $0x43]] }
 0x190   : > { %1011 = vrot.lane.b32.xlu1 %v1003_v16, %s3452_s23  ;;  %1027 = vrot.lane.b32.xlu0 %v1021_v39, %s3452_s23  ;;  %v1042_v39 = vmul.f32 %v1040_v53, %v3711_v43 }
 0x192   : > { %v4113_v21 = vpop.permute.xlu1 %647  ;;  %v4116_v47 = vpop.permute.xlu0 %649 }
 0x193   : > { %6317 = vst [vmem:[#allocation41_spill] sm:$0xff] %v4113_v21  ;;  %6318 = vst [vmem:[#allocation42_spill] sm:$0xff] %v4116_v47  ;;  %v4253_v21 = vld [vmem:[#allocation2 + $0x19] sm:$0xff] }
 0x194   : > { %1029 = vrot.lane.b32.xlu1 %v1022_v37, %s3452_s23  ;;  %1031 = vrot.lane.b32.xlu0 %v1023_v2, %s3452_s23  ;;  %v1043_v37 = vmul.f32 %v1040_v53, %v3723_v48  ;;  %v1061_v2 = vmul.f32 %v1060_v20, %v3699_v38 }
 0x196   : > { %v4121_v42 = vpop.permute.xlu1 %651  ;;  %v4124_v16 = vpop.permute.xlu0 %667 }
 0x197   : > { %6319 = vst [vmem:[#allocation43_spill] sm:$0xff] %v4121_v42 }
 0x198   : > { %1047 = vrot.lane.b32.xlu1 %v1041_v28, %s3452_s23  ;;  %1049 = vrot.lane.b32.xlu0 %v1042_v39, %s3452_s23  ;;  %v1062_v28 = vmul.f32 %v1060_v20, %v3711_v43  ;;  %v1063_v39 = vmul.f32 %v1060_v20, %v3723_v48 }
 0x19a   : > { %v4129_v27 = vpop.permute.xlu1 %669  ;;  %v4132_v52 = vpop.permute.xlu0 %671 }
 0x19b   : > { %6320 = vst [vmem:[#allocation44_spill] sm:$0xff] %v4132_v52 }
 0x19c   : > { %1051 = vrot.lane.b32.xlu1 %v1043_v37, %s3452_s23  ;;  %1067 = vrot.lane.b32.xlu0 %v1061_v2, %s3452_s23  ;;  %v1081_v37 = vmul.f32 %v1080_v57, %v3699_v38  ;;  %v1082_v2 = vmul.f32 %v1080_v57, %v3711_v43 }
 0x19e   : > { %v4137_v45 = vpop.permute.xlu1 %687  ;;  %v4140_v3 = vpop.permute.xlu0 %689 }
 0x1a0   : > { %1069 = vrot.lane.b32.xlu1 %v1062_v28, %s3452_s23  ;;  %1071 = vrot.lane.b32.xlu0 %v1063_v39, %s3452_s23  ;;  %v1083_v28 = vmul.f32 %v1080_v57, %v3723_v48  ;;  %v1101_v39 = vmul.f32 %v1100_v44, %v3699_v38 }
 0x1a2   : > { %v4145_v53 = vpop.permute.xlu1 %691  ;;  %v4148_v52 = vpop.permute.xlu0 %707 }
 0x1a3   : > { %6321 = vst [vmem:[#allocation45_spill] sm:$0xff] %v4145_v53 }
 0x1a4   : > { %1087 = vrot.lane.b32.xlu1 %v1081_v37, %s3452_s23  ;;  %1089 = vrot.lane.b32.xlu0 %v1082_v2, %s3452_s23  ;;  %v1102_v37 = vmul.f32 %v1100_v44, %v3711_v43  ;;  %v1103_v2 = vmul.f32 %v1100_v44, %v3723_v48  ;;  %v4179_v44 = vld [vmem:[#allocation2 + $0x11] sm:$0x1] }
 0x1a5   : > { %6327 = vst [vmem:[#allocation51_spill] sm:$0xff] %v4179_v44 }
 0x1a6   : > { %v4153_v20 = vpop.permute.xlu1 %709  ;;  %v4156_v42 = vpop.permute.xlu0 %711 }
 0x1a7   : > { %6322 = vst [vmem:[#allocation46_spill] sm:$0xff] %v4156_v42 }
 0x1a8   : > { %1091 = vrot.lane.b32.xlu1 %v1083_v28, %s3452_s23  ;;  %1107 = vrot.lane.b32.xlu0 %v1101_v39, %s3452_s23  ;;  %v1121_v28 = vmul.f32 %v1120_v62, %v3699_v38  ;;  %v1122_v39 = vmul.f32 %v1120_v62, %v3711_v43  ;;  %v1294_v43 = vmul.f32 %v1293_v17, %v4175_v58 }
 0x1aa   : > { %v4161_v53 = vpop.permute.xlu1 %727  ;;  %v4164_v22 = vpop.permute.xlu0 %729 }
 0x1ab   : > { %6323 = vst [vmem:[#allocation47_spill] sm:$0xff] %v4161_v53  ;;  %6324 = vst [vmem:[#allocation48_spill] sm:$0xff] %v4164_v22  ;;  %v4389_v22 = vstv %s4327_s25  ;;  %s3169_s25 = sld [smem:[#allocation3 + $0x5d]] }
 0x1ac   : > { %1109 = vrot.lane.b32.xlu1 %v1102_v37, %s3452_s23  ;;  %1111 = vrot.lane.b32.xlu0 %v1103_v2, %s3452_s23  ;;  %v1123_v2 = vmul.f32 %v1120_v62, %v3723_v48  ;;  %v1313_v48 = vstv %s3149_s28  ;;  %s4336_s28 = sld [smem:[#allocation3 + $0x3e]]  ;;  %6362 = vst [vmem:[#allocation86_spill] sm:$0xff] %v4389_v22  ;;  %v1534_v22 = vmul.f32 %v1533_v26, %v4372_v10 }
 0x1ae   : > { %v4169_v57 = vpop.permute.xlu1 %731  ;;  %v4172_v42 = vpop.permute.xlu0 %747 }
 0x1af   : > { %6325 = vst [vmem:[#allocation49_spill] sm:$0xff] %v4169_v57  ;;  %6326 = vst [vmem:[#allocation50_spill] sm:$0xff] %v4172_v42  ;;  %v4184_v57 = vld [vmem:[#allocation2 + $0x9] sm:$0xff] }
 0x1b0   : > { %1127 = vrot.lane.b32.xlu1 %v1121_v28, %s3452_s23  ;;  %1129 = vrot.lane.b32.xlu0 %v1122_v39, %s3452_s23  ;;  %v1296_v28 = vmul.f32 %v1293_v17, %v4179_v44  ;;  %v1295_v51 = vmul.f32 %v1293_v17, %v4184_v57  ;;  %v1316_v17 = vmul.f32 %v1313_v48, %v4179_v44 }
 0x1b2   : > { %v4181_v37 = vpop.permute.xlu1 %749  ;;  %v4186_v38 = vpop.permute.xlu0 %751  ;;  %v4407_v53 = vstv %s4336_s28  ;;  %s3173_s28 = sld [smem:[#allocation3 + $0x61]] }
 0x1b3   : > { %6328 = vst [vmem:[#allocation52_spill] sm:$0xff] %v4181_v37  ;;  %6329 = vst [vmem:[#allocation53_spill] sm:$0xff] %v4186_v38  ;;  %v1414_v37 = vmul.f32 %v1413_v50, %v4253_v21 }
 0x1b4   : > { %1131 = vrot.lane.b32.xlu1 %v1123_v2, %s3452_s23  ;;  %1300 = vrot.lane.b32.xlu0 %v1294_v43, %s3451_s10  ;;  %v1314_v2 = vmul.f32 %v1313_v48, %v4175_v58  ;;  %v1315_v43 = vmul.f32 %v1313_v48, %v4184_v57  ;;  %v1335_v48 = vmul.f32 %v1333_v59, %v4184_v57 }
 0x1b5   : > { %6366 = vst [vmem:[#allocation90_spill] sm:$0xff] %v4407_v53 }
 0x1b6   : > { %v4192_v39 = vpop.permute.xlu1 %767  ;;  %v4195_v40 = vpop.permute.xlu0 %769 }
 0x1b7   : > { %6330 = vst [vmem:[#allocation54_spill] sm:$0xff] %v4192_v39  ;;  %6331 = vst [vmem:[#allocation55_spill] sm:$0xff] %v4195_v40 }
 0x1b8   : > { %1302 = vrot.lane.b32.xlu1 %v1295_v51, %s3451_s10  ;;  %1304 = vrot.lane.b32.xlu0 %v1296_v28, %s3451_s10  ;;  %v1334_v28 = vmul.f32 %v1333_v59, %v4175_v58 }
 0x1ba   : > { %v4199_v62 = vpop.permute.xlu1 %771  ;;  %v4202_v38 = vpop.permute.xlu0 %787 }
 0x1bb   : > { %6332 = vst [vmem:[#allocation56_spill] sm:$0xff] %v4199_v62  ;;  %v1336_v62 = vmul.f32 %v1333_v59, %v4179_v44 }
 0x1bc   : > { %1320 = vrot.lane.b32.xlu1 %v1314_v2, %s3451_s10  ;;  %1322 = vrot.lane.b32.xlu0 %v1315_v43, %s3451_s10  ;;  %v1353_v43 = vstv %s3151_s12  ;;  %s4343_s12 = sld [smem:[#allocation3 + $0x3f]] }
 0x1bd   : > { %v1356_v59 = vmul.f32 %v1353_v43, %v4179_v44 }
 0x1be   : > { %v4208_v8 = vpop.permute.xlu1 %789  ;;  %v4210_v51 = vpop.permute.xlu0 %791 }
 0x1bf   : > { %6333 = vst [vmem:[#allocation57_spill] sm:$0xff] %v4210_v51 }
 0x1c0   : > { %1324 = vrot.lane.b32.xlu1 %v1316_v17, %s3451_s10  ;;  %1340 = vrot.lane.b32.xlu0 %v1334_v28, %s3451_s10  ;;  %v1354_v17 = vmul.f32 %v1353_v43, %v4175_v58  ;;  %v1355_v28 = vmul.f32 %v1353_v43, %v4184_v57  ;;  %v1375_v43 = vmul.f32 %v1373_v13, %v4184_v57 }
 0x1c2   : > { %v4216_v23 = vpop.permute.xlu1 %807  ;;  %v4219_v2 = vpop.permute.xlu0 %809  ;;  %v4416_v54 = vstv %s4343_s12  ;;  %s3175_s12 = sld [smem:[#allocation3 + $0x63]] }
 0x1c3   : > { %6368 = vst [vmem:[#allocation92_spill] sm:$0xff] %v4416_v54  ;;  %v437_v54 = vadd.f32 %v3985_v30, %v3767_v11 }
 0x1c4   : > { %1342 = vrot.lane.b32.xlu1 %v1335_v48, %s3451_s10  ;;  %1344 = vrot.lane.b32.xlu0 %v1336_v62, %s3451_s10  ;;  %v1374_v62 = vmul.f32 %v1373_v13, %v4175_v58 }
 0x1c5   : > { %v557_v11 = vadd.f32 %v4057_v46, %v437_v54 }
 0x1c6   : > { %v4223_v51 = vpop.permute.xlu1 %811  ;;  %v4226_v33 = vpop.permute.xlu0 %827 }
 0x1c7   : > { %6334 = vst [vmem:[#allocation58_spill] sm:$0xff] %v4223_v51  ;;  %v1376_v51 = vmul.f32 %v1373_v13, %v4179_v44 }
 0x1c8   : > { %1360 = vrot.lane.b32.xlu1 %v1354_v17, %s3451_s10  ;;  %1362 = vrot.lane.b32.xlu0 %v1355_v28, %s3451_s10  ;;  %v1393_v28 = vstv %s3153_s19  ;;  %s4349_s19 = sld [smem:[#allocation3 + $0x40]] }
 0x1c9   : > { %v1396_v13 = vmul.f32 %v1393_v28, %v4179_v44 }
 0x1ca   : > { %v4232_v40 = vpop.permute.xlu1 %829  ;;  %v4234_v48 = vpop.permute.xlu0 %831 }
 0x1cb   : > { %6335 = vst [vmem:[#allocation59_spill] sm:$0xff] %v4232_v40  ;;  %6336 = vst [vmem:[#allocation60_spill] sm:$0xff] %v4234_v48 }
 0x1cc   : > { %1364 = vrot.lane.b32.xlu1 %v1356_v59, %s3451_s10  ;;  %1380 = vrot.lane.b32.xlu0 %v1374_v62, %s3451_s10  ;;  %v1394_v59 = vmul.f32 %v1393_v28, %v4175_v58  ;;  %v1395_v62 = vmul.f32 %v1393_v28, %v4184_v57 }
 0x1ce   : > { %v4240_v39 = vpop.permute.xlu1 %847  ;;  %v4243_v17 = vpop.permute.xlu0 %849  ;;  %v4419_v40 = vstv %s4349_s19  ;;  %s3177_s19 = sld [smem:[#allocation3 + $0x65]] }
 0x1cf   : > { %6337 = vst [vmem:[#allocation61_spill] sm:$0xff] %v4240_v39  ;;  %6338 = vst [vmem:[#allocation62_spill] sm:$0xff] %v4243_v17  ;;  %v4377_v17 = vstv %s4318_s27  ;;  %v4386_v39 = vstv %s4325_s15  ;;  %s4671_s27 = sld [smem:[#allocation3 + $0x41]]  ;;  %s4708_s15 = sld [smem:[#allocation3 + $0x5c]] }
 0x1d0   : > { %1382 = vrot.lane.b32.xlu1 %v1375_v43, %s3451_s10  ;;  %1384 = vrot.lane.b32.xlu0 %v1376_v51, %s3451_s10  ;;  %v4258_v43 = vld [vmem:[#allocation2 + $0x29] sm:$0x1]  ;;  %6359 = vst [vmem:[#allocation83_spill] sm:$0xff] %v4377_v17  ;;  %6361 = vst [vmem:[#allocation85_spill] sm:$0xff] %v4386_v39  ;;  %v4413_v39 = vstv %s4347_s18  ;;  %s3176_s18 = sld [smem:[#allocation3 + $0x64]] }
 0x1d1   : > { %6341 = vst [vmem:[#allocation65_spill] sm:$0xff] %v4258_v43  ;;  %v1416_v28 = vmul.f32 %v1413_v50, %v4258_v43  ;;  %6369 = vst [vmem:[#allocation93_spill] sm:$0xff] %v4419_v40  ;;  %v1574_v24 = vmul.f32 %v4413_v39, %v4372_v10 }
 0x1d2   : > { %v4247_v48 = vpop.permute.xlu1 %851  ;;  %v4250_v47 = vpop.permute.xlu0 %867 }
 0x1d3   : > { %6339 = vst [vmem:[#allocation63_spill] sm:$0xff] %v4247_v48  ;;  %6340 = vst [vmem:[#allocation64_spill] sm:$0xff] %v4250_v47  ;;  %v4262_v48 = vld [vmem:[#allocation2 + $0x21] sm:$0xff] }
 0x1d4   : > { %1400 = vrot.lane.b32.xlu1 %v1394_v59, %s3451_s10  ;;  %1402 = vrot.lane.b32.xlu0 %v1395_v62, %s3451_s10  ;;  %v1415_v62 = vmul.f32 %v1413_v50, %v4262_v48 }
 0x1d6   : > { %v4260_v51 = vpop.permute.xlu1 %869  ;;  %v4264_v5 = vpop.permute.xlu0 %871 }
 0x1d7   : > { %6342 = vst [vmem:[#allocation66_spill] sm:$0xff] %v4260_v51  ;;  %6343 = vst [vmem:[#allocation67_spill] sm:$0xff] %v4264_v5  ;;  %v1433_v51 = vstv %s3155_s24  ;;  %s4358_s24 = sld [smem:[#allocation3 + $0x58]] }
 0x1d8   : > { %1404 = vrot.lane.b32.xlu1 %v1396_v13, %s3451_s10  ;;  %1420 = vrot.lane.b32.xlu0 %v1414_v37, %s3451_s10  ;;  %v1434_v13 = vmul.f32 %v1433_v51, %v4253_v21  ;;  %v1435_v37 = vmul.f32 %v1433_v51, %v4262_v48  ;;  %v1436_v50 = vmul.f32 %v1433_v51, %v4258_v43 }
 0x1da   : > { %v4270_v59 = vpop.permute.xlu1 %887  ;;  %v4273_v44 = vpop.permute.xlu0 %889 }
 0x1db   : > { %6344 = vst [vmem:[#allocation68_spill] sm:$0xff] %v4270_v59  ;;  %6345 = vst [vmem:[#allocation69_spill] sm:$0xff] %v4273_v44  ;;  %v1453_v59 = vstv %s3156_s29  ;;  %s4401_s29 = sld [smem:[#allocation3 + $0x59]] }
 0x1dc   : > { %1422 = vrot.lane.b32.xlu1 %v1415_v62, %s3451_s10  ;;  %1424 = vrot.lane.b32.xlu0 %v1416_v28, %s3451_s10  ;;  %v1454_v28 = vmul.f32 %v1453_v59, %v4253_v21  ;;  %v1455_v51 = vmul.f32 %v1453_v59, %v4262_v48 }
 0x1de   : > { %v4277_v5 = vpop.permute.xlu1 %891  ;;  %v4280_v12 = vpop.permute.xlu0 %907 }
 0x1df   : > { %6346 = vst [vmem:[#allocation70_spill] sm:$0xff] %v4277_v5  ;;  %v1456_v5 = vmul.f32 %v1453_v59, %v4258_v43 }
 0x1e0   : > { %1440 = vrot.lane.b32.xlu1 %v1434_v13, %s3451_s10  ;;  %1442 = vrot.lane.b32.xlu0 %v1435_v37, %s3451_s10  ;;  %v1473_v37 = vstv %s3157_s22  ;;  %s4430_s22 = sld [smem:[#allocation3 + $0x42]] }
 0x1e1   : > { %v1476_v59 = vmul.f32 %v1473_v37, %v4258_v43 }
 0x1e2   : > { %v4286_v44 = vpop.permute.xlu1 %909  ;;  %v4288_v62 = vpop.permute.xlu0 %911 }
 0x1e3   : > { %6347 = vst [vmem:[#allocation71_spill] sm:$0xff] %v4288_v62 }
 0x1e4   : > { %1444 = vrot.lane.b32.xlu1 %v1436_v50, %s3451_s10  ;;  %1460 = vrot.lane.b32.xlu0 %v1454_v28, %s3451_s10  ;;  %v1474_v50 = vmul.f32 %v1473_v37, %v4253_v21  ;;  %v1475_v28 = vmul.f32 %v1473_v37, %v4262_v48  ;;  %v1496_v37 = vmul.f32 %v1493_v14, %v4258_v43 }
 0x1e6   : > { %v4294_v4 = vpop.permute.xlu1 %927  ;;  %v4297_v13 = vpop.permute.xlu0 %929 }
 0x1e8   : > { %1462 = vrot.lane.b32.xlu1 %v1455_v51, %s3451_s10  ;;  %1464 = vrot.lane.b32.xlu0 %v1456_v5, %s3451_s10 }
 0x1ea   : > { %v4301_v62 = vpop.permute.xlu1 %931  ;;  %v4304_v47 = vpop.permute.xlu0 %947 }
 0x1eb   : > { %6348 = vst [vmem:[#allocation72_spill] sm:$0xff] %v4301_v62  ;;  %6349 = vst [vmem:[#allocation73_spill] sm:$0xff] %v4304_v47  ;;  %v4447_v47 = vstv %s4358_s24  ;;  %s3179_s24 = sld [smem:[#allocation3 + $0x67]] }
 0x1ec   : > { %1480 = vrot.lane.b32.xlu1 %v1474_v50, %s3451_s10  ;;  %1482 = vrot.lane.b32.xlu0 %v1475_v28, %s3451_s10  ;;  %v1494_v50 = vmul.f32 %v1493_v14, %v4253_v21 }
 0x1ee   : > { %v4316_v5 = vpop.permute.xlu1 %949  ;;  %v4322_v51 = vpop.permute.xlu0 %951 }
 0x1ef   : > { %6350 = vst [vmem:[#allocation74_spill] sm:$0xff] %v4316_v5  ;;  %6351 = vst [vmem:[#allocation75_spill] sm:$0xff] %v4322_v51  ;;  %v1495_v51 = vmul.f32 %v1493_v14, %v4262_v48  ;;  %v4404_v5 = vstv %s4334_s9  ;;  %s3172_s9 = sld [smem:[#allocation3 + $0x60]] }
 0x1f0   : > { %1484 = vrot.lane.b32.xlu1 %v1476_v59, %s3451_s10  ;;  %1500 = vrot.lane.b32.xlu0 %v1494_v50, %s3451_s10  ;;  %v1513_v50 = vstv %s3159_s30  ;;  %6365 = vst [vmem:[#allocation89_spill] sm:$0xff] %v4404_v5  ;;  %s4556_s30 = sld [smem:[#allocation3 + $0x44]] }
 0x1f1   : > { %v1514_v62 = vmul.f32 %v1513_v50, %v4253_v21  ;;  %v1515_v42 = vmul.f32 %v1513_v50, %v4262_v48 }
 0x1f2   : > { %v4338_v28 = vpop.permute.xlu1 %967  ;;  %v4345_v59 = vpop.permute.xlu0 %969 }
 0x1f3   : > { %6352 = vst [vmem:[#allocation76_spill] sm:$0xff] %v4338_v28  ;;  %6353 = vst [vmem:[#allocation77_spill] sm:$0xff] %v4345_v59  ;;  %v4364_v28 = vstv %s4309_s0  ;;  %s4593_s0 = sld [smem:[#allocation3 + $0x45]] }
 0x1f4   : > { %1502 = vrot.lane.b32.xlu1 %v1495_v51, %s3451_s10  ;;  %1504 = vrot.lane.b32.xlu0 %v1496_v37, %s3451_s10  ;;  %6356 = vst [vmem:[#allocation80_spill] sm:$0xff] %v4364_v28  ;;  %v4367_v51 = vstv %s4312_s4  ;;  %v4370_v37 = vstv %s4314_s5  ;;  %s4635_s4 = sld [smem:[#allocation3 + $0x46]]  ;;  %s4650_s5 = sld [smem:[#allocation3 + $0x5b]] }
 0x1f5   : > { %6357 = vst [vmem:[#allocation81_spill] sm:$0xff] %v4367_v51  ;;  %6358 = vst [vmem:[#allocation82_spill] sm:$0xff] %v4370_v37  ;;  %v4468_v46 = vmul.f32 %v4370_v37, %v4175_v58 }
 0x1f6   : > { %v4355_v14 = vpop.permute.xlu1 %971  ;;  %v4360_v59 = vpop.permute.xlu0 %987 }
 0x1f7   : > { %6354 = vst [vmem:[#allocation78_spill] sm:$0xff] %v4355_v14  ;;  %6355 = vst [vmem:[#allocation79_spill] sm:$0xff] %v4360_v59  ;;  %v1516_v14 = vmul.f32 %v1513_v50, %v4258_v43  ;;  %v4380_v59 = vstv %s4320_s6  ;;  %v436_v50 = vadd.f32 %v3979_v19, %v3750_v63  ;;  %v1535_v19 = vmul.f32 %v1533_v26, %v4382_v7  ;;  %s4682_s6 = sld [smem:[#allocation3 + $0x47]] }
 0x1f8   : > { %1520 = vrot.lane.b32.xlu1 %v1514_v62, %s3451_s10  ;;  %6360 = vst [vmem:[#allocation84_spill] sm:$0xff] %v4380_v59  ;;  %1522 = vrot.lane.b32.xlu0 %v1515_v42, %s3451_s10  ;;  %v4392_v62 = vstv %s4330_s8  ;;  %6372 = vst [vmem:[#allocation96_spill] sm:$0xff] %v4468_v46  ;;  %s3171_s8 = sld [smem:[#allocation3 + $0x5f]] }
 0x1f9   : > { %6363 = vst [vmem:[#allocation87_spill] sm:$0xff] %v4392_v62  ;;  %v556_v63 = vadd.f32 %v4052_v32, %v436_v50  ;;  %v1536_v32 = vmul.f32 %v1533_v26, %v4394_v61  ;;  %v4438_v50 = vstv %s4353_s26  ;;  %v4454_v26 = vmul.f32 %v4367_v51, %v4175_v58  ;;  %s3178_s26 = sld [smem:[#allocation3 + $0x66]] }
 0x1fa   : > { %v4398_v43 = vpop.permute.xlu1 %989  ;;  %v4409_v42 = vpop.permute.xlu0 %991  ;;  %v4472_v54 = vmul.f32 %v4438_v50, %v4372_v10 }
 0x1fb   : > { %6364 = vst [vmem:[#allocation88_spill] sm:$0xff] %v4398_v43  ;;  %6367 = vst [vmem:[#allocation91_spill] sm:$0xff] %v4409_v42  ;;  %v1144_v43 = vmul.f32 %v4364_v28, %v4175_v58  ;;  %v4428_v42 = vmul.f32 %v4364_v28, %v4184_v57  ;;  %v676_v40 = vadd.f32 %v4124_v16, %v556_v63 }
 0x1fc   : > { %1524 = vrot.lane.b32.xlu1 %v1516_v14, %s3451_s10  ;;  %1540 = vrot.lane.b32.xlu0 %v1534_v22, %s3451_s10  ;;  %v1554_v14 = vmul.f32 %v1553_v34, %v4372_v10  ;;  %v1555_v28 = vmul.f32 %v1553_v34, %v4382_v7  ;;  %v4458_v22 = vmul.f32 %v4367_v51, %v4184_v57 }
 0x1fd   : > { %v4462_v16 = vmul.f32 %v4413_v39, %v4382_v7  ;;  %v796_v63 = vadd.f32 %v4202_v38, %v676_v40  ;;  %v4476_v51 = vmul.f32 %v4438_v50, %v4382_v7  ;;  %v677_v40 = vadd.f32 %v4129_v27, %v557_v11 }
 0x1fe   : > { %v4441_v53 = vpop.permute.xlu1 %1007  ;;  %v4450_v30 = vpop.permute.xlu0 %1009  ;;  %v4486_v38 = vmul.f32 %v4370_v37, %v4184_v57  ;;  %v4508_v37 = vmul.f32 %v4377_v17, %v4184_v57 }
 0x1ff   : > { %6370 = vst [vmem:[#allocation94_spill] sm:$0xff] %v4441_v53  ;;  %6371 = vst [vmem:[#allocation95_spill] sm:$0xff] %v4450_v30  ;;  %v456_v30 = vadd.f32 %v3993_v49, %v3781_v25  ;;  %v457_v53 = vadd.f32 %v3996_v55, %v3783_v29  ;;  %v916_v46 = vadd.f32 %v4280_v12, %v796_v63  ;;  %v4502_v49 = vstv %s4401_s29  ;;  %s3180_s29 = sld [smem:[#allocation3 + $0x68]] }
 0x200   : > { %1542 = vrot.lane.b32.xlu1 %v1535_v19, %s3451_s10  ;;  %6373 = vst [vmem:[#allocation97_spill] sm:$0xff] %v4476_v51  ;;  %1544 = vrot.lane.b32.xlu0 %v1536_v32, %s3451_s10  ;;  %v4490_v19 = vmul.f32 %v4447_v47, %v4372_v10  ;;  %v4499_v25 = vmul.f32 %v4377_v17, %v4175_v58 }
 0x201   : > { %v576_v27 = vadd.f32 %v4065_v60, %v456_v30  ;;  %v797_v32 = vadd.f32 %v4208_v8, %v677_v40  ;;  %v4512_v29 = vmul.f32 %v4447_v47, %v4382_v7  ;;  %v577_v55 = vadd.f32 %v4068_v0, %v457_v53 }
 0x202   : > { %v4495_v51 = vpop.permute.xlu1 %1011  ;;  %v1028_v11 = vpop.permute.xlu0 %1027  ;;  %v1556_v63 = vmul.f32 %v1553_v34, %v4394_v61  ;;  %v4525_v30 = vmul.f32 %v4380_v59, %v4175_v58  ;;  %v4529_v0 = vmul.f32 %v4502_v49, %v4372_v10  ;;  %v476_v34 = vadd.f32 %v4004_v31, %v3803_v56 }
 0x203   : > { %6374 = vst [vmem:[#allocation98_spill] sm:$0xff] %v4495_v51  ;;  %v1036_v12 = vadd.f32 %v1028_v11, %v916_v46  ;;  %v4518_v51 = vstv %s4430_s22  ;;  %v696_v8 = vadd.f32 %v4137_v45, %v576_v27  ;;  %v917_v60 = vadd.f32 %v4286_v44, %v797_v32  ;;  %s3181_s22 = sld [smem:[#allocation3 + $0x69]] }
 0x204   : > { %1560 = vrot.lane.b32.xlu1 %v1554_v14, %s3451_s10  ;;  %6375 = vst [vmem:[#allocation99_spill] sm:$0xff] %v4518_v51  ;;  %1562 = vrot.lane.b32.xlu0 %v1555_v28, %s3451_s10  ;;  %v697_v53 = vadd.f32 %v4140_v3, %v577_v55  ;;  %v1195_v44 = vmul.f32 %v4392_v62, %v4253_v21 }
 0x205   : > { %v1147_v14 = vadd.f32 %v1144_v43, %v1036_v12  ;;  %v816_v28 = vadd.f32 %v4216_v23, %v696_v8  ;;  %v1246_v27 = vmul.f32 %v4518_v51, %v4372_v10  ;;  %v1196_v32 = vmul.f32 %v4392_v62, %v4262_v48 }
 0x206   : > { %v1030_v45 = vpop.permute.xlu1 %1029  ;;  %v4537_v40 = vpop.permute.xlu0 %1031  ;;  %v596_v56 = vadd.f32 %v4076_v9, %v476_v34  ;;  %v817_v3 = vadd.f32 %v4219_v2, %v697_v53  ;;  %v4547_v43 = vstv %s4478_s21  ;;  %v477_v23 = vadd.f32 %v4009_v35, %v3814_v36  ;;  %s3182_s21 = sld [smem:[#allocation3 + $0x6a]] }
 0x207   : > { %v1037_v46 = vadd.f32 %v1030_v45, %v917_v60  ;;  %6376 = vst [vmem:[#allocation100_spill] sm:$0xff] %v4537_v40  ;;  %v1198_v31 = vadd.f32 %v1195_v44, %v1147_v14  ;;  %6377 = vst [vmem:[#allocation101_spill] sm:$0xff] %v4547_v43  ;;  %v936_v11 = vadd.f32 %v4294_v4, %v816_v28  ;;  %v6378_v45 = vld [vmem:[#allocation73_spill] sm:$0xff] }
 0x208   : > { %1564 = vrot.lane.b32.xlu1 %v1556_v63, %s3451_s10  ;;  %1580 = vrot.lane.b32.xlu0 %v1574_v24, %s3451_s10  ;;  %v1576_v12 = vmul.f32 %v4413_v39, %v4394_v61  ;;  %v716_v9 = vadd.f32 %v4148_v52, %v596_v56  ;;  %v937_v2 = vadd.f32 %v4297_v13, %v817_v3  ;;  %v6382_v3 = vld [vmem:[#allocation90_spill] sm:$0xff] }
 0x209   : > { %v1148_v55 = vadd.f32 %v4428_v42, %v1037_v46  ;;  %v4560_v8 = vadd.f32 %v1246_v27, %v1198_v31  ;;  %v1247_v36 = vmul.f32 %v4518_v51, %v4382_v7  ;;  %v597_v4 = vadd.f32 %v4081_v18, %v477_v23 }
 0x20a   : > { %v1048_v63 = vpop.permute.xlu1 %1047  ;;  %v1050_v42 = vpop.permute.xlu0 %1049  ;;  %v1203_v39 = vmul.f32 %v4404_v5, %v4253_v21  ;;  %v836_v60 = vadd.f32 %v4226_v33, %v716_v9  ;;  %v1254_v52 = vmul.f32 %v4547_v43, %v4372_v10  ;;  %v1204_v13 = vmul.f32 %v4404_v5, %v4262_v48  ;;  %v6385_v9 = vld [vmem:[#allocation74_spill] sm:$0xff] }
 0x20b   : > { %v1056_v35 = vadd.f32 %v1048_v63, %v936_v11  ;;  %v1199_v24 = vadd.f32 %v1196_v32, %v1148_v55  ;;  %v1057_v34 = vadd.f32 %v1050_v42, %v937_v2  ;;  %v496_v18 = vadd.f32 %v4017_v1, %v3845_v15  ;;  %v6380_v1 = vld [vmem:[#allocation35_spill] sm:$0xff]  ;;  %v6386_v63 = vld [vmem:[#allocation97_spill] sm:$0xff]  ;;  %v6389_v42 = vld [vmem:[#allocation26_spill] sm:$0xff] }
 0x20c   : > { %1582 = vrot.lane.b32.xlu1 %v4462_v16, %s3451_s10  ;;  %v717_v53 = vadd.f32 %v4153_v20, %v597_v4  ;;  %1584 = vrot.lane.b32.xlu0 %v1576_v12, %s3451_s10  ;;  %v497_v16 = vadd.f32 %v4020_v6, %v3847_v41  ;;  %v956_v44 = vadd.f32 %v6378_v45, %v836_v60  ;;  %v6383_v41 = vld [vmem:[#allocation36_spill] sm:$0xff]  ;;  %v6384_v55 = vld [vmem:[#allocation47_spill] sm:$0xff]  ;;  %v4607_v4 = vstv %s4556_s30  ;;  %s3183_s30 = sld [smem:[#allocation3 + $0x6b]] }
 0x20d   : > { %v1155_v14 = vadd.f32 %v4454_v26, %v1056_v35  ;;  %v4579_v33 = vadd.f32 %v1247_v36, %v1199_v24  ;;  %v1156_v28 = vadd.f32 %v4458_v22, %v1057_v34  ;;  %v1255_v15 = vmul.f32 %v4547_v43, %v4382_v7  ;;  %v6381_v26 = vld [vmem:[#allocation59_spill] sm:$0xff]  ;;  %6387 = vst [vmem:[#allocation35_spill] sm:$0xff] %v4607_v4  ;;  %v6388_v35 = vld [vmem:[#allocation16_spill] sm:$0xff] }
 0x20e   : > { %v4585_v46 = vpop.permute.xlu1 %1051  ;;  %v616_v20 = vadd.f32 %v6380_v1, %v496_v18  ;;  %v837_v27 = vadd.f32 %v6381_v26, %v717_v53  ;;  %v1068_v32 = vpop.permute.xlu0 %1067  ;;  %v1211_v31 = vmul.f32 %v6382_v3, %v4253_v21  ;;  %v617_v6 = vadd.f32 %v6383_v41, %v497_v16  ;;  %v6391_v60 = vld [vmem:[#allocation96_spill] sm:$0xff]  ;;  %v6392_v18 = vld [vmem:[#allocation61_spill] sm:$0xff]  ;;  %v6395_v1 = vld [vmem:[#allocation62_spill] sm:$0xff] }
 0x20f   : > { %6379 = vst [vmem:[#allocation73_spill] sm:$0xff] %v4585_v46  ;;  %v1206_v56 = vadd.f32 %v1203_v39, %v1155_v14  ;;  %v1076_v22 = vadd.f32 %v1068_v32, %v956_v44  ;;  %v1596_v23 = vmul.f32 %v4438_v50, %v4394_v61  ;;  %v1207_v11 = vadd.f32 %v1204_v13, %v1156_v28  ;;  %v6390_v39 = vld [vmem:[#allocation48_spill] sm:$0xff]  ;;  %v6394_v44 = vld [vmem:[#allocation38_spill] sm:$0xff]  ;;  %v6397_v32 = vld [vmem:[#allocation27_spill] sm:$0xff] }
 0x210   : > { %1600 = vrot.lane.b32.xlu1 %v4472_v54, %s3451_s10  ;;  %v736_v12 = vadd.f32 %v6384_v55, %v616_v20  ;;  %v957_v2 = vadd.f32 %v6385_v9, %v837_v27  ;;  %1602 = vrot.lane.b32.xlu0 %v6386_v63, %s3451_s10  ;;  %v516_v24 = vadd.f32 %v6389_v42, %v6388_v35  ;;  %v6396_v27 = vld [vmem:[#allocation17_spill] sm:$0xff]  ;;  %v6398_v41 = vld [vmem:[#allocation76_spill] sm:$0xff]  ;;  %v6401_v35 = vld [vmem:[#allocation39_spill] sm:$0xff]  ;;  %v1893_v51 = vstv %s3178_s26  ;;  %s5076_s26 = sld [smem:[#allocation3 + $0x90]] }
 0x211   : > { %v4604_v36 = vadd.f32 %v1254_v52, %v1206_v56  ;;  %v737_v54 = vadd.f32 %v6390_v39, %v617_v6  ;;  %v1163_v34 = vadd.f32 %v6391_v60, %v1076_v22  ;;  %v4613_v13 = vadd.f32 %v1255_v15, %v1207_v11 }
 0x212   : > { %v1070_v50 = vpop.permute.xlu1 %1069  ;;  %v856_v53 = vadd.f32 %v6392_v18, %v736_v12  ;;  %v4616_v16 = vpop.permute.xlu0 %1071  ;;  %v1635_v52 = vmul.f32 %v4502_v49, %v4382_v7  ;;  %v1212_v45 = vmul.f32 %v6382_v3, %v4262_v48  ;;  %v636_v28 = vadd.f32 %v6394_v44, %v516_v24  ;;  %v6400_v12 = vld [vmem:[#allocation77_spill] sm:$0xff] }
 0x213   : > { %v1077_v14 = vadd.f32 %v1070_v50, %v957_v2  ;;  %6393 = vst [vmem:[#allocation59_spill] sm:$0xff] %v4616_v16  ;;  %v857_v20 = vadd.f32 %v6395_v1, %v737_v54  ;;  %v1262_v15 = vmul.f32 %v4607_v4, %v4372_v10  ;;  %v1214_v26 = vadd.f32 %v1211_v31, %v1163_v34  ;;  %v6404_v34 = vld [vmem:[#allocation92_spill] sm:$0xff] }
 0x214   : > { %1604 = vrot.lane.b32.xlu1 %v1596_v23, %s3451_s10  ;;  %v517_v56 = vadd.f32 %v6397_v32, %v6396_v27  ;;  %v976_v6 = vadd.f32 %v6398_v41, %v856_v53  ;;  %1620 = vrot.lane.b32.xlu0 %v4490_v19, %s3451_s10  ;;  %v1616_v11 = vmul.f32 %v4447_v47, %v4394_v61  ;;  %v6399_v23 = vld [vmem:[#allocation50_spill] sm:$0xff]  ;;  %v4645_v39 = vstv %s4593_s0  ;;  %v6403_v47 = vld [vmem:[#allocation64_spill] sm:$0xff]  ;;  %v6405_v53 = vld [vmem:[#allocation19_spill] sm:$0xff]  ;;  %s3202_s0 = sld [smem:[#allocation3 + $0x7e]] }
 0x215   : > { %v1164_v22 = vadd.f32 %v4486_v38, %v1077_v14  ;;  %v756_v55 = vadd.f32 %v6399_v23, %v636_v28  ;;  %v977_v31 = vadd.f32 %v6400_v12, %v857_v20  ;;  %v4639_v2 = vadd.f32 %v1262_v15, %v1214_v26  ;;  %6402 = vst [vmem:[#allocation36_spill] sm:$0xff] %v4645_v39  ;;  %v6406_v14 = vld [vmem:[#allocation29_spill] sm:$0xff]  ;;  %v6409_v15 = vld [vmem:[#allocation30_spill] sm:$0xff]  ;;  %v6410_v27 = vld [vmem:[#allocation79_spill] sm:$0xff] }
 0x216   : > { %v1088_v9 = vpop.permute.xlu1 %1087  ;;  %v1263_v63 = vmul.f32 %v4607_v4, %v4382_v7  ;;  %v637_v38 = vadd.f32 %v6401_v35, %v517_v56  ;;  %v1090_v24 = vpop.permute.xlu0 %1089  ;;  %v1219_v50 = vmul.f32 %v6404_v34, %v4253_v21  ;;  %v1220_v18 = vmul.f32 %v6404_v34, %v4262_v48 }
 0x217   : > { %v1096_v42 = vadd.f32 %v1088_v9, %v976_v6  ;;  %v1215_v19 = vadd.f32 %v1212_v45, %v1164_v22  ;;  %v876_v54 = vadd.f32 %v6403_v47, %v756_v55  ;;  %v1097_v60 = vadd.f32 %v1090_v24, %v977_v31  ;;  %v6407_v45 = vld [vmem:[#allocation52_spill] sm:$0xff]  ;;  %v6412_v22 = vld [vmem:[#allocation41_spill] sm:$0xff]  ;;  %v6414_v9 = vld [vmem:[#allocation42_spill] sm:$0xff] }
 0x218   : > { %1622 = vrot.lane.b32.xlu1 %v4512_v29, %s3451_s10  ;;  %v536_v44 = vadd.f32 %v6406_v14, %v6405_v53  ;;  %v757_v28 = vadd.f32 %v6407_v45, %v637_v38  ;;  %1624 = vrot.lane.b32.xlu0 %v1616_v11, %s3451_s10  ;;  %v6408_v29 = vld [vmem:[#allocation20_spill] sm:$0xff]  ;;  %v1270_v6 = vmul.f32 %v4645_v39, %v4372_v10  ;;  %v6413_v11 = vld [vmem:[#allocation66_spill] sm:$0xff] }
 0x219   : > { %v1171_v1 = vadd.f32 %v4499_v25, %v1096_v42  ;;  %v4661_v20 = vadd.f32 %v1263_v63, %v1215_v19  ;;  %v537_v26 = vadd.f32 %v6409_v15, %v6408_v29  ;;  %v996_v32 = vadd.f32 %v6410_v27, %v876_v54  ;;  %v6415_v42 = vld [vmem:[#allocation54_spill] sm:$0xff]  ;;  %v6416_v19 = vld [vmem:[#allocation88_spill] sm:$0xff]  ;;  %v6424_v15 = vld [vmem:[#allocation85_spill] sm:$0xff] }
 0x21a   : > { %v1172_v56 = vadd.f32 %v4508_v37, %v1097_v60  ;;  %v4667_v41 = vpop.permute.xlu1 %1091  ;;  %v656_v25 = vadd.f32 %v6412_v22, %v536_v44  ;;  %v877_v23 = vadd.f32 %v6413_v11, %v757_v28  ;;  %v1108_v55 = vpop.permute.xlu0 %1107  ;;  %v1271_v31 = vmul.f32 %v4645_v39, %v4382_v7  ;;  %v6422_v45 = vld [vmem:[#allocation68_spill] sm:$0xff]  ;;  %v6425_v27 = vld [vmem:[#allocation69_spill] sm:$0xff]  ;;  %v6426_v22 = vld [vmem:[#allocation94_spill] sm:$0xff] }
 0x21b   : > { %6411 = vst [vmem:[#allocation47_spill] sm:$0xff] %v4667_v41  ;;  %v1222_v12 = vadd.f32 %v1219_v50, %v1171_v1  ;;  %v657_v63 = vadd.f32 %v6414_v9, %v537_v26  ;;  %v1116_v37 = vadd.f32 %v1108_v55, %v996_v32  ;;  %v1636_v35 = vmul.f32 %v4502_v49, %v4394_v61  ;;  %v6419_v50 = vld [vmem:[#allocation55_spill] sm:$0xff] }
 0x21c   : > { %1640 = vrot.lane.b32.xlu1 %v4529_v0, %s3451_s10  ;;  %v1223_v38 = vadd.f32 %v1220_v18, %v1172_v56  ;;  %v776_v24 = vadd.f32 %v6415_v42, %v656_v25  ;;  %v997_v47 = vadd.f32 %v6416_v19, %v877_v23  ;;  %1642 = vrot.lane.b32.xlu0 %v1635_v52, %s3451_s10  ;;  %v4690_v60 = vstv %s4635_s4  ;;  %v6421_v18 = vld [vmem:[#allocation93_spill] sm:$0xff]  ;;  %v6427_v23 = vld [vmem:[#allocation51_spill] sm:$0xff]  ;;  %v6431_v42 = vld [vmem:[#allocation86_spill] sm:$0xff]  ;;  %s3203_s4 = sld [smem:[#allocation3 + $0x7f]] }
 0x21d   : > { %v4687_v54 = vadd.f32 %v1270_v6, %v1222_v12  ;;  %6418 = vst [vmem:[#allocation97_spill] sm:$0xff] %v4690_v60  ;;  %v777_v53 = vadd.f32 %v6419_v50, %v657_v63  ;;  %v1179_v0 = vadd.f32 %v4525_v30, %v1116_v37  ;;  %v1227_v44 = vmul.f32 %v6421_v18, %v4253_v21 }
 0x21e   : > { %v1110_v14 = vpop.permute.xlu1 %1109  ;;  %v4694_v49 = vadd.f32 %v1271_v31, %v1223_v38  ;;  %v896_v28 = vadd.f32 %v6422_v45, %v776_v24  ;;  %v1177_v1 = vmul.f32 %v4380_v59, %v4184_v57  ;;  %v4701_v29 = vpop.permute.xlu0 %1111  ;;  %v1654_v26 = vmul.f32 %v6424_v15, %v4175_v58  ;;  %v6428_v31 = vld [vmem:[#allocation95_spill] sm:$0xff] }
 0x21f   : > { %6417 = vst [vmem:[#allocation74_spill] sm:$0xff] %v4687_v54  ;;  %v1117_v52 = vadd.f32 %v1110_v14, %v997_v47  ;;  %6423 = vst [vmem:[#allocation26_spill] sm:$0xff] %v4701_v29  ;;  %v897_v30 = vadd.f32 %v6425_v27, %v777_v53  ;;  %v1673_v32 = vstv %s4650_s5  ;;  %v1278_v56 = vmul.f32 %v4690_v60, %v4372_v10  ;;  %s3204_s5 = sld [smem:[#allocation3 + $0x80]]  ;;  %v5137_v59 = vld [vmem:[#allocation2 + $0x3a] sm:$0xff] }
 0x220   : > { %6420 = vst [vmem:[#allocation16_spill] sm:$0xff] %v4694_v49  ;;  %1644 = vrot.lane.b32.xlu1 %v1636_v35, %s3451_s10  ;;  %v1230_v6 = vadd.f32 %v1227_v44, %v1179_v0  ;;  %v1016_v25 = vadd.f32 %v6426_v22, %v896_v28  ;;  %1660 = vrot.lane.b32.xlu0 %v1654_v26, %s3452_s23  ;;  %v4724_v38 = vstv %s4671_s27  ;;  %v4734_v44 = vstv %s4682_s6  ;;  %s3205_s27 = sld [smem:[#allocation3 + $0x81]]  ;;  %s3206_s6 = sld [smem:[#allocation3 + $0x82]] }
 0x221   : > { %v1180_v11 = vadd.f32 %v1177_v1, %v1117_v52  ;;  %v1656_v55 = vmul.f32 %v6424_v15, %v6427_v23  ;;  %v1228_v12 = vmul.f32 %v6421_v18, %v4262_v48  ;;  %v1017_v9 = vadd.f32 %v6428_v31, %v897_v30  ;;  %6430 = vst [vmem:[#allocation96_spill] sm:$0xff] %v4724_v38 }
 0x222   : > { %v1128_v63 = vpop.permute.xlu1 %1127  ;;  %v1655_v37 = vmul.f32 %v6424_v15, %v4184_v57  ;;  %v4721_v35 = vadd.f32 %v1278_v56, %v1230_v6  ;;  %v1184_v24 = vmul.f32 %v6431_v42, %v4175_v58  ;;  %v1130_v47 = vpop.permute.xlu0 %1129  ;;  %v1279_v53 = vmul.f32 %v4690_v60, %v4382_v7  ;;  %6432 = vst [vmem:[#allocation61_spill] sm:$0xff] %v4734_v44 }
 0x223   : > { %v1136_v19 = vadd.f32 %v1128_v63, %v1016_v25  ;;  %v1231_v50 = vadd.f32 %v1228_v12, %v1180_v11  ;;  %v1185_v0 = vmul.f32 %v6431_v42, %v4184_v57  ;;  %v1137_v14 = vadd.f32 %v1130_v47, %v1017_v9 }
 0x224   : > { %6429 = vst [vmem:[#allocation48_spill] sm:$0xff] %v4721_v35  ;;  %1662 = vrot.lane.b32.xlu1 %v1655_v37, %s3452_s23  ;;  %1664 = vrot.lane.b32.xlu0 %v1656_v55, %s3452_s23  ;;  %v1235_v1 = vmul.f32 %v4724_v38, %v4253_v21  ;;  %v1674_v26 = vmul.f32 %v1673_v32, %v4175_v58  ;;  %v1693_v11 = vstv %s4708_s15  ;;  %v2166_v42 = vstv %s3202_s0  ;;  %s3207_s15 = sld [smem:[#allocation3 + $0x83]]  ;;  %s3214_s0 = sld [smem:[#allocation3 + $0x8a]] }
 0x225   : > { %v1187_v45 = vadd.f32 %v1184_v24, %v1136_v19  ;;  %v4737_v28 = vadd.f32 %v1279_v53, %v1231_v50  ;;  %v1188_v52 = vadd.f32 %v1185_v0, %v1137_v14  ;;  %v1236_v27 = vmul.f32 %v4724_v38, %v4262_v48 }
 0x226   : > { %v4741_v15 = vpop.permute.xlu1 %1131  ;;  %v4746_v30 = vpop.permute.xlu0 %1300  ;;  %v1675_v56 = vmul.f32 %v1673_v32, %v4184_v57  ;;  %v1286_v6 = vmul.f32 %v4734_v44, %v4372_v10  ;;  %v1676_v25 = vmul.f32 %v1673_v32, %v6427_v23  ;;  %v1287_v12 = vmul.f32 %v4734_v44, %v4382_v7 }
 0x227   : > { %6433 = vst [vmem:[#allocation38_spill] sm:$0xff] %v4737_v28  ;;  %6434 = vst [vmem:[#allocation62_spill] sm:$0xff] %v4741_v15  ;;  %v1238_v22 = vadd.f32 %v1235_v1, %v1187_v45  ;;  %v1239_v55 = vadd.f32 %v1236_v27, %v1188_v52  ;;  %v1694_v24 = vmul.f32 %v1693_v11, %v4175_v58  ;;  %v1713_v53 = vstv %s3169_s25  ;;  %v4950_v15 = vld [vmem:[#allocation2 + $0x2] sm:$0xff]  ;;  %s3208_s25 = sld [smem:[#allocation3 + $0x84]] }
 0x228   : > { %1680 = vrot.lane.b32.xlu1 %v1674_v26, %s3452_s23  ;;  %1682 = vrot.lane.b32.xlu0 %v1675_v56, %s3452_s23  ;;  %v1696_v32 = vmul.f32 %v1693_v11, %v6427_v23  ;;  %v1695_v47 = vmul.f32 %v1693_v11, %v4184_v57  ;;  %v1714_v14 = vmul.f32 %v1713_v53, %v4175_v58  ;;  %v1733_v26 = vstv %s3170_s7  ;;  %s3209_s7 = sld [smem:[#allocation3 + $0x85]] }
 0x229   : > { %v4757_v31 = vadd.f32 %v1286_v6, %v1238_v22  ;;  %v4761_v63 = vadd.f32 %v1287_v12, %v1239_v55  ;;  %v1715_v1 = vmul.f32 %v1713_v53, %v4184_v57  ;;  %v1716_v52 = vmul.f32 %v1713_v53, %v6427_v23  ;;  %6472 = vst [vmem:[#allocation112_spill] sm:$0xff] %v4950_v15 }
 0x22a   : > { %v4759_v9 = vpop.permute.xlu1 %1302  ;;  %v4763_v37 = vpop.permute.xlu0 %1304  ;;  %v1734_v6 = vmul.f32 %v1733_v26, %v4175_v58  ;;  %v1736_v22 = vmul.f32 %v1733_v26, %v6427_v23  ;;  %v1735_v11 = vmul.f32 %v1733_v26, %v4184_v57  ;;  %v1753_v12 = vstv %s3171_s8  ;;  %s3210_s8 = sld [smem:[#allocation3 + $0x86]] }
 0x22b   : > { %6435 = vst [vmem:[#allocation17_spill] sm:$0xff] %v4757_v31  ;;  %6436 = vst [vmem:[#allocation27_spill] sm:$0xff] %v4761_v63  ;;  %v1755_v53 = vmul.f32 %v1753_v12, %v4184_v57  ;;  %v1933_v44 = vstv %s3180_s29  ;;  %v1973_v38 = vstv %s3182_s21  ;;  %v2186_v18 = vstv %s3203_s4  ;;  %s3212_s29 = sld [smem:[#allocation3 + $0x88]]  ;;  %s3213_s21 = sld [smem:[#allocation3 + $0x89]] }
 0x22c   : > { %6437 = vst [vmem:[#allocation76_spill] sm:$0xff] %v4763_v37  ;;  %1684 = vrot.lane.b32.xlu1 %v1676_v25, %s3452_s23  ;;  %1700 = vrot.lane.b32.xlu0 %v1694_v24, %s3452_s23  ;;  %v1853_v37 = vstv %s3176_s18  ;;  %v2206_v29 = vstv %s3204_s5  ;;  %s5069_s18 = sld [smem:[#allocation3 + $0x6f]]  ;;  %s5090_s4 = sld [smem:[#allocation3 + $0x72]] }
 0x22d   : > { %s5094_s5 = sld [smem:[#allocation3 + $0x8b]] }
 0x22e   : > { %v4769_v19 = vpop.permute.xlu1 %1320  ;;  %v4772_v50 = vpop.permute.xlu0 %1322 }
 0x230   : > { %1702 = vrot.lane.b32.xlu1 %v1695_v47, %s3452_s23  ;;  %1704 = vrot.lane.b32.xlu0 %v1696_v32, %s3452_s23  ;;  %v1754_v32 = vmul.f32 %v1753_v12, %v4175_v58  ;;  %v6446_v58 = vld [vmem:[#allocation65_spill] sm:$0xff] }
 0x232   : > { %v4776_v0 = vpop.permute.xlu1 %1324  ;;  %v4779_v45 = vpop.permute.xlu0 %1340  ;;  %v5126_v28 = vstv %s5069_s18  ;;  %s5266_s18 = sld [smem:[#allocation3 + $0x7b]] }
 0x233   : > { %6438 = vst [vmem:[#allocation50_spill] sm:$0xff] %v4776_v0  ;;  %6503 = vst [vmem:[#allocation143_spill] sm:$0xff] %v5126_v28 }
 0x234   : > { %1720 = vrot.lane.b32.xlu1 %v1714_v14, %s3452_s23  ;;  %1722 = vrot.lane.b32.xlu0 %v1715_v1, %s3452_s23  ;;  %v1756_v14 = vmul.f32 %v1753_v12, %v6427_v23  ;;  %v1773_v1 = vstv %s3172_s9  ;;  %v1793_v12 = vstv %s3173_s28  ;;  %s3211_s9 = sld [smem:[#allocation3 + $0x87]]  ;;  %s5060_s28 = sld [smem:[#allocation3 + $0x6c]] }
 0x235   : > { %v1776_v57 = vmul.f32 %v1773_v1, %v6446_v58  ;;  %v1775_v23 = vmul.f32 %v1773_v1, %v4262_v48 }
 0x236   : > { %v4785_v27 = vpop.permute.xlu1 %1342  ;;  %v4787_v56 = vpop.permute.xlu0 %1344 }
 0x237   : > { %6439 = vst [vmem:[#allocation77_spill] sm:$0xff] %v4787_v56  ;;  %v1813_v56 = vstv %s3174_s11  ;;  %s5063_s11 = sld [smem:[#allocation3 + $0x6d]] }
 0x238   : > { %1724 = vrot.lane.b32.xlu1 %v1716_v52, %s3452_s23  ;;  %1740 = vrot.lane.b32.xlu0 %v1734_v6, %s3452_s23  ;;  %v1774_v6 = vmul.f32 %v1773_v1, %v4253_v21  ;;  %v1796_v1 = vmul.f32 %v1793_v12, %v6446_v58  ;;  %v1816_v4 = vmul.f32 %v1813_v56, %v6446_v58 }
 0x23a   : > { %v4793_v25 = vpop.permute.xlu1 %1360  ;;  %v4796_v55 = vpop.permute.xlu0 %1362 }
 0x23b   : > { %6440 = vst [vmem:[#allocation39_spill] sm:$0xff] %v4793_v25  ;;  %6441 = vst [vmem:[#allocation64_spill] sm:$0xff] %v4796_v55 }
 0x23c   : > { %1742 = vrot.lane.b32.xlu1 %v1735_v11, %s3452_s23  ;;  %1744 = vrot.lane.b32.xlu0 %v1736_v22, %s3452_s23 }
 0x23e   : > { %v4800_v24 = vpop.permute.xlu1 %1364  ;;  %v4803_v47 = vpop.permute.xlu0 %1380 }
 0x23f   : > { %6442 = vst [vmem:[#allocation19_spill] sm:$0xff] %v4800_v24  ;;  %6443 = vst [vmem:[#allocation29_spill] sm:$0xff] %v4803_v47 }
 0x240   : > { %1760 = vrot.lane.b32.xlu1 %v1754_v32, %s3452_s23  ;;  %1762 = vrot.lane.b32.xlu0 %v1755_v53, %s3452_s23  ;;  %v1794_v53 = vmul.f32 %v1793_v12, %v4253_v21 }
 0x242   : > { %v4809_v52 = vpop.permute.xlu1 %1382  ;;  %v4811_v26 = vpop.permute.xlu0 %1384 }
 0x243   : > { %6444 = vst [vmem:[#allocation52_spill] sm:$0xff] %v4809_v52  ;;  %6445 = vst [vmem:[#allocation20_spill] sm:$0xff] %v4811_v26 }
 0x244   : > { %1764 = vrot.lane.b32.xlu1 %v1756_v14, %s3452_s23  ;;  %1780 = vrot.lane.b32.xlu0 %v1774_v6, %s3452_s23  ;;  %v1795_v6 = vmul.f32 %v1793_v12, %v4262_v48  ;;  %v1815_v12 = vmul.f32 %v1813_v56, %v4262_v48 }
 0x246   : > { %v4817_v22 = vpop.permute.xlu1 %1400  ;;  %v4820_v11 = vpop.permute.xlu0 %1402 }
 0x247   : > { %6447 = vst [vmem:[#allocation30_spill] sm:$0xff] %v4817_v22  ;;  %6448 = vst [vmem:[#allocation79_spill] sm:$0xff] %v4820_v11  ;;  %v2286_v22 = vstv %s3208_s25  ;;  %s5107_s25 = sld [smem:[#allocation3 + $0x8e]] }
 0x248   : > { %1782 = vrot.lane.b32.xlu1 %v1775_v23, %s3452_s23  ;;  %1784 = vrot.lane.b32.xlu0 %v1776_v57, %s3452_s23  ;;  %v1814_v57 = vmul.f32 %v1813_v56, %v4253_v21 }
 0x24a   : > { %v4824_v32 = vpop.permute.xlu1 %1404  ;;  %v4827_v14 = vpop.permute.xlu0 %1420 }
 0x24b   : > { %6449 = vst [vmem:[#allocation41_spill] sm:$0xff] %v4824_v32 }
 0x24c   : > { %1800 = vrot.lane.b32.xlu1 %v1794_v53, %s3452_s23  ;;  %1802 = vrot.lane.b32.xlu0 %v1795_v6, %s3452_s23  ;;  %v1833_v6 = vstv %s3175_s12  ;;  %s5065_s12 = sld [smem:[#allocation3 + $0x6e]] }
 0x24d   : > { %v1836_v56 = vmul.f32 %v1833_v6, %v6446_v58 }
 0x24e   : > { %v4833_v0 = vpop.permute.xlu1 %1422  ;;  %v4835_v23 = vpop.permute.xlu0 %1424 }
 0x24f   : > { %6450 = vst [vmem:[#allocation66_spill] sm:$0xff] %v4835_v23 }
 0x250   : > { %1804 = vrot.lane.b32.xlu1 %v1796_v1, %s3452_s23  ;;  %1820 = vrot.lane.b32.xlu0 %v1814_v57, %s3452_s23  ;;  %v1834_v1 = vmul.f32 %v1833_v6, %v4253_v21  ;;  %v1835_v57 = vmul.f32 %v1833_v6, %v4262_v48  ;;  %v1855_v6 = vmul.f32 %v1853_v37, %v4262_v48 }
 0x252   : > { %v4841_v3 = vpop.permute.xlu1 %1440  ;;  %v4844_v53 = vpop.permute.xlu0 %1442  ;;  %v5123_v52 = vstv %s5065_s12  ;;  %s5247_s12 = sld [smem:[#allocation3 + $0x75]] }
 0x253   : > { %6502 = vst [vmem:[#allocation142_spill] sm:$0xff] %v5123_v52 }
 0x254   : > { %1822 = vrot.lane.b32.xlu1 %v1815_v12, %s3452_s23  ;;  %1824 = vrot.lane.b32.xlu0 %v1816_v4, %s3452_s23  ;;  %v1854_v4 = vmul.f32 %v1853_v37, %v4253_v21 }
 0x256   : > { %v4848_v23 = vpop.permute.xlu1 %1444  ;;  %v4851_v43 = vpop.permute.xlu0 %1460 }
 0x257   : > { %6451 = vst [vmem:[#allocation42_spill] sm:$0xff] %v4848_v23  ;;  %v1856_v23 = vmul.f32 %v1853_v37, %v6446_v58 }
 0x258   : > { %1840 = vrot.lane.b32.xlu1 %v1834_v1, %s3452_s23  ;;  %1842 = vrot.lane.b32.xlu0 %v1835_v57, %s3452_s23  ;;  %v1873_v57 = vstv %s3177_s19  ;;  %s5071_s19 = sld [smem:[#allocation3 + $0x70]] }
 0x259   : > { %v1876_v37 = vmul.f32 %v1873_v57, %v6446_v58  ;;  %v1895_v58 = vmul.f32 %v1893_v51, %v4382_v7 }
 0x25a   : > { %v4857_v32 = vpop.permute.xlu1 %1462  ;;  %v4859_v12 = vpop.permute.xlu0 %1464 }
 0x25b   : > { %6452 = vst [vmem:[#allocation54_spill] sm:$0xff] %v4857_v32  ;;  %6453 = vst [vmem:[#allocation88_spill] sm:$0xff] %v4859_v12 }
 0x25c   : > { %1844 = vrot.lane.b32.xlu1 %v1836_v56, %s3452_s23  ;;  %1860 = vrot.lane.b32.xlu0 %v1854_v4, %s3452_s23  ;;  %v1874_v56 = vmul.f32 %v1873_v57, %v4253_v21  ;;  %v1875_v4 = vmul.f32 %v1873_v57, %v4262_v48  ;;  %v1896_v21 = vmul.f32 %v1893_v51, %v4394_v61 }
 0x25e   : > { %v4865_v5 = vpop.permute.xlu1 %1480  ;;  %v4868_v1 = vpop.permute.xlu0 %1482 }
 0x25f   : > { %6454 = vst [vmem:[#allocation55_spill] sm:$0xff] %v4865_v5  ;;  %6455 = vst [vmem:[#allocation68_spill] sm:$0xff] %v4868_v1  ;;  %v5161_v5 = vstv %s5090_s4  ;;  %s5875_s4 = sld [smem:[#allocation3 + $0x98]] }
 0x260   : > { %1862 = vrot.lane.b32.xlu1 %v1855_v6, %s3452_s23  ;;  %1864 = vrot.lane.b32.xlu0 %v1856_v23, %s3452_s23  ;;  %v1894_v23 = vmul.f32 %v1893_v51, %v4372_v10  ;;  %6511 = vst [vmem:[#allocation151_spill] sm:$0xff] %v5161_v5 }
 0x262   : > { %v4872_v12 = vpop.permute.xlu1 %1484  ;;  %v4875_v16 = vpop.permute.xlu0 %1500 }
 0x263   : > { %6456 = vst [vmem:[#allocation85_spill] sm:$0xff] %v4872_v12  ;;  %6457 = vst [vmem:[#allocation69_spill] sm:$0xff] %v4875_v16  ;;  %v5132_v16 = vstv %s5071_s19  ;;  %s5286_s19 = sld [smem:[#allocation3 + $0x76]] }
 0x264   : > { %1880 = vrot.lane.b32.xlu1 %v1874_v56, %s3452_s23  ;;  %1882 = vrot.lane.b32.xlu0 %v1875_v4, %s3452_s23  ;;  %v1913_v56 = vstv %s3179_s24  ;;  %s5078_s24 = sld [smem:[#allocation3 + $0x71]]  ;;  %6504 = vst [vmem:[#allocation144_spill] sm:$0xff] %v5132_v16 }
 0x265   : > { %v1916_v51 = vmul.f32 %v1913_v56, %v4394_v61 }
 0x266   : > { %v4881_v46 = vpop.permute.xlu1 %1502  ;;  %v4883_v6 = vpop.permute.xlu0 %1504 }
 0x267   : > { %6458 = vst [vmem:[#allocation94_spill] sm:$0xff] %v4881_v46  ;;  %6459 = vst [vmem:[#allocation51_spill] sm:$0xff] %v4883_v6 }
 0x268   : > { %1884 = vrot.lane.b32.xlu1 %v1876_v37, %s3452_s23  ;;  %1900 = vrot.lane.b32.xlu0 %v1894_v23, %s3452_s23  ;;  %v1914_v37 = vmul.f32 %v1913_v56, %v4372_v10  ;;  %v1915_v23 = vmul.f32 %v1913_v56, %v4382_v7  ;;  %v1935_v56 = vmul.f32 %v1933_v44, %v4382_v7 }
 0x26a   : > { %v4889_v48 = vpop.permute.xlu1 %1520  ;;  %v4892_v57 = vpop.permute.xlu0 %1522  ;;  %v5146_v47 = vstv %s5078_s24  ;;  %s5338_s24 = sld [smem:[#allocation3 + $0x77]] }
 0x26b   : > { %6460 = vst [vmem:[#allocation95_spill] sm:$0xff] %v4889_v48  ;;  %6461 = vst [vmem:[#allocation65_spill] sm:$0xff] %v4892_v57  ;;  %v2246_v48 = vstv %s3206_s6  ;;  %s5099_s6 = sld [smem:[#allocation3 + $0x8c]] }
 0x26c   : > { %1902 = vrot.lane.b32.xlu1 %v1895_v58, %s3452_s23  ;;  %1904 = vrot.lane.b32.xlu0 %v1896_v21, %s3452_s23  ;;  %v1934_v21 = vmul.f32 %v1933_v44, %v4372_v10  ;;  %6507 = vst [vmem:[#allocation147_spill] sm:$0xff] %v5146_v47 }
 0x26e   : > { %v4896_v4 = vpop.permute.xlu1 %1524  ;;  %v4899_v6 = vpop.permute.xlu0 %1540 }
 0x26f   : > { %6462 = vst [vmem:[#allocation102_spill] sm:$0xff] %v4896_v4  ;;  %v1936_v4 = vmul.f32 %v1933_v44, %v4394_v61 }
 0x270   : > { %1920 = vrot.lane.b32.xlu1 %v1914_v37, %s3452_s23  ;;  %1922 = vrot.lane.b32.xlu0 %v1915_v23, %s3452_s23  ;;  %v1953_v23 = vstv %s3181_s22  ;;  %s5081_s22 = sld [smem:[#allocation3 + $0x91]] }
 0x271   : > { %v1956_v44 = vmul.f32 %v1953_v23, %v4394_v61 }
 0x272   : > { %v4905_v26 = vpop.permute.xlu1 %1542  ;;  %v4907_v58 = vpop.permute.xlu0 %1544 }
 0x273   : > { %6463 = vst [vmem:[#allocation103_spill] sm:$0xff] %v4907_v58 }
 0x274   : > { %1924 = vrot.lane.b32.xlu1 %v1916_v51, %s3452_s23  ;;  %1940 = vrot.lane.b32.xlu0 %v1934_v21, %s3452_s23  ;;  %v1954_v51 = vmul.f32 %v1953_v23, %v4372_v10  ;;  %v1955_v21 = vmul.f32 %v1953_v23, %v4382_v7  ;;  %v1975_v23 = vmul.f32 %v1973_v38, %v4382_v7 }
 0x276   : > { %v4913_v62 = vpop.permute.xlu1 %1560  ;;  %v4916_v37 = vpop.permute.xlu0 %1562  ;;  %v5149_v35 = vstv %s5081_s22  ;;  %s5732_s22 = sld [smem:[#allocation3 + $0x94]] }
 0x277   : > { %6508 = vst [vmem:[#allocation148_spill] sm:$0xff] %v5149_v35 }
 0x278   : > { %1942 = vrot.lane.b32.xlu1 %v1935_v56, %s3452_s23  ;;  %1944 = vrot.lane.b32.xlu0 %v1936_v4, %s3452_s23  ;;  %v1974_v4 = vmul.f32 %v1973_v38, %v4372_v10 }
 0x27a   : > { %v4920_v58 = vpop.permute.xlu1 %1564  ;;  %v4923_v12 = vpop.permute.xlu0 %1580 }
 0x27b   : > { %6464 = vst [vmem:[#allocation104_spill] sm:$0xff] %v4920_v58  ;;  %6465 = vst [vmem:[#allocation105_spill] sm:$0xff] %v4923_v12  ;;  %v1976_v58 = vmul.f32 %v1973_v38, %v4394_v61 }
 0x27c   : > { %1960 = vrot.lane.b32.xlu1 %v1954_v51, %s3452_s23  ;;  %1962 = vrot.lane.b32.xlu0 %v1955_v21, %s3452_s23  ;;  %v1993_v21 = vstv %s3183_s30  ;;  %s5085_s30 = sld [smem:[#allocation3 + $0x92]] }
 0x27d   : > { %v1996_v38 = vmul.f32 %v1993_v21, %v4394_v61 }
 0x27e   : > { %v4929_v40 = vpop.permute.xlu1 %1582  ;;  %v4931_v56 = vpop.permute.xlu0 %1584 }
 0x27f   : > { %6466 = vst [vmem:[#allocation106_spill] sm:$0xff] %v4929_v40  ;;  %6467 = vst [vmem:[#allocation107_spill] sm:$0xff] %v4931_v56 }
 0x280   : > { %1964 = vrot.lane.b32.xlu1 %v1956_v44, %s3452_s23  ;;  %1980 = vrot.lane.b32.xlu0 %v1974_v4, %s3452_s23  ;;  %v1994_v44 = vmul.f32 %v1993_v21, %v4372_v10  ;;  %v1995_v4 = vmul.f32 %v1993_v21, %v4382_v7  ;;  %v2167_v7 = vmul.f32 %v2166_v42, %v4950_v15 }
 0x282   : > { %v4937_v24 = vpop.permute.xlu1 %1600  ;;  %v4940_v51 = vpop.permute.xlu0 %1602 }
 0x283   : > { %6468 = vst [vmem:[#allocation108_spill] sm:$0xff] %v4937_v24  ;;  %6469 = vst [vmem:[#allocation109_spill] sm:$0xff] %v4940_v51  ;;  %v5143_v51 = vstv %s3214_s0  ;;  %s5861_s0 = sld [smem:[#allocation3 + $0x97]] }
 0x284   : > { %1982 = vrot.lane.b32.xlu1 %v1975_v23, %s3452_s23  ;;  %1984 = vrot.lane.b32.xlu0 %v1976_v58, %s3452_s23  ;;  %v4955_v23 = vld [vmem:[#allocation2 + $0x12] sm:$0x1] }
 0x285   : > { %6473 = vst [vmem:[#allocation113_spill] sm:$0xff] %v4955_v23  ;;  %v2169_v61 = vmul.f32 %v2166_v42, %v4955_v23 }
 0x286   : > { %v4944_v56 = vpop.permute.xlu1 %1604  ;;  %v4947_v60 = vpop.permute.xlu0 %1620 }
 0x287   : > { %6470 = vst [vmem:[#allocation110_spill] sm:$0xff] %v4944_v56  ;;  %6471 = vst [vmem:[#allocation111_spill] sm:$0xff] %v4947_v60  ;;  %v4959_v56 = vld [vmem:[#allocation2 + $0xa] sm:$0xff]  ;;  %v5116_v60 = vstv %s5063_s11  ;;  %s5228_s11 = sld [smem:[#allocation3 + $0x7a]] }
 0x288   : > { %2000 = vrot.lane.b32.xlu1 %v1994_v44, %s3452_s23  ;;  %2002 = vrot.lane.b32.xlu0 %v1995_v4, %s3452_s23  ;;  %6475 = vst [vmem:[#allocation115_spill] sm:$0xff] %v4959_v56  ;;  %v2168_v44 = vmul.f32 %v2166_v42, %v4959_v56  ;;  %v2189_v42 = vmul.f32 %v2186_v18, %v4955_v23  ;;  %6501 = vst [vmem:[#allocation141_spill] sm:$0xff] %v5116_v60 }
 0x289   : > { %v5223_v12 = vmul.f32 %v5116_v60, %v4950_v15 }
 0x28a   : > { %v4957_v58 = vpop.permute.xlu1 %1622  ;;  %v4961_v10 = vpop.permute.xlu0 %1624 }
 0x28b   : > { %6474 = vst [vmem:[#allocation114_spill] sm:$0xff] %v4957_v58  ;;  %6476 = vst [vmem:[#allocation116_spill] sm:$0xff] %v4961_v10  ;;  %v5028_v58 = vld [vmem:[#allocation2 + $0x1a] sm:$0xff] }
 0x28c   : > { %2004 = vrot.lane.b32.xlu1 %v1996_v38, %s3452_s23  ;;  %2173 = vrot.lane.b32.xlu0 %v2167_v7, %s3451_s10  ;;  %v2187_v38 = vmul.f32 %v2186_v18, %v4950_v15  ;;  %v2188_v7 = vmul.f32 %v2186_v18, %v4959_v56  ;;  %v2208_v18 = vmul.f32 %v2206_v29, %v4959_v56 }
 0x28d   : > { %6517 = vst [vmem:[#allocation157_spill] sm:$0xff] %v5223_v12  ;;  %v5245_v12 = vmul.f32 %v5123_v52, %v4959_v56 }
 0x28e   : > { %v4967_v21 = vpop.permute.xlu1 %1640  ;;  %v4970_v4 = vpop.permute.xlu0 %1642 }
 0x28f   : > { %6477 = vst [vmem:[#allocation117_spill] sm:$0xff] %v4967_v21  ;;  %6478 = vst [vmem:[#allocation118_spill] sm:$0xff] %v4970_v4 }
 0x290   : > { %2175 = vrot.lane.b32.xlu1 %v2168_v44, %s3451_s10  ;;  %2177 = vrot.lane.b32.xlu0 %v2169_v61, %s3451_s10  ;;  %v2207_v61 = vmul.f32 %v2206_v29, %v4950_v15  ;;  %6519 = vst [vmem:[#allocation159_spill] sm:$0xff] %v5245_v12  ;;  %v5272_v12 = vmul.f32 %v5126_v28, %v4959_v56 }
 0x292   : > { %v4974_v10 = vpop.permute.xlu1 %1644  ;;  %v4977_v39 = vpop.permute.xlu0 %1660  ;;  %6524 = vst [vmem:[#allocation164_spill] sm:$0xff] %v5272_v12  ;;  %v5296_v12 = vmul.f32 %v5132_v16, %v4959_v56 }
 0x293   : > { %6479 = vst [vmem:[#allocation119_spill] sm:$0xff] %v4974_v10  ;;  %v2209_v10 = vmul.f32 %v2206_v29, %v4955_v23 }
 0x294   : > { %2193 = vrot.lane.b32.xlu1 %v2187_v38, %s3451_s10  ;;  %2195 = vrot.lane.b32.xlu0 %v2188_v7, %s3451_s10  ;;  %v2226_v7 = vstv %s3205_s27  ;;  %s5096_s27 = sld [smem:[#allocation3 + $0x73]]  ;;  %6528 = vst [vmem:[#allocation168_spill] sm:$0xff] %v5296_v12 }
 0x295   : > { %v2229_v29 = vmul.f32 %v2226_v7, %v4955_v23 }
 0x296   : > { %v4983_v4 = vpop.permute.xlu1 %1662  ;;  %v4985_v44 = vpop.permute.xlu0 %1664 }
 0x297   : > { %6480 = vst [vmem:[#allocation120_spill] sm:$0xff] %v4985_v44 }
 0x298   : > { %2197 = vrot.lane.b32.xlu1 %v2189_v42, %s3451_s10  ;;  %2213 = vrot.lane.b32.xlu0 %v2207_v61, %s3451_s10  ;;  %v2227_v42 = vmul.f32 %v2226_v7, %v4950_v15  ;;  %v2228_v61 = vmul.f32 %v2226_v7, %v4959_v56  ;;  %v2248_v7 = vmul.f32 %v2246_v48, %v4959_v56 }
 0x29a   : > { %v4991_v21 = vpop.permute.xlu1 %1680  ;;  %v4994_v38 = vpop.permute.xlu0 %1682 }
 0x29c   : > { %2215 = vrot.lane.b32.xlu1 %v2208_v18, %s3451_s10  ;;  %2217 = vrot.lane.b32.xlu0 %v2209_v10, %s3451_s10  ;;  %v2247_v10 = vmul.f32 %v2246_v48, %v4950_v15 }
 0x29e   : > { %v4998_v44 = vpop.permute.xlu1 %1684  ;;  %v5001_v57 = vpop.permute.xlu0 %1700 }
 0x29f   : > { %6481 = vst [vmem:[#allocation121_spill] sm:$0xff] %v4998_v44  ;;  %6482 = vst [vmem:[#allocation122_spill] sm:$0xff] %v5001_v57  ;;  %v2249_v44 = vmul.f32 %v2246_v48, %v4955_v23  ;;  %v5207_v57 = vstv %s5107_s25  ;;  %s3233_s25 = sld [smem:[#allocation3 + $0x9d]] }
 0x2a0   : > { %2233 = vrot.lane.b32.xlu1 %v2227_v42, %s3451_s10  ;;  %2235 = vrot.lane.b32.xlu0 %v2228_v61, %s3451_s10  ;;  %v2266_v61 = vstv %s3207_s15  ;;  %s5105_s15 = sld [smem:[#allocation3 + $0x8d]] }
 0x2a1   : > { %v2269_v48 = vmul.f32 %v2266_v61, %v4955_v23 }
 0x2a2   : > { %v5007_v11 = vpop.permute.xlu1 %1702  ;;  %v5009_v18 = vpop.permute.xlu0 %1704 }
 0x2a3   : > { %6483 = vst [vmem:[#allocation123_spill] sm:$0xff] %v5007_v11  ;;  %6484 = vst [vmem:[#allocation124_spill] sm:$0xff] %v5009_v18  ;;  %v5158_v11 = vstv %s5094_s5  ;;  %s3229_s5 = sld [smem:[#allocation3 + $0x99]] }
 0x2a4   : > { %2237 = vrot.lane.b32.xlu1 %v2229_v29, %s3451_s10  ;;  %2253 = vrot.lane.b32.xlu0 %v2247_v10, %s3451_s10  ;;  %v2267_v29 = vmul.f32 %v2266_v61, %v4950_v15  ;;  %v2268_v10 = vmul.f32 %v2266_v61, %v4959_v56 }
 0x2a6   : > { %v5015_v63 = vpop.permute.xlu1 %1720  ;;  %v5018_v42 = vpop.permute.xlu0 %1722  ;;  %v5204_v54 = vstv %s5105_s15  ;;  %s3232_s15 = sld [smem:[#allocation3 + $0x9c]] }
 0x2a7   : > { %6485 = vst [vmem:[#allocation125_spill] sm:$0xff] %v5015_v63  ;;  %6486 = vst [vmem:[#allocation126_spill] sm:$0xff] %v5018_v42  ;;  %v5129_v42 = vstv %s3213_s21  ;;  %v5135_v63 = vstv %s5076_s26  ;;  %s5305_s26 = sld [smem:[#allocation3 + $0x7c]]  ;;  %s5784_s21 = sld [smem:[#allocation3 + $0x95]] }
 0x2a8   : > { %2255 = vrot.lane.b32.xlu1 %v2248_v7, %s3451_s10  ;;  %2257 = vrot.lane.b32.xlu0 %v2249_v44, %s3451_s10  ;;  %v5033_v7 = vld [vmem:[#allocation2 + $0x2a] sm:$0x1]  ;;  %6505 = vst [vmem:[#allocation145_spill] sm:$0xff] %v5135_v63  ;;  %6514 = vst [vmem:[#allocation154_spill] sm:$0xff] %v5204_v54 }
 0x2a9   : > { %6489 = vst [vmem:[#allocation129_spill] sm:$0xff] %v5033_v7  ;;  %v2289_v61 = vmul.f32 %v2286_v22, %v5033_v7 }
 0x2aa   : > { %v5022_v18 = vpop.permute.xlu1 %1724  ;;  %v5025_v34 = vpop.permute.xlu0 %1740 }
 0x2ab   : > { %6487 = vst [vmem:[#allocation127_spill] sm:$0xff] %v5022_v18  ;;  %6488 = vst [vmem:[#allocation128_spill] sm:$0xff] %v5025_v34  ;;  %v5037_v18 = vld [vmem:[#allocation2 + $0x22] sm:$0xff]  ;;  %v2287_v34 = vmul.f32 %v2286_v22, %v5028_v58 }
 0x2ac   : > { %2273 = vrot.lane.b32.xlu1 %v2267_v29, %s3451_s10  ;;  %2275 = vrot.lane.b32.xlu0 %v2268_v10, %s3451_s10  ;;  %v2288_v10 = vmul.f32 %v2286_v22, %v5037_v18 }
 0x2ae   : > { %v5035_v44 = vpop.permute.xlu1 %1742  ;;  %v5039_v31 = vpop.permute.xlu0 %1744 }
 0x2af   : > { %6490 = vst [vmem:[#allocation130_spill] sm:$0xff] %v5035_v44  ;;  %6491 = vst [vmem:[#allocation131_spill] sm:$0xff] %v5039_v31  ;;  %v2306_v44 = vstv %s3209_s7  ;;  %s5118_s7 = sld [smem:[#allocation3 + $0x8f]] }
 0x2b0   : > { %2277 = vrot.lane.b32.xlu1 %v2269_v48, %s3451_s10  ;;  %2293 = vrot.lane.b32.xlu0 %v2287_v34, %s3451_s10  ;;  %v2307_v48 = vmul.f32 %v2306_v44, %v5028_v58  ;;  %v2308_v34 = vmul.f32 %v2306_v44, %v5037_v18  ;;  %v2309_v22 = vmul.f32 %v2306_v44, %v5033_v7 }
 0x2b2   : > { %v5045_v29 = vpop.permute.xlu1 %1760  ;;  %v5048_v23 = vpop.permute.xlu0 %1762 }
 0x2b3   : > { %6492 = vst [vmem:[#allocation132_spill] sm:$0xff] %v5045_v29  ;;  %6493 = vst [vmem:[#allocation133_spill] sm:$0xff] %v5048_v23  ;;  %v2326_v29 = vstv %s3210_s8  ;;  %s5163_s8 = sld [smem:[#allocation3 + $0x78]] }
 0x2b4   : > { %2295 = vrot.lane.b32.xlu1 %v2288_v10, %s3451_s10  ;;  %2297 = vrot.lane.b32.xlu0 %v2289_v61, %s3451_s10  ;;  %v2329_v44 = vmul.f32 %v2326_v29, %v5033_v7 }
 0x2b6   : > { %v5052_v31 = vpop.permute.xlu1 %1764  ;;  %v5055_v41 = vpop.permute.xlu0 %1780 }
 0x2b7   : > { %6494 = vst [vmem:[#allocation134_spill] sm:$0xff] %v5052_v31  ;;  %v2346_v31 = vstv %s3211_s9  ;;  %s5191_s9 = sld [smem:[#allocation3 + $0x79]] }
 0x2b8   : > { %2313 = vrot.lane.b32.xlu1 %v2307_v48, %s3451_s10  ;;  %2315 = vrot.lane.b32.xlu0 %v2308_v34, %s3451_s10  ;;  %v2327_v48 = vmul.f32 %v2326_v29, %v5028_v58  ;;  %v2348_v46 = vmul.f32 %v2346_v31, %v5037_v18 }
 0x2ba   : > { %v5067_v61 = vpop.permute.xlu1 %1782  ;;  %v5073_v10 = vpop.permute.xlu0 %1784 }
 0x2bb   : > { %6495 = vst [vmem:[#allocation135_spill] sm:$0xff] %v5073_v10  ;;  %v2328_v10 = vmul.f32 %v2326_v29, %v5037_v18 }
 0x2bc   : > { %2317 = vrot.lane.b32.xlu1 %v2309_v22, %s3451_s10  ;;  %2333 = vrot.lane.b32.xlu0 %v2327_v48, %s3451_s10  ;;  %v2347_v48 = vmul.f32 %v2346_v31, %v5028_v58 }
 0x2be   : > { %v5087_v34 = vpop.permute.xlu1 %1800  ;;  %v5092_v22 = vpop.permute.xlu0 %1802 }
 0x2bf   : > { %6496 = vst [vmem:[#allocation136_spill] sm:$0xff] %v5087_v34  ;;  %6497 = vst [vmem:[#allocation137_spill] sm:$0xff] %v5092_v22  ;;  %v5226_v34 = vstv %s5118_s7  ;;  %s3234_s7 = sld [smem:[#allocation3 + $0x9e]] }
 0x2c0   : > { %2335 = vrot.lane.b32.xlu1 %v2328_v10, %s3451_s10  ;;  %2337 = vrot.lane.b32.xlu0 %v2329_v44, %s3451_s10  ;;  %v5113_v10 = vstv %s5060_s28  ;;  %v2349_v44 = vmul.f32 %v2346_v31, %v5033_v7  ;;  %s5209_s28 = sld [smem:[#allocation3 + $0x74]] }
 0x2c1   : > { %6500 = vst [vmem:[#allocation140_spill] sm:$0xff] %v5113_v10  ;;  %v5189_v40 = vmul.f32 %v5113_v10, %v4950_v15  ;;  %v5215_v22 = vmul.f32 %v5113_v10, %v4959_v56 }
 0x2c2   : > { %v5102_v29 = vpop.permute.xlu1 %1804  ;;  %v5109_v23 = vpop.permute.xlu0 %1820 }
 0x2c3   : > { %6498 = vst [vmem:[#allocation138_spill] sm:$0xff] %v5102_v29  ;;  %6499 = vst [vmem:[#allocation139_spill] sm:$0xff] %v5109_v23  ;;  %v2366_v29 = vstv %s3212_s29  ;;  %v5175_v23 = vstv %s5099_s6  ;;  %s5357_s29 = sld [smem:[#allocation3 + $0x7d]]  ;;  %s3231_s6 = sld [smem:[#allocation3 + $0x9b]] }
 0x2c4   : > { %2353 = vrot.lane.b32.xlu1 %v2347_v48, %s3451_s10  ;;  %2355 = vrot.lane.b32.xlu0 %v2348_v46, %s3451_s10  ;;  %v5139_v48 = vld [vmem:[#allocation2 + $0x32] sm:$0xff]  ;;  %v5152_v46 = vstv %s5085_s30  ;;  %v2367_v1 = vmul.f32 %v2366_v29, %v5028_v58  ;;  %v2368_v17 = vmul.f32 %v2366_v29, %v5037_v18  ;;  %v2369_v55 = vmul.f32 %v2366_v29, %v5033_v7  ;;  %s5826_s30 = sld [smem:[#allocation3 + $0x96]] }
 0x2c5   : > { %6509 = vst [vmem:[#allocation149_spill] sm:$0xff] %v5152_v46  ;;  %v2387_v46 = vmul.f32 %v5129_v42, %v5028_v58  ;;  %v5181_v49 = vmul.f32 %v5143_v51, %v5139_v48  ;;  %v5201_v29 = vmul.f32 %v5158_v11, %v5137_v59  ;;  %v5237_v10 = vmul.f32 %v5175_v23, %v5137_v59 }
 0x2c6   : > { %v5141_v31 = vpop.permute.xlu1 %1822  ;;  %v5154_v24 = vpop.permute.xlu0 %1824 }
 0x2c7   : > { %6506 = vst [vmem:[#allocation146_spill] sm:$0xff] %v5141_v31  ;;  %6510 = vst [vmem:[#allocation150_spill] sm:$0xff] %v5154_v24  ;;  %v5166_v31 = vstv %s5096_s27  ;;  %v2388_v24 = vmul.f32 %v5129_v42, %v5037_v18  ;;  %s3230_s27 = sld [smem:[#allocation3 + $0x9a]] }
 0x2c8   : > { %6512 = vst [vmem:[#allocation152_spill] sm:$0xff] %v5166_v31  ;;  %2357 = vrot.lane.b32.xlu1 %v2349_v44, %s3451_s10  ;;  %2373 = vrot.lane.b32.xlu0 %v2367_v1, %s3451_s10  ;;  %v5185_v44 = vmul.f32 %v5143_v51, %v5137_v59  ;;  %v5197_v1 = vmul.f32 %v5158_v11, %v5139_v48 }
 0x2ca   : > { %v5193_v25 = vpop.permute.xlu1 %1840  ;;  %v5211_v32 = vpop.permute.xlu0 %1842 }
 0x2cb   : > { %6513 = vst [vmem:[#allocation153_spill] sm:$0xff] %v5193_v25  ;;  %6515 = vst [vmem:[#allocation155_spill] sm:$0xff] %v5211_v32  ;;  %v5219_v25 = vmul.f32 %v5175_v23, %v5139_v48  ;;  %v5233_v32 = vmul.f32 %v5116_v60, %v4959_v56  ;;  %v5256_v60 = vmul.f32 %v5204_v54, %v5137_v59 }
 0x2cc   : > { %2375 = vrot.lane.b32.xlu1 %v2368_v17, %s3451_s10  ;;  %2377 = vrot.lane.b32.xlu0 %v2369_v55, %s3451_s10  ;;  %v5252_v17 = vmul.f32 %v5204_v54, %v5139_v48  ;;  %v5276_v54 = vmul.f32 %v5207_v57, %v5137_v59 }
 0x2cd   : > { %6516 = vst [vmem:[#allocation156_spill] sm:$0xff] %v5219_v25  ;;  %v5241_v25 = vmul.f32 %v5123_v52, %v4950_v15  ;;  %6520 = vst [vmem:[#allocation160_spill] sm:$0xff] %v5256_v60  ;;  %v5264_v52 = vmul.f32 %v5126_v28, %v4950_v15  ;;  %v5280_v60 = vmul.f32 %v5132_v16, %v4950_v15 }
 0x2ce   : > { %v5268_v55 = vpop.permute.xlu1 %1844  ;;  %v5292_v28 = vmul.f32 %v5226_v34, %v5137_v59  ;;  %v5316_v16 = vmul.f32 %v5146_v47, %v4959_v56 }
 0x2cf   : > { %6518 = vst [vmem:[#allocation158_spill] sm:$0xff] %v5241_v25  ;;  %v5260_v25 = vmul.f32 %v5207_v57, %v5139_v48  ;;  %6522 = vst [vmem:[#allocation162_spill] sm:$0xff] %v5264_v52  ;;  %v5303_v52 = vstv %s5163_s8  ;;  %s3235_s8 = sld [smem:[#allocation3 + $0x9f]] }
 0x2d0   : > { %6523 = vst [vmem:[#allocation163_spill] sm:$0xff] %v5268_v55  ;;  %6525 = vst [vmem:[#allocation165_spill] sm:$0xff] %v5280_v60  ;;  %v5288_v55 = vpop.permute.xlu0 %1860  ;;  %v5300_v60 = vmul.f32 %v5135_v63, %v4950_v15  ;;  %2393 = vrot.lane.b32.xlu1 %v2387_v46, %s3451_s10  ;;  %2395 = vrot.lane.b32.xlu0 %v2388_v24, %s3451_s10  ;;  %v5325_v46 = vmul.f32 %v5161_v5, %v5028_v58 }
 0x2d1   : > { %6521 = vst [vmem:[#allocation161_spill] sm:$0xff] %v5260_v25  ;;  %v5284_v25 = vmul.f32 %v5226_v34, %v5139_v48  ;;  %6527 = vst [vmem:[#allocation167_spill] sm:$0xff] %v5292_v28  ;;  %v5312_v28 = vmul.f32 %v5146_v47, %v4950_v15  ;;  %v5336_v47 = vstv %s5191_s9  ;;  %v1309_v24 = vadd.f32 %v4746_v30, %v4560_v8  ;;  %s3236_s9 = sld [smem:[#allocation3 + $0xa0]] }
 0x2d2   : > { %6529 = vst [vmem:[#allocation169_spill] sm:$0xff] %v5300_v60  ;;  %6530 = vst [vmem:[#allocation170_spill] sm:$0xff] %v5303_v52  ;;  %v5320_v60 = vmul.f32 %v5135_v63, %v4959_v56  ;;  %v5363_v8 = vmul.f32 %v5303_v52, %v5137_v59  ;;  %v5367_v30 = vmul.f32 %v5166_v31, %v5028_v58  ;;  %v5387_v63 = vstv %s5247_s12  ;;  %s3263_s12 = smul.u32 144, %s6729_s16  ;;  %s3246_s16 = sld [smem:[#allocation7 + $0x3]] }
 0x2d3   : > { %6526 = vst [vmem:[#allocation166_spill] sm:$0xff] %v5284_v25  ;;  %v2389_v25 = vmul.f32 %v5129_v42, %v5033_v7  ;;  %6531 = vst [vmem:[#allocation171_spill] sm:$0xff] %v5312_v28  ;;  %v5329_v42 = vmul.f32 %v5149_v35, %v4950_v15  ;;  %v5333_v7 = vmul.f32 %v5149_v35, %v4959_v56  ;;  %v5344_v28 = vpop.permute.xlu1 %1862 }
 0x2d4   : > { %6532 = vst [vmem:[#allocation172_spill] sm:$0xff] %v5316_v16  ;;  %6533 = vst [vmem:[#allocation173_spill] sm:$0xff] %v5320_v60  ;;  %v5340_v16 = vld [vmem:[#allocation2 + $0x42] sm:$0x1]  ;;  %v5348_v15 = vmul.f32 %v5303_v52, %v5139_v48  ;;  %v5352_v56 = vmul.f32 %v5161_v5, %v5037_v18  ;;  %v5359_v35 = vpop.permute.xlu0 %1864  ;;  %v5374_v5 = vstv %s5228_s11  ;;  %v1429_v60 = vadd.f32 %v4827_v14, %v1309_v24  ;;  %s3238_s11 = sld [smem:[#allocation7 + $0x1]] }
 0x2d5   : > { %6534 = vst [vmem:[#allocation174_spill] sm:$0xff] %v5329_v42  ;;  %6535 = vst [vmem:[#allocation175_spill] sm:$0xff] %v5333_v7  ;;  %v5355_v7 = vstv %s5209_s28  ;;  %v5371_v42 = vmul.f32 %v5166_v31, %v5037_v18  ;;  %2397 = vrot.lane.b32.xlu1 %v2389_v25, %s3451_s10  ;;  %v5384_v52 = vmul.f32 %v5336_v47, %v5137_v59  ;;  %2413 = vrot.lane.b32.xlu0 %v5181_v49, %s3451_s10  ;;  %s3237_s28 = sld [smem:[#allocation3 + $0xa1]] }
 0x2d6   : > { %6536 = vst [vmem:[#allocation176_spill] sm:$0xff] %v5336_v47  ;;  %6537 = vst [vmem:[#allocation177_spill] sm:$0xff] %v5344_v28  ;;  %v1310_v31 = vadd.f32 %v4759_v9, %v4579_v33  ;;  %v2409_v25 = vmul.f32 %v5143_v51, %v5340_v16  ;;  %v5397_v14 = vmul.f32 %v5355_v7, %v5028_v58  ;;  %v5400_v24 = vstv %s5266_s18  ;;  %s3242_s18 = sld [smem:[#allocation7 + $0x2]] }
 0x2d7   : > { %6538 = vst [vmem:[#allocation178_spill] sm:$0xff] %v5355_v7  ;;  %6539 = vst [vmem:[#allocation179_spill] sm:$0xff] %v5359_v35  ;;  %v5380_v35 = vmul.f32 %v5336_v47, %v5139_v48  ;;  %v1549_v47 = vadd.f32 %v4899_v6, %v1429_v60  ;;  %v5403_v12 = vpop.permute.xlu1 %1880  ;;  %v5407_v28 = vmul.f32 %v5374_v5, %v5139_v48  ;;  %v5414_v49 = vstv %s5286_s19 }
 0x2d8   : > { %6540 = vst [vmem:[#allocation180_spill] sm:$0xff] %v5374_v5  ;;  %6541 = vst [vmem:[#allocation181_spill] sm:$0xff] %v5387_v63  ;;  %v5411_v33 = vmul.f32 %v5355_v7, %v5037_v18  ;;  %v1430_v9 = vadd.f32 %v4833_v0, %v1310_v31  ;;  %v5417_v51 = vpop.permute.xlu0 %1882  ;;  %v5421_v60 = vmul.f32 %v5374_v5, %v5137_v59 }
 0x2d9   : > { %6542 = vst [vmem:[#allocation182_spill] sm:$0xff] %v5400_v24  ;;  %6543 = vst [vmem:[#allocation183_spill] sm:$0xff] %v5403_v12  ;;  %v5425_v6 = vmul.f32 %v5387_v63, %v5028_v58  ;;  %v5428_v12 = vstv %s5305_s26  ;;  %v1669_v7 = vadd.f32 %v4977_v39, %v1549_v47  ;;  %2415 = vrot.lane.b32.xlu1 %v5185_v44, %s3451_s10  ;;  %2417 = vrot.lane.b32.xlu0 %v2409_v25, %s3451_s10 }
 0x2da   : > { %6544 = vst [vmem:[#allocation184_spill] sm:$0xff] %v5417_v51  ;;  %v5435_v0 = vmul.f32 %v5400_v24, %v5139_v48  ;;  %v5439_v31 = vmul.f32 %v5387_v63, %v5037_v18  ;;  %v5443_v5 = vmul.f32 %v5400_v24, %v5137_v59  ;;  %v1329_v51 = vadd.f32 %v4769_v19, %v4604_v36 }
 0x2db   : > { %v1550_v39 = vadd.f32 %v4905_v26, %v1430_v9  ;;  %v5451_v47 = vmul.f32 %v5414_v49, %v5028_v58  ;;  %v5454_v44 = vstv %s5338_s24  ;;  %v1330_v63 = vadd.f32 %v4772_v50, %v4613_v13  ;;  %v5459_v24 = vpop.permute.xlu1 %1884  ;;  %s6142_s24 = scalar_lea.vmem %s6220_s3, %s3263_s12 }
 0x2dc   : > { %6545 = vst [vmem:[#allocation185_spill] sm:$0xff] %v5435_v0  ;;  %6547 = vst [vmem:[#allocation187_spill] sm:$0xff] %v5454_v44  ;;  %v1789_v0 = vadd.f32 %v5055_v41, %v1669_v7  ;;  %v5463_v36 = vmul.f32 %v5428_v12, %v5139_v48  ;;  %v5466_v19 = vstv %s5357_s29  ;;  %v1449_v26 = vadd.f32 %v4841_v3, %v1329_v51  ;;  %v1901_v9 = vpop.permute.xlu0 %1900  ;;  %s3250_s29 = sld [smem:[#allocation7 + $0x4]] }
 0x2dd   : > { %6546 = vst [vmem:[#allocation186_spill] sm:$0xff] %v5451_v47  ;;  %v1670_v25 = vadd.f32 %v4983_v4, %v1550_v39  ;;  %v5472_v47 = vmul.f32 %v5414_v49, %v5037_v18  ;;  %v5476_v13 = vmul.f32 %v5428_v12, %v5137_v59  ;;  %v1450_v41 = vadd.f32 %v4844_v53, %v1330_v63  ;;  %v6550_v39 = vld [vmem:[#allocation15_spill] sm:$0xff] }
 0x2de   : > { %v1909_v50 = vadd.f32 %v1901_v9, %v1789_v0  ;;  %2433 = vrot.lane.b32.xlu1 %v5197_v1, %s3451_s10  ;;  %v2429_v3 = vmul.f32 %v5158_v11, %v5340_v16  ;;  %v5485_v4 = vmul.f32 %v5454_v44, %v5028_v58  ;;  %v1569_v7 = vadd.f32 %v4913_v62, %v1449_v26  ;;  %v6549_v0 = vld [vmem:[#allocation22_spill] sm:$0xff]  ;;  %v6551_v26 = vld [vmem:[#allocation25_spill] sm:$0xff] }
 0x2df   : > { %v1790_v51 = vadd.f32 %v5067_v61, %v1670_v25  ;;  %2435 = vrot.lane.b32.xlu0 %v5201_v29, %s3451_s10  ;;  %v5493_v63 = vmul.f32 %v5466_v19, %v5139_v48  ;;  %v5497_v53 = vmul.f32 %v5454_v44, %v5037_v18  ;;  %v1349_v11 = vadd.f32 %v4779_v45, %v4639_v2  ;;  %v1903_v1 = vpop.permute.xlu1 %1902  ;;  %v6548_v29 = vld [vmem:[#allocation12_spill] sm:$0xff]  ;;  %v6552_v2 = vld [vmem:[#allocation18_spill] sm:$0xff] }
 0x2e0   : > { %v1570_v58 = vadd.f32 %v4916_v37, %v1450_v41  ;;  %v2020_v62 = vadd.f32 %v5189_v40, %v1909_v50  ;;  %v5505_v61 = vmul.f32 %v5466_v19, %v5137_v59  ;;  %v438_v48 = vadd.f32 %v6549_v0, %v6548_v29  ;;  %v5512_v44 = vpop.permute.xlu0 %1904  ;;  %v6553_v45 = vld [vmem:[#allocation28_spill] sm:$0xff] }
 0x2e1   : > { %v498_v25 = vadd.f32 %v6551_v26, %v6550_v39  ;;  %v1689_v18 = vadd.f32 %v4991_v21, %v1569_v7  ;;  %v1910_v9 = vadd.f32 %v1903_v1, %v1790_v51  ;;  %v518_v37 = vadd.f32 %v6553_v45, %v6552_v2  ;;  %v6554_v29 = vld [vmem:[#allocation136_spill] sm:$0xff]  ;;  %v6559_v1 = vld [vmem:[#allocation137_spill] sm:$0xff] }
 0x2e2   : > { %v1469_v40 = vadd.f32 %v4851_v43, %v1349_v11  ;;  %v1690_v41 = vadd.f32 %v4994_v38, %v1570_v58  ;;  %2437 = vrot.lane.b32.xlu1 %v2429_v3, %s3451_s10  ;;  %v2071_v59 = vadd.f32 %v5325_v46, %v2020_v62  ;;  %v1350_v50 = vadd.f32 %v4785_v27, %v4661_v20  ;;  %v6555_v7 = vld [vmem:[#allocation156_spill] sm:$0xff]  ;;  %v6556_v43 = vld [vmem:[#allocation21_spill] sm:$0xff]  ;;  %v6557_v11 = vld [vmem:[#allocation31_spill] sm:$0xff] }
 0x2e3   : > { %v1809_v0 = vadd.f32 %v6554_v29, %v1689_v18  ;;  %v2021_v21 = vadd.f32 %v5215_v22, %v1910_v9  ;;  %2453 = vrot.lane.b32.xlu0 %v6555_v7, %s3451_s10  ;;  %v2449_v51 = vmul.f32 %v5175_v23, %v5340_v16  ;;  %v538_v38 = vadd.f32 %v6557_v11, %v6556_v43  ;;  %v6558_v58 = vld [vmem:[#allocation105_spill] sm:$0xff]  ;;  %v1921_v62 = vpop.permute.xlu1 %1920  ;;  %v6560_v27 = vld [vmem:[#allocation32_spill] sm:$0xff]  ;;  %v6561_v22 = vld [vmem:[#allocation54_spill] sm:$0xff] }
 0x2e4   : > { %v1589_v3 = vadd.f32 %v6558_v58, %v1469_v40  ;;  %v1810_v46 = vadd.f32 %v6559_v1, %v1690_v41  ;;  %v5533_v20 = vadd.f32 %v5348_v15, %v2071_v59  ;;  %v5536_v39 = vadd.f32 %v6560_v27, %v438_v48  ;;  %v1923_v9 = vpop.permute.xlu0 %1922  ;;  %v6562_v2 = vld [vmem:[#allocation37_spill] sm:$0xff]  ;;  %v6563_v29 = vld [vmem:[#allocation40_spill] sm:$0xff]  ;;  %v6564_v40 = vld [vmem:[#allocation122_spill] sm:$0xff] }
 0x2e5   : > { %v1470_v26 = vadd.f32 %v6561_v22, %v1350_v50  ;;  %v1929_v18 = vadd.f32 %v1921_v62, %v1809_v0  ;;  %v2072_v23 = vadd.f32 %v5352_v56, %v2021_v21  ;;  %v618_v45 = vadd.f32 %v6562_v2, %v498_v25  ;;  %v6565_v15 = vld [vmem:[#allocation74_spill] sm:$0xff]  ;;  %v6566_v59 = vld [vmem:[#allocation39_spill] sm:$0xff]  ;;  %v6568_v50 = vld [vmem:[#allocation157_spill] sm:$0xff] }
 0x2e6   : > { %v638_v7 = vadd.f32 %v6563_v29, %v518_v37  ;;  %v1709_v43 = vadd.f32 %v6564_v40, %v1589_v3  ;;  %v1930_v41 = vadd.f32 %v1923_v9, %v1810_v46  ;;  %2455 = vrot.lane.b32.xlu1 %v5237_v10, %s3451_s10  ;;  %v1369_v48 = vadd.f32 %v6566_v59, %v6565_v15  ;;  %v6567_v11 = vld [vmem:[#allocation106_spill] sm:$0xff]  ;;  %v6569_v25 = vld [vmem:[#allocation43_spill] sm:$0xff]  ;;  %v6570_v21 = vld [vmem:[#allocation16_spill] sm:$0xff] }
 0x2e7   : > { %v1590_v58 = vadd.f32 %v6567_v11, %v1470_v26  ;;  %v2028_v0 = vadd.f32 %v6568_v50, %v1929_v18  ;;  %2457 = vrot.lane.b32.xlu0 %v2449_v51, %s3451_s10  ;;  %v5551_v56 = vadd.f32 %v5363_v8, %v2072_v23  ;;  %v658_v37 = vadd.f32 %v6569_v25, %v538_v38  ;;  %v6571_v3 = vld [vmem:[#allocation64_spill] sm:$0xff]  ;;  %v6572_v46 = vld [vmem:[#allocation139_spill] sm:$0xff]  ;;  %v5558_v27 = vpop.permute.xlu1 %1924  ;;  %v5560_v22 = vld [vmem:[#allocation2 + $0x11] sm:$0x1] }
 0x2e8   : > { %v1370_v1 = vadd.f32 %v6571_v3, %v6570_v21  ;;  %v1829_v62 = vadd.f32 %v6572_v46, %v1709_v43  ;;  %v2029_v10 = vadd.f32 %v5233_v32, %v1930_v41  ;;  %v6573_v26 = vld [vmem:[#allocation83_spill] sm:$0xff]  ;;  %v1941_v38 = vpop.permute.xlu0 %1940  ;;  %v6576_v29 = vld [vmem:[#allocation68_spill] sm:$0xff]  ;;  %v6577_v32 = vld [vmem:[#allocation154_spill] sm:$0xff] }
 0x2e9   : > { %v5564_v18 = vmul.f32 %v5560_v22, %v6573_v26  ;;  %v6574_v51 = vld [vmem:[#allocation55_spill] sm:$0xff]  ;;  %v2079_v2 = vadd.f32 %v5367_v30, %v2028_v0  ;;  %v2469_v41 = vmul.f32 %v6577_v32, %v5340_v16  ;;  %v6578_v59 = vld [vmem:[#allocation49_spill] sm:$0xff]  ;;  %v6579_v50 = vld [vmem:[#allocation108_spill] sm:$0xff] }
 0x2ea   : > { %v1489_v8 = vadd.f32 %v6574_v51, %v1369_v48  ;;  %v6575_v9 = vld [vmem:[#allocation123_spill] sm:$0xff]  ;;  %v1490_v40 = vadd.f32 %v6576_v29, %v1370_v1  ;;  %v1949_v43 = vadd.f32 %v1941_v38, %v1829_v62  ;;  %2473 = vrot.lane.b32.xlu1 %v5252_v17, %s3451_s10  ;;  %v2080_v15 = vadd.f32 %v5371_v42, %v2029_v10  ;;  %v6580_v25 = vld [vmem:[#allocation146_spill] sm:$0xff]  ;;  %v6581_v21 = vld [vmem:[#allocation160_spill] sm:$0xff] }
 0x2eb   : > { %v1710_v23 = vadd.f32 %v6575_v9, %v1590_v58  ;;  %v738_v11 = vadd.f32 %v6578_v59, %v618_v45  ;;  %2475 = vrot.lane.b32.xlu0 %v6581_v21, %s3451_s10  ;;  %v5581_v30 = vadd.f32 %v5380_v35, %v2079_v2  ;;  %v6582_v0 = vld [vmem:[#allocation48_spill] sm:$0xff]  ;;  %v6583_v3 = vld [vmem:[#allocation29_spill] sm:$0xff]  ;;  %v6585_v62 = vld [vmem:[#allocation158_spill] sm:$0xff]  ;;  %v1943_v42 = vpop.permute.xlu1 %1942 }
 0x2ec   : > { %v1609_v48 = vadd.f32 %v6579_v50, %v1489_v8  ;;  %v1389_v17 = vadd.f32 %v6583_v3, %v6582_v0  ;;  %v6584_v1 = vld [vmem:[#allocation109_spill] sm:$0xff]  ;;  %v2036_v26 = vadd.f32 %v6585_v62, %v1949_v43  ;;  %v5588_v45 = vadd.f32 %v5384_v52, %v2080_v15  ;;  %v6587_v8 = vld [vmem:[#allocation84_spill] sm:$0xff]  ;;  %v5596_v2 = vpop.permute.xlu0 %1944  ;;  %v6589_v29 = vld [vmem:[#allocation63_spill] sm:$0xff] }
 0x2ed   : > { %v1830_v58 = vadd.f32 %v6580_v25, %v1710_v23  ;;  %v1610_v46 = vadd.f32 %v6584_v1, %v1490_v40  ;;  %v6586_v10 = vld [vmem:[#allocation53_spill] sm:$0xff]  ;;  %v5593_v9 = vmul.f32 %v5560_v22, %v6587_v8  ;;  %v858_v32 = vadd.f32 %v6589_v29, %v738_v11  ;;  %v6591_v43 = vld [vmem:[#allocation126_spill] sm:$0xff]  ;;  %v6593_v15 = vld [vmem:[#allocation52_spill] sm:$0xff] }
 0x2ee   : > { %v758_v51 = vadd.f32 %v6586_v10, %v638_v7  ;;  %v6588_v23 = vld [vmem:[#allocation125_spill] sm:$0xff]  ;;  %2477 = vrot.lane.b32.xlu1 %v2469_v41, %s3451_s10  ;;  %v2087_v52 = vadd.f32 %v5397_v14, %v2036_v26  ;;  %v6592_v7 = vld [vmem:[#allocation38_spill] sm:$0xff]  ;;  %v6595_v3 = vld [vmem:[#allocation159_spill] sm:$0xff]  ;;  %v2489_v11 = vmul.f32 %v5207_v57, %v5340_v16 }
 0x2ef   : > { %v1729_v35 = vadd.f32 %v6588_v23, %v1609_v48  ;;  %v1950_v38 = vadd.f32 %v1943_v42, %v1830_v58  ;;  %v6590_v40 = vld [vmem:[#allocation69_spill] sm:$0xff]  ;;  %v1730_v50 = vadd.f32 %v6591_v43, %v1610_v46  ;;  %v1390_v25 = vadd.f32 %v6593_v15, %v6592_v7  ;;  %v6598_v46 = vld [vmem:[#allocation111_spill] sm:$0xff]  ;;  %v1961_v14 = vpop.permute.xlu1 %1960  ;;  %v6600_v10 = vld [vmem:[#allocation56_spill] sm:$0xff] }
 0x2f0   : > { %v1509_v59 = vadd.f32 %v6590_v40, %v1389_v17  ;;  %v6594_v21 = vld [vmem:[#allocation153_spill] sm:$0xff]  ;;  %v6597_v17 = vld [vmem:[#allocation78_spill] sm:$0xff]  ;;  %v6599_v41 = vld [vmem:[#allocation155_spill] sm:$0xff]  ;;  %v5615_v26 = vadd.f32 %v5407_v28, %v2087_v52  ;;  %v778_v8 = vadd.f32 %v6600_v10, %v658_v37  ;;  %v1963_v29 = vpop.permute.xlu0 %1962 }
 0x2f1   : > { %v1849_v0 = vadd.f32 %v6594_v21, %v1729_v35  ;;  %v2037_v48 = vadd.f32 %v6595_v3, %v1950_v38  ;;  %v6596_v58 = vld [vmem:[#allocation161_spill] sm:$0xff]  ;;  %v978_v1 = vadd.f32 %v6597_v17, %v858_v32  ;;  %v1850_v42 = vadd.f32 %v6599_v41, %v1730_v50  ;;  %v6601_v23 = vld [vmem:[#allocation94_spill] sm:$0xff]  ;;  %v6602_v43 = vld [vmem:[#allocation67_spill] sm:$0xff] }
 0x2f2   : > { %2493 = vrot.lane.b32.xlu0 %v6596_v58, %s3451_s10  ;;  %v1629_v62 = vadd.f32 %v6598_v46, %v1509_v59  ;;  %v1510_v35 = vadd.f32 %v6601_v23, %v1390_v25  ;;  %v878_v57 = vadd.f32 %v6602_v43, %v758_v51  ;;  %v6603_v7 = vld [vmem:[#allocation47_spill] sm:$0xff]  ;;  %v6604_v15 = vld [vmem:[#allocation128_spill] sm:$0xff]  ;;  %2495 = vrot.lane.b32.xlu1 %v5276_v54, %s3451_s10  ;;  %v6605_v28 = vld [vmem:[#allocation17_spill] sm:$0xff] }
 0x2f3   : > { %v1969_v38 = vadd.f32 %v1961_v14, %v1849_v0  ;;  %v2088_v40 = vadd.f32 %v5411_v33, %v2037_v48  ;;  %v1098_v32 = vadd.f32 %v6603_v7, %v978_v1  ;;  %v1970_v21 = vadd.f32 %v1963_v29, %v1850_v42  ;;  %v6606_v50 = vld [vmem:[#allocation30_spill] sm:$0xff]  ;;  %v5633_v51 = vld [vmem:[#allocation2 + $0x29] sm:$0x1]  ;;  %v6610_v17 = vld [vmem:[#allocation27_spill] sm:$0xff]  ;;  %v5641_v42 = vpop.permute.xlu1 %1964 }
 0x2f4   : > { %v1749_v59 = vadd.f32 %v6604_v15, %v1629_v62  ;;  %v1409_v52 = vadd.f32 %v6606_v50, %v6605_v28  ;;  %v6607_v37 = vld [vmem:[#allocation114_spill] sm:$0xff]  ;;  %v6609_v48 = vld [vmem:[#allocation92_spill] sm:$0xff]  ;;  %v6611_v1 = vld [vmem:[#allocation79_spill] sm:$0xff] }
 0x2f5   : > { %v1630_v3 = vadd.f32 %v6607_v37, %v1510_v35  ;;  %v6608_v25 = vld [vmem:[#allocation162_spill] sm:$0xff]  ;;  %v5631_v33 = vadd.f32 %v5421_v60, %v2088_v40  ;;  %v1221_v58 = vmul.f32 %v5633_v51, %v6609_v48  ;;  %v1410_v54 = vadd.f32 %v6611_v1, %v6610_v17  ;;  %v6612_v62 = vld [vmem:[#allocation164_spill] sm:$0xff]  ;;  %v6613_v14 = vld [vmem:[#allocation91_spill] sm:$0xff] }
 0x2f6   : > { %v2044_v0 = vadd.f32 %v6608_v25, %v1969_v38  ;;  %2497 = vrot.lane.b32.xlu0 %v2489_v11, %s3451_s10  ;;  %v1869_v46 = vadd.f32 %v5288_v55, %v1749_v59  ;;  %v2045_v41 = vadd.f32 %v6612_v62, %v1970_v21  ;;  %v998_v10 = vadd.f32 %v6613_v14, %v878_v57  ;;  %v6614_v11 = vld [vmem:[#allocation95_spill] sm:$0xff]  ;;  %v6615_v60 = vld [vmem:[#allocation130_spill] sm:$0xff]  ;;  %v1981_v38 = vpop.permute.xlu0 %1980  ;;  %v6616_v40 = vld [vmem:[#allocation65_spill] sm:$0xff] }
 0x2f7   : > { %v1529_v23 = vadd.f32 %v6614_v11, %v1409_v52  ;;  %v1750_v35 = vadd.f32 %v6615_v60, %v1630_v3  ;;  %v1530_v43 = vadd.f32 %v6616_v40, %v1410_v54  ;;  %v6617_v15 = vld [vmem:[#allocation166_spill] sm:$0xff]  ;;  %v2509_v55 = vmul.f32 %v5226_v34, %v5340_v16  ;;  %v6618_v21 = vld [vmem:[#allocation117_spill] sm:$0xff]  ;;  %v6620_v37 = vld [vmem:[#allocation167_spill] sm:$0xff]  ;;  %v1983_v54 = vpop.permute.xlu1 %1982 }
 0x2f8   : > { %v2095_v29 = vadd.f32 %v5425_v6, %v2044_v0  ;;  %v1989_v7 = vadd.f32 %v1981_v38, %v1869_v46  ;;  %2513 = vrot.lane.b32.xlu1 %v6617_v15, %s3451_s10  ;;  %v2096_v59 = vadd.f32 %v5439_v31, %v2045_v41  ;;  %v1173_v57 = vadd.f32 %v5564_v18, %v1098_v32  ;;  %v6619_v50 = vld [vmem:[#allocation177_spill] sm:$0xff]  ;;  %v6622_v25 = vld [vmem:[#allocation26_spill] sm:$0xff]  ;;  %v6626_v32 = vld [vmem:[#allocation23_spill] sm:$0xff] }
 0x2f9   : > { %v1649_v28 = vadd.f32 %v6618_v21, %v1529_v23  ;;  %v1870_v52 = vadd.f32 %v6619_v50, %v1750_v35  ;;  %v6621_v6 = vld [vmem:[#allocation185_spill] sm:$0xff]  ;;  %v1118_v0 = vadd.f32 %v6622_v25, %v998_v10  ;;  %v6623_v48 = vld [vmem:[#allocation118_spill] sm:$0xff]  ;;  %v6627_v62 = vld [vmem:[#allocation44_spill] sm:$0xff] }
 0x2fa   : > { %2515 = vrot.lane.b32.xlu0 %v6620_v37, %s3451_s10  ;;  %v5659_v3 = vadd.f32 %v6621_v6, %v2095_v29  ;;  %v1650_v17 = vadd.f32 %v6623_v48, %v1530_v43  ;;  %v6624_v1 = vld [vmem:[#allocation165_spill] sm:$0xff]  ;;  %v5665_v31 = vadd.f32 %v5443_v5, %v2096_v59  ;;  %v678_v41 = vadd.f32 %v6627_v62, %v5536_v39  ;;  %v6628_v14 = vld [vmem:[#allocation132_spill] sm:$0xff]  ;;  %v5672_v60 = vpop.permute.xlu0 %1984  ;;  %v6629_v10 = vld [vmem:[#allocation70_spill] sm:$0xff] }
 0x2fb   : > { %v2052_v34 = vadd.f32 %v6624_v1, %v1989_v7  ;;  %v6625_v18 = vld [vmem:[#allocation13_spill] sm:$0xff]  ;;  %v1769_v11 = vadd.f32 %v6628_v14, %v1649_v28  ;;  %v1990_v23 = vadd.f32 %v1983_v54, %v1870_v52  ;;  %v898_v35 = vadd.f32 %v6629_v10, %v778_v8  ;;  %v5675_v38 = vld [vmem:[#allocation2 + $0x41] sm:$0x1]  ;;  %v6630_v29 = vld [vmem:[#allocation36_spill] sm:$0xff]  ;;  %v2001_v54 = vpop.permute.xlu1 %2000 }
 0x2fc   : > { %v458_v46 = vadd.f32 %v6626_v32, %v6625_v18  ;;  %v1272_v40 = vmul.f32 %v5675_v38, %v6630_v29  ;;  %v6631_v5 = vld [vmem:[#allocation133_spill] sm:$0xff]  ;;  %2517 = vrot.lane.b32.xlu1 %v2509_v55, %s3451_s10  ;;  %v6632_v7 = vld [vmem:[#allocation186_spill] sm:$0xff]  ;;  %v1224_v59 = vadd.f32 %v1221_v58, %v1173_v57  ;;  %v6633_v39 = vld [vmem:[#allocation183_spill] sm:$0xff]  ;;  %v1181_v25 = vadd.f32 %v5593_v9, %v1118_v0  ;;  %s5717_s10 = sld [smem:[#allocation3 + $0x93]] }
 0x2fd   : > { %v1770_v43 = vadd.f32 %v6631_v5, %v1650_v17  ;;  %v2103_v15 = vadd.f32 %v6632_v7, %v2052_v34  ;;  %v1889_v21 = vadd.f32 %v6633_v39, %v1769_v11  ;;  %v6634_v28 = vld [vmem:[#allocation168_spill] sm:$0xff]  ;;  %v6635_v52 = vld [vmem:[#allocation169_spill] sm:$0xff]  ;;  %v6640_v57 = vld [vmem:[#allocation14_spill] sm:$0xff] }
 0x2fe   : > { %v2053_v50 = vadd.f32 %v6634_v28, %v1990_v23  ;;  %2533 = vrot.lane.b32.xlu0 %v6635_v52, %s3452_s23  ;;  %v6636_v8 = vld [vmem:[#allocation113_spill] sm:$0xff]  ;;  %v6639_v1 = vld [vmem:[#allocation184_spill] sm:$0xff]  ;;  %v6642_v32 = vld [vmem:[#allocation98_spill] sm:$0xff]  ;;  %v2003_v11 = vpop.permute.xlu0 %2002  ;;  %v1275_v28 = vadd.f32 %v1272_v40, %v1224_v59 }
 0x2ff   : > { %v6637_v37 = vld [vmem:[#allocation145_spill] sm:$0xff]  ;;  %v1890_v55 = vadd.f32 %v6639_v1, %v1770_v43  ;;  %v5693_v58 = vadd.f32 %v5463_v36, %v2103_v15  ;;  %v6641_v34 = vld [vmem:[#allocation24_spill] sm:$0xff]  ;;  %v1018_v62 = vadd.f32 %v6642_v32, %v898_v35  ;;  %v2009_v14 = vadd.f32 %v2001_v54, %v1889_v21  ;;  %v6645_v5 = vld [vmem:[#allocation86_spill] sm:$0xff] }
 0x300   : > { %v2529_v6 = vmul.f32 %v6637_v37, %v6636_v8  ;;  %v6638_v48 = vld [vmem:[#allocation93_spill] sm:$0xff]  ;;  %v478_v18 = vadd.f32 %v6641_v34, %v6640_v57  ;;  %v2104_v23 = vadd.f32 %v5472_v47, %v2053_v50  ;;  %v1186_v43 = vmul.f32 %v5560_v22, %v6645_v5  ;;  %v6647_v15 = vld [vmem:[#allocation62_spill] sm:$0xff]  ;;  %v6648_v52 = vld [vmem:[#allocation171_spill] sm:$0xff] }
 0x301   : > { %v1229_v17 = vmul.f32 %v5633_v51, %v6638_v48  ;;  %v6643_v10 = vld [vmem:[#allocation33_spill] sm:$0xff]  ;;  %v2010_v7 = vadd.f32 %v2003_v11, %v1890_v55  ;;  %v1138_v39 = vadd.f32 %v6647_v15, %v1018_v62  ;;  %v2060_v35 = vadd.f32 %v6648_v52, %v2009_v14  ;;  %v6651_v48 = vld [vmem:[#allocation172_spill] sm:$0xff]  ;;  %v5715_v55 = vpop.permute.xlu1 %2004  ;;  %v6652_v40 = vld [vmem:[#allocation34_spill] sm:$0xff] }
 0x302   : > { %v578_v9 = vadd.f32 %v6643_v10, %v458_v46  ;;  %v6644_v0 = vld [vmem:[#allocation57_spill] sm:$0xff]  ;;  %2537 = vrot.lane.b32.xlu0 %v2529_v6, %s3452_s23  ;;  %v5709_v47 = vadd.f32 %v5476_v13, %v2104_v23  ;;  %v6649_v46 = vld [vmem:[#allocation71_spill] sm:$0xff]  ;;  %v598_v59 = vadd.f32 %v6652_v40, %v478_v18  ;;  %v6653_v54 = vld [vmem:[#allocation80_spill] sm:$0xff]  ;;  %v5723_v34 = vpop.permute.xlu0 %2173 }
 0x303   : > { %v798_v29 = vadd.f32 %v6644_v0, %v678_v41  ;;  %v6646_v36 = vld [vmem:[#allocation173_spill] sm:$0xff]  ;;  %v1232_v41 = vadd.f32 %v1229_v17, %v1181_v25  ;;  %v2061_v1 = vadd.f32 %v6651_v48, %v2010_v7  ;;  %v1146_v6 = vmul.f32 %v5560_v22, %v6653_v54  ;;  %v6654_v57 = vld [vmem:[#allocation19_spill] sm:$0xff]  ;;  %v6656_v62 = vld [vmem:[#allocation100_spill] sm:$0xff] }
 0x304   : > { %2535 = vrot.lane.b32.xlu1 %v6646_v36, %s3452_s23  ;;  %v6650_v50 = vld [vmem:[#allocation97_spill] sm:$0xff]  ;;  %v1371_v13 = vadd.f32 %v6654_v57, %v1275_v28  ;;  %v2111_v25 = vadd.f32 %v5485_v4, %v2060_v35  ;;  %v6657_v11 = vld [vmem:[#allocation174_spill] sm:$0xff]  ;;  %v6658_v23 = vld [vmem:[#allocation148_spill] sm:$0xff]  ;;  %v1189_v0 = vadd.f32 %v1186_v43, %v1138_v39 }
 0x305   : > { %v918_v21 = vadd.f32 %v6649_v46, %v798_v29  ;;  %v1280_v37 = vmul.f32 %v5675_v38, %v6650_v50  ;;  %v6655_v17 = vld [vmem:[#allocation45_spill] sm:$0xff]  ;;  %v2549_v10 = vmul.f32 %v6658_v23, %v6636_v8  ;;  %v2112_v18 = vadd.f32 %v5497_v53, %v2061_v1  ;;  %v6659_v29 = vld [vmem:[#allocation96_spill] sm:$0xff]  ;;  %v5743_v28 = vpop.permute.xlu1 %2175  ;;  %v6662_v35 = vld [vmem:[#allocation46_spill] sm:$0xff] }
 0x306   : > { %v698_v32 = vadd.f32 %v6655_v17, %v578_v9  ;;  %v1237_v5 = vmul.f32 %v5633_v51, %v6659_v29  ;;  %v6660_v7 = vld [vmem:[#allocation85_spill] sm:$0xff]  ;;  %v6661_v9 = vld [vmem:[#allocation175_spill] sm:$0xff]  ;;  %v5741_v36 = vadd.f32 %v5493_v63, %v2111_v25  ;;  %v718_v53 = vadd.f32 %v6662_v35, %v598_v59  ;;  %v6663_v43 = vld [vmem:[#allocation58_spill] sm:$0xff]  ;;  %v5751_v50 = vpop.permute.xlu0 %2177 }
 0x307   : > { %v1038_v14 = vadd.f32 %v6656_v62, %v918_v21  ;;  %v1491_v4 = vadd.f32 %v6660_v7, %v1371_v13  ;;  %2555 = vrot.lane.b32.xlu0 %v6661_v9, %s3452_s23  ;;  %v1283_v15 = vadd.f32 %v1280_v37, %v1232_v41  ;;  %v5746_v52 = vadd.f32 %v5505_v61, %v2112_v18  ;;  %v6664_v46 = vld [vmem:[#allocation110_spill] sm:$0xff]  ;;  %v6665_v48 = vld [vmem:[#allocation112_spill] sm:$0xff]  ;;  %v6666_v1 = vld [vmem:[#allocation149_spill] sm:$0xff] }
 0x308   : > { %2553 = vrot.lane.b32.xlu1 %v6657_v11, %s3452_s23  ;;  %v818_v39 = vadd.f32 %v6663_v43, %v698_v32  ;;  %v2567_v40 = vmul.f32 %v6666_v1, %v6665_v48  ;;  %v6667_v54 = vld [vmem:[#allocation87_spill] sm:$0xff]  ;;  %v6668_v37 = vld [vmem:[#allocation20_spill] sm:$0xff]  ;;  %v6669_v61 = vld [vmem:[#allocation61_spill] sm:$0xff]  ;;  %v1240_v17 = vadd.f32 %v1237_v5, %v1189_v0  ;;  %v2586_v7 = vstv %s5717_s10  ;;  %s3254_s10 = sld [smem:[#allocation7 + $0x5]] }
 0x309   : > { %v1611_v21 = vadd.f32 %v6664_v46, %v1491_v4  ;;  %v1149_v63 = vadd.f32 %v1146_v6, %v1038_v14  ;;  %v1197_v41 = vmul.f32 %v5633_v51, %v6667_v54  ;;  %v1391_v57 = vadd.f32 %v6668_v37, %v1283_v15  ;;  %v6670_v59 = vld [vmem:[#allocation72_spill] sm:$0xff]  ;;  %v6671_v32 = vld [vmem:[#allocation127_spill] sm:$0xff]  ;;  %v5767_v23 = vpop.permute.xlu1 %2193  ;;  %v6675_v9 = vld [vmem:[#allocation81_spill] sm:$0xff] }
 0x30a   : > { %v1288_v13 = vmul.f32 %v5675_v38, %v6669_v61  ;;  %v938_v25 = vadd.f32 %v6670_v59, %v818_v39  ;;  %v2569_v6 = vmul.f32 %v6666_v1, %v6636_v8  ;;  %v6672_v14 = vld [vmem:[#allocation51_spill] sm:$0xff]  ;;  %v1154_v0 = vmul.f32 %v5560_v22, %v6675_v9  ;;  %v6676_v5 = vld [vmem:[#allocation73_spill] sm:$0xff]  ;;  %v5777_v39 = vpop.permute.xlu0 %2195  ;;  %v6679_v54 = vld [vmem:[#allocation116_spill] sm:$0xff] }
 0x30b   : > { %v1731_v62 = vadd.f32 %v6671_v32, %v1611_v21  ;;  %2573 = vrot.lane.b32.xlu0 %v2567_v40, %s3452_s23  ;;  %v1511_v11 = vadd.f32 %v6672_v14, %v1391_v57  ;;  %v6673_v18 = vld [vmem:[#allocation115_spill] sm:$0xff]  ;;  %v1200_v46 = vadd.f32 %v1197_v41, %v1149_v63  ;;  %v6682_v63 = vld [vmem:[#allocation82_spill] sm:$0xff]  ;;  %v6685_v9 = vld [vmem:[#allocation89_spill] sm:$0xff] }
 0x30c   : > { %2557 = vrot.lane.b32.xlu1 %v2549_v10, %s3452_s23  ;;  %v2568_v29 = vmul.f32 %v6666_v1, %v6673_v18  ;;  %v6674_v10 = vld [vmem:[#allocation60_spill] sm:$0xff]  ;;  %v1058_v15 = vadd.f32 %v6676_v5, %v938_v25  ;;  %v6677_v35 = vld [vmem:[#allocation163_spill] sm:$0xff]  ;;  %v2606_v1 = vstv %s5732_s22  ;;  %v1291_v61 = vadd.f32 %v1288_v13, %v1240_v17 }
 0x30d   : > { %v838_v4 = vadd.f32 %v6674_v10, %v718_v53  ;;  %v1851_v43 = vadd.f32 %v6677_v35, %v1731_v62  ;;  %v6678_v21 = vld [vmem:[#allocation99_spill] sm:$0xff]  ;;  %v1631_v37 = vadd.f32 %v6679_v54, %v1511_v11  ;;  %v1162_v41 = vmul.f32 %v5560_v22, %v6682_v63  ;;  %v5794_v11 = vpop.permute.xlu1 %2197 }
 0x30e   : > { %v1248_v40 = vmul.f32 %v5675_v38, %v6678_v21  ;;  %v6680_v53 = vld [vmem:[#allocation75_spill] sm:$0xff]  ;;  %v2588_v10 = vmul.f32 %v2586_v7, %v6673_v18  ;;  %v1205_v5 = vmul.f32 %v5633_v51, %v6685_v9  ;;  %v2589_v54 = vmul.f32 %v2586_v7, %v6636_v8 }
 0x30f   : > { %v958_v57 = vadd.f32 %v6680_v53, %v838_v4  ;;  %v6681_v59 = vld [vmem:[#allocation143_spill] sm:$0xff]  ;;  %v1971_v32 = vadd.f32 %v5641_v42, %v1851_v43  ;;  %2577 = vrot.lane.b32.xlu0 %v2569_v6, %s3452_s23  ;;  %v1157_v4 = vadd.f32 %v1154_v0, %v1058_v15  ;;  %v6686_v42 = vld [vmem:[#allocation41_spill] sm:$0xff]  ;;  %v5802_v6 = vpop.permute.xlu0 %2213 }
 0x310   : > { %2575 = vrot.lane.b32.xlu1 %v2568_v29, %s3452_s23  ;;  %v2043_v25 = vmul.f32 %v6681_v59, %v6636_v8  ;;  %v6683_v62 = vld [vmem:[#allocation131_spill] sm:$0xff]  ;;  %v2587_v29 = vmul.f32 %v2586_v7, %v6665_v48  ;;  %v1411_v35 = vadd.f32 %v6686_v42, %v1291_v61  ;;  %v1251_v43 = vadd.f32 %v1248_v40, %v1200_v46  ;;  %v6688_v48 = vld [vmem:[#allocation102_spill] sm:$0xff]  ;;  %v6689_v53 = vld [vmem:[#allocation129_spill] sm:$0xff] }
 0x311   : > { %v1751_v14 = vadd.f32 %v6683_v62, %v1631_v37  ;;  %v6684_v13 = vld [vmem:[#allocation59_spill] sm:$0xff]  ;;  %v6691_v59 = vld [vmem:[#allocation76_spill] sm:$0xff]  ;;  %v6692_v46 = vld [vmem:[#allocation101_spill] sm:$0xff] }
 0x312   : > { %v1078_v17 = vadd.f32 %v6684_v13, %v958_v57  ;;  %v6687_v22 = vld [vmem:[#allocation179_spill] sm:$0xff]  ;;  %v1531_v37 = vadd.f32 %v6688_v48, %v1411_v35  ;;  %v2046_v18 = vadd.f32 %v2043_v25, %v1971_v32  ;;  %v6690_v57 = vld [vmem:[#allocation181_spill] sm:$0xff]  ;;  %v1311_v63 = vadd.f32 %v6691_v59, %v1251_v43  ;;  %v5819_v25 = vpop.permute.xlu1 %2215  ;;  %v6696_v43 = vld [vmem:[#allocation66_spill] sm:$0xff] }
 0x313   : > { %v1871_v21 = vadd.f32 %v6687_v22, %v1751_v14  ;;  %2595 = vrot.lane.b32.xlu0 %v2588_v10, %s3452_s23  ;;  %v3333_v0 = vld [vmem:[#allocation2 + $0x2] sm:$0xff]  ;;  %v2094_v61 = vmul.f32 %v6690_v57, %v6689_v53  ;;  %v1256_v40 = vmul.f32 %v5675_v38, %v6692_v46  ;;  %v5814_v62 = vld [vmem:[#allocation2 + $0x12] sm:$0x1]  ;;  %v6694_v10 = vld [vmem:[#allocation90_spill] sm:$0xff]  ;;  %v5824_v35 = vpop.permute.xlu0 %2217  ;;  %v2626_v48 = vstv %s5784_s21 }
 0x314   : > { %2593 = vrot.lane.b32.xlu1 %v2587_v29, %s3452_s23  ;;  %v2607_v15 = vmul.f32 %v3333_v0, %v2606_v1  ;;  %v6693_v14 = vld [vmem:[#allocation144_spill] sm:$0xff]  ;;  %v1165_v32 = vadd.f32 %v1162_v41, %v1078_v17  ;;  %v1208_v29 = vadd.f32 %v1205_v5, %v1157_v4  ;;  %v1213_v13 = vmul.f32 %v5633_v51, %v6694_v10  ;;  %v6695_v9 = vld [vmem:[#allocation119_spill] sm:$0xff]  ;;  %v6697_v57 = vld [vmem:[#allocation134_spill] sm:$0xff] }
 0x315   : > { %v2051_v8 = vmul.f32 %v5814_v62, %v6693_v14  ;;  %v1991_v7 = vadd.f32 %v5672_v60, %v1871_v21  ;;  %v1651_v42 = vadd.f32 %v6695_v9, %v1531_v37  ;;  %v1431_v22 = vadd.f32 %v6696_v43, %v1311_v63  ;;  %v6698_v51 = vld [vmem:[#allocation182_spill] sm:$0xff]  ;;  %v6699_v5 = vld [vmem:[#allocation103_spill] sm:$0xff]  ;;  %v3335_v46 = vld [vmem:[#allocation2 + $0xa] sm:$0xff] }
 0x316   : > { %v2609_v41 = vmul.f32 %v5814_v62, %v2606_v1  ;;  %v2097_v4 = vadd.f32 %v2094_v61, %v2046_v18  ;;  %v2145_v17 = vmul.f32 %v6698_v51, %v5340_v16  ;;  %v5837_v59 = vpop.permute.xlu1 %2233  ;;  %v2608_v63 = vmul.f32 %v3335_v46, %v2606_v1  ;;  %v6700_v9 = vld [vmem:[#allocation35_spill] sm:$0xff] }
 0x317   : > { %v1771_v60 = vadd.f32 %v6697_v57, %v1651_v42  ;;  %2613 = vrot.lane.b32.xlu0 %v2607_v15, %s3452_s23  ;;  %v1551_v21 = vadd.f32 %v6699_v5, %v1431_v22  ;;  %v2054_v37 = vadd.f32 %v2051_v8, %v1991_v7  ;;  %v1259_v14 = vadd.f32 %v1256_v40, %v1208_v29  ;;  %v2236_v61 = vpop.permute.xlu0 %2235  ;;  %v6701_v42 = vld [vmem:[#allocation120_spill] sm:$0xff]  ;;  %v6702_v8 = vld [vmem:[#allocation50_spill] sm:$0xff] }
 0x318   : > { %2597 = vrot.lane.b32.xlu1 %v2589_v54, %s3452_s23  ;;  %v2102_v54 = vmul.f32 %v5414_v49, %v6689_v53  ;;  %v1216_v10 = vadd.f32 %v1213_v13, %v1165_v32  ;;  %v1264_v15 = vmul.f32 %v5675_v38, %v6700_v9  ;;  %v5846_v22 = vadd.f32 %v2236_v61, %v5665_v31  ;;  %v6703_v49 = vld [vmem:[#allocation147_spill] sm:$0xff] }
 0x319   : > { %v1891_v18 = vadd.f32 %v5459_v24, %v1771_v60  ;;  %v1671_v43 = vadd.f32 %v6701_v42, %v1551_v21  ;;  %v2627_v1 = vmul.f32 %v3333_v0, %v2626_v48  ;;  %v1331_v7 = vadd.f32 %v6702_v8, %v1259_v14  ;;  %v6704_v38 = vld [vmem:[#allocation135_spill] sm:$0xff]  ;;  %v6705_v0 = vld [vmem:[#allocation42_spill] sm:$0xff] }
 0x31a   : > { %v2059_v40 = vmul.f32 %v5814_v62, %v6703_v49  ;;  %v2148_v24 = vadd.f32 %v2145_v17, %v2097_v4  ;;  %v2238_v13 = vpop.permute.xlu1 %2237  ;;  %v2628_v57 = vmul.f32 %v3335_v46, %v2626_v48  ;;  %v2105_v31 = vadd.f32 %v2102_v54, %v2054_v37  ;;  %v6707_v37 = vld [vmem:[#allocation104_spill] sm:$0xff] }
 0x31b   : > { %v2011_v32 = vadd.f32 %v5715_v55, %v1891_v18  ;;  %2617 = vrot.lane.b32.xlu0 %v2609_v41, %s3452_s23  ;;  %v1791_v29 = vadd.f32 %v6704_v38, %v1671_v43  ;;  %v2153_v60 = vmul.f32 %v5428_v12, %v5340_v16  ;;  %v1267_v51 = vadd.f32 %v1264_v15, %v1216_v10  ;;  %v6706_v55 = vld [vmem:[#allocation140_spill] sm:$0xff]  ;;  %v6708_v10 = vld [vmem:[#allocation187_spill] sm:$0xff]  ;;  %v6709_v15 = vld [vmem:[#allocation77_spill] sm:$0xff] }
 0x31c   : > { %2615 = vrot.lane.b32.xlu1 %v2608_v63, %s3452_s23  ;;  %v1451_v5 = vadd.f32 %v6705_v0, %v1331_v7  ;;  %v5858_v21 = vadd.f32 %v2238_v13, %v2148_v24  ;;  %v2254_v63 = vpop.permute.xlu0 %2253  ;;  %v2646_v14 = vstv %s5826_s30  ;;  %v2019_v41 = vmul.f32 %v5814_v62, %v6706_v55  ;;  %v6711_v7 = vld [vmem:[#allocation88_spill] sm:$0xff]  ;;  %v6715_v55 = vld [vmem:[#allocation141_spill] sm:$0xff] }
 0x31d   : > { %v1911_v4 = vadd.f32 %v5512_v44, %v1791_v29  ;;  %v5867_v17 = vadd.f32 %v2254_v63, %v5693_v58  ;;  %v2629_v12 = vmul.f32 %v5814_v62, %v2626_v48  ;;  %v2062_v54 = vadd.f32 %v2059_v40, %v2011_v32  ;;  %v6710_v58 = vld [vmem:[#allocation121_spill] sm:$0xff]  ;;  %v6712_v32 = vld [vmem:[#allocation151_spill] sm:$0xff]  ;;  %v6713_v29 = vld [vmem:[#allocation138_spill] sm:$0xff] }
 0x31e   : > { %v1571_v46 = vadd.f32 %v6707_v37, %v1451_v5  ;;  %v2110_v9 = vmul.f32 %v6708_v10, %v6689_v53  ;;  %v1351_v18 = vadd.f32 %v6709_v15, %v1267_v51  ;;  %v2256_v44 = vpop.permute.xlu1 %2255  ;;  %v2156_v61 = vadd.f32 %v2153_v60, %v2105_v31  ;;  %v6714_v51 = vld [vmem:[#allocation107_spill] sm:$0xff] }
 0x31f   : > { %2635 = vrot.lane.b32.xlu0 %v2628_v57, %s3452_s23  ;;  %v5880_v43 = vadd.f32 %v2256_v44, %v5709_v47  ;;  %v2022_v40 = vadd.f32 %v2019_v41, %v1911_v4  ;;  %v2070_v24 = vmul.f32 %v6712_v32, %v6689_v53  ;;  %v5893_v47 = vld [vmem:[#allocation2 + $0x2a] sm:$0x1]  ;;  %v2161_v60 = vmul.f32 %v5466_v19, %v5340_v16  ;;  %v5899_v5 = vld [vmem:[#allocation2 + $0x22] sm:$0xff]  ;;  %v6718_v44 = vld [vmem:[#allocation150_spill] sm:$0xff] }
 0x320   : > { %2633 = vrot.lane.b32.xlu1 %v2627_v1, %s3452_s23  ;;  %v1691_v42 = vadd.f32 %v6710_v58, %v1571_v46  ;;  %v2258_v48 = vpop.permute.xlu0 %2257  ;;  %v5882_v1 = vld [vmem:[#allocation2 + $0x1a] sm:$0xff]  ;;  %v1471_v49 = vadd.f32 %v6711_v7, %v1351_v18  ;;  %v2649_v57 = vmul.f32 %v5893_v47, %v2646_v14  ;;  %v2113_v31 = vadd.f32 %v2110_v9, %v2062_v54  ;;  %v6716_v54 = vld [vmem:[#allocation124_spill] sm:$0xff] }
 0x321   : > { %v2647_v8 = vmul.f32 %v5882_v1, %v2646_v14  ;;  %v5888_v38 = vadd.f32 %v2258_v48, %v2156_v61  ;;  %v2648_v63 = vmul.f32 %v5899_v5, %v2646_v14  ;;  %v2027_v41 = vmul.f32 %v5814_v62, %v6715_v55  ;;  %v6717_v9 = vld [vmem:[#allocation170_spill] sm:$0xff] }
 0x322   : > { %v1811_v13 = vadd.f32 %v6713_v29, %v1691_v42  ;;  %v1591_v0 = vadd.f32 %v6714_v51, %v1471_v49  ;;  %v2274_v53 = vpop.permute.xlu1 %2273  ;;  %v2666_v46 = vstv %s5861_s0  ;;  %v2073_v10 = vadd.f32 %v2070_v24, %v2022_v40  ;;  %v6719_v7 = vld [vmem:[#allocation142_spill] sm:$0xff]  ;;  %v6720_v49 = vld [vmem:[#allocation152_spill] sm:$0xff] }
 0x323   : > { %2653 = vrot.lane.b32.xlu0 %v2647_v8, %s3452_s23  ;;  %v2121_v15 = vmul.f32 %v6717_v9, %v5340_v16  ;;  %v2164_v14 = vadd.f32 %v2161_v60, %v2113_v31  ;;  %v2182_v61 = vadd.f32 %v5723_v34, %v5533_v20  ;;  %v2667_v42 = vmul.f32 %v5882_v1, %v2666_v46  ;;  %v6721_v51 = vld [vmem:[#allocation176_spill] sm:$0xff] }
 0x324   : > { %2637 = vrot.lane.b32.xlu1 %v2629_v12, %s3452_s23  ;;  %v1931_v4 = vadd.f32 %v5558_v27, %v1811_v13  ;;  %v5906_v12 = vadd.f32 %v2274_v53, %v5741_v36  ;;  %v2276_v37 = vpop.permute.xlu0 %2275  ;;  %v1711_v19 = vadd.f32 %v6716_v54, %v1591_v0  ;;  %v2686_v27 = vstv %s5875_s4 }
 0x325   : > { %v5913_v18 = vadd.f32 %v2276_v37, %v5746_v52  ;;  %v2668_v48 = vmul.f32 %v5899_v5, %v2666_v46  ;;  %v2035_v52 = vmul.f32 %v5814_v62, %v6719_v7  ;;  %v2078_v40 = vmul.f32 %v5893_v47, %v6720_v49 }
 0x326   : > { %v1831_v36 = vadd.f32 %v6718_v44, %v1711_v19  ;;  %v2278_v58 = vpop.permute.xlu1 %2277  ;;  %v2030_v8 = vadd.f32 %v2027_v41, %v1931_v4  ;;  %v2124_v13 = vadd.f32 %v2121_v15, %v2073_v10  ;;  %v2669_v34 = vmul.f32 %v5893_v47, %v2666_v46  ;;  %v6722_v41 = vld [vmem:[#allocation178_spill] sm:$0xff]  ;;  %v6723_v44 = vld [vmem:[#allocation180_spill] sm:$0xff] }
 0x327   : > { %2657 = vrot.lane.b32.xlu0 %v2649_v57, %s3452_s23  ;;  %v5927_v32 = vadd.f32 %v2278_v58, %v2164_v14  ;;  %v2183_v57 = vadd.f32 %v5743_v28, %v5551_v56  ;;  %v2129_v0 = vmul.f32 %v6721_v51, %v5340_v16  ;;  %v2086_v4 = vmul.f32 %v5893_v47, %v6722_v41  ;;  %v6010_v41 = vld [vmem:[#allocation2 + $0x32] sm:$0xff] }
 0x328   : > { %2655 = vrot.lane.b32.xlu1 %v2648_v63, %s3452_s23  ;;  %v2294_v24 = vpop.permute.xlu0 %2293  ;;  %v1951_v29 = vadd.f32 %v5596_v2, %v1831_v36  ;;  %v2184_v62 = vadd.f32 %v5751_v50, %v2124_v13  ;;  %v2081_v60 = vadd.f32 %v2078_v40, %v2030_v8  ;;  %v2687_v63 = vmul.f32 %v5882_v1, %v2686_v27 }
 0x329   : > { %v5930_v20 = vadd.f32 %v2294_v24, %v2182_v61  ;;  %v2202_v56 = vadd.f32 %v5767_v23, %v5581_v30  ;;  %v2689_v28 = vmul.f32 %v5893_v47, %v2686_v27  ;;  %v2203_v50 = vadd.f32 %v5777_v39, %v5588_v45 }
 0x32a   : > { %v2296_v31 = vpop.permute.xlu1 %2295  ;;  %v2038_v55 = vadd.f32 %v2035_v52, %v1951_v29  ;;  %v2688_v54 = vmul.f32 %v5899_v5, %v2686_v27  ;;  %v2132_v19 = vadd.f32 %v2129_v0, %v2081_v60  ;;  %v2706_v15 = vstv %s3229_s5 }
 0x32b   : > { %2675 = vrot.lane.b32.xlu0 %v2668_v48, %s3452_s23  ;;  %v5940_v2 = vadd.f32 %v2296_v31, %v2183_v57  ;;  %v2137_v36 = vmul.f32 %v6723_v44, %v5340_v16  ;;  %v2222_v45 = vadd.f32 %v5802_v6, %v5615_v26  ;;  %v2707_v27 = vmul.f32 %v5882_v1, %v2706_v15 }
 0x32c   : > { %2673 = vrot.lane.b32.xlu1 %v2667_v42, %s3452_s23  ;;  %v2298_v53 = vpop.permute.xlu0 %2297  ;;  %v2089_v14 = vadd.f32 %v2086_v4, %v2038_v55  ;;  %v2204_v23 = vadd.f32 %v5794_v11, %v2132_v19  ;;  %v2708_v42 = vmul.f32 %v5899_v5, %v2706_v15  ;;  %v2709_v11 = vmul.f32 %v5893_v47, %v2706_v15 }
 0x32d   : > { %v5945_v37 = vadd.f32 %v2298_v53, %v2184_v62  ;;  %v2726_v7 = vstv %s3230_s27  ;;  %v2223_v26 = vadd.f32 %v5819_v25, %v5631_v33  ;;  %v2242_v13 = vadd.f32 %v5837_v59, %v5659_v3 }
 0x32e   : > { %v2314_v46 = vpop.permute.xlu1 %2313  ;;  %v2140_v48 = vadd.f32 %v2137_v36, %v2089_v14  ;;  %v2727_v24 = vmul.f32 %v5882_v1, %v2726_v7  ;;  %v2729_v33 = vmul.f32 %v5893_v47, %v2726_v7  ;;  %v2746_v62 = vstv %s3231_s6 }
 0x32f   : > { %2693 = vrot.lane.b32.xlu0 %v2687_v63, %s3452_s23  ;;  %v5955_v10 = vadd.f32 %v2314_v46, %v2202_v56  ;;  %v2747_v3 = vmul.f32 %v5882_v1, %v2746_v62  ;;  %v2748_v0 = vmul.f32 %v5899_v5, %v2746_v62  ;;  %v2766_v63 = vstv %s3232_s15  ;;  %v6019_v56 = vld [vmem:[#allocation2 + $0x3a] sm:$0xff] }
 0x330   : > { %2677 = vrot.lane.b32.xlu1 %v2669_v34, %s3452_s23  ;;  %v2316_v9 = vpop.permute.xlu0 %2315  ;;  %v2224_v6 = vadd.f32 %v5824_v35, %v2140_v48  ;;  %v2728_v35 = vmul.f32 %v5899_v5, %v2726_v7  ;;  %v2767_v5 = vmul.f32 %v6010_v41, %v2766_v63  ;;  %v2786_v46 = vstv %s3233_s25 }
 0x331   : > { %v5959_v30 = vadd.f32 %v2316_v9, %v2203_v50  ;;  %v2787_v19 = vmul.f32 %v6010_v41, %v2786_v46  ;;  %v2788_v14 = vmul.f32 %v6019_v56, %v2786_v46  ;;  %v2806_v44 = vstv %s3234_s7 }
 0x332   : > { %v2318_v39 = vpop.permute.xlu1 %2317  ;;  %v2826_v48 = vstv %s3235_s8 }
 0x333   : > { %2697 = vrot.lane.b32.xlu0 %v2689_v28, %s3452_s23  ;;  %v5967_v61 = vadd.f32 %v2318_v39, %v2204_v23  ;;  %v2827_v7 = vmul.f32 %v6010_v41, %v2826_v48 }
 0x334   : > { %2695 = vrot.lane.b32.xlu1 %v2688_v54, %s3452_s23  ;;  %v2334_v58 = vpop.permute.xlu0 %2333 }
 0x335   : > { %v5970_v8 = vadd.f32 %v2334_v58, %v2222_v45  ;;  %v2807_v45 = vmul.f32 %v6010_v41, %v2806_v44  ;;  %v2808_v58 = vmul.f32 %v6019_v56, %v2806_v44 }
 0x336   : > { %v2336_v52 = vpop.permute.xlu1 %2335 }
 0x337   : > { %2715 = vrot.lane.b32.xlu0 %v2708_v42, %s3452_s23  ;;  %v5978_v49 = vadd.f32 %v2336_v52, %v2223_v26  ;;  %v2828_v52 = vmul.f32 %v6019_v56, %v2826_v48 }
 0x338   : > { %2713 = vrot.lane.b32.xlu1 %v2707_v27, %s3452_s23  ;;  %v2338_v40 = vpop.permute.xlu0 %2337 }
 0x339   : > { %v5981_v29 = vadd.f32 %v2338_v40, %v2224_v6 }
 0x33a   : > { %v2354_v25 = vpop.permute.xlu1 %2353 }
 0x33b   : > { %2733 = vrot.lane.b32.xlu0 %v2727_v24, %s3452_s23  ;;  %v5989_v34 = vadd.f32 %v2354_v25, %v2242_v13  ;;  %v2846_v24 = vstv %s3236_s9 }
 0x33c   : > { %2717 = vrot.lane.b32.xlu1 %v2709_v11, %s3452_s23  ;;  %v2356_v57 = vpop.permute.xlu0 %2355  ;;  %v2847_v25 = vmul.f32 %v6010_v41, %v2846_v24 }
 0x33d   : > { %v5992_v31 = vadd.f32 %v2356_v57, %v5846_v22  ;;  %v2749_v22 = vmul.f32 %v5893_v47, %v2746_v62  ;;  %v2848_v57 = vmul.f32 %v6019_v56, %v2846_v24 }
 0x33e   : > { %v2358_v60 = vpop.permute.xlu1 %2357 }
 0x33f   : > { %2737 = vrot.lane.b32.xlu0 %v2729_v33, %s3452_s23  ;;  %v5998_v59 = vadd.f32 %v2358_v60, %v5858_v21 }
 0x340   : > { %2735 = vrot.lane.b32.xlu1 %v2728_v35, %s3452_s23  ;;  %v2374_v51 = vpop.permute.xlu0 %2373 }
 0x341   : > { %v6002_v53 = vadd.f32 %v2374_v51, %v5867_v17  ;;  %v2769_v17 = vmul.f32 %v2766_v63, %v5340_v16 }
 0x342   : > { %v2376_v55 = vpop.permute.xlu1 %2375 }
 0x343   : > { %2755 = vrot.lane.b32.xlu0 %v2748_v0, %s3452_s23  ;;  %v6008_v1 = vadd.f32 %v2376_v55, %v5880_v43  ;;  %v2768_v43 = vmul.f32 %v6019_v56, %v2766_v63 }
 0x344   : > { %2753 = vrot.lane.b32.xlu1 %v2747_v3, %s3452_s23  ;;  %v2378_v21 = vpop.permute.xlu0 %2377  ;;  %v2866_v3 = vstv %s3237_s28 }
 0x345   : > { %v6014_v4 = vadd.f32 %v2378_v21, %v5888_v38  ;;  %v2868_v63 = vmul.f32 %v6019_v56, %v2866_v3 }
 0x346   : > { %v2394_v47 = vpop.permute.xlu1 %2393 }
 0x347   : > { %2773 = vrot.lane.b32.xlu0 %v2767_v5, %s3452_s23  ;;  %v6023_v28 = vadd.f32 %v2394_v47, %v5906_v12 }
 0x348   : > { %2757 = vrot.lane.b32.xlu1 %v2749_v22, %s3452_s23  ;;  %v2396_v50 = vpop.permute.xlu0 %2395 }
 0x349   : > { %v6026_v38 = vadd.f32 %v2396_v50, %v5913_v18  ;;  %v2789_v18 = vmul.f32 %v2786_v46, %v5340_v16 }
 0x34a   : > { %v2398_v54 = vpop.permute.xlu1 %2397 }
 0x34b   : > { %2777 = vrot.lane.b32.xlu0 %v2769_v17, %s3452_s23  ;;  %v6032_v9 = vadd.f32 %v2398_v54, %v5927_v32 }
 0x34c   : > { %2775 = vrot.lane.b32.xlu1 %v2768_v43, %s3452_s23  ;;  %v2414_v15 = vpop.permute.xlu0 %2413 }
 0x34d   : > { %v6036_v12 = vadd.f32 %v2414_v15, %v5930_v20  ;;  %v3341_v20 = vld [vmem:[#allocation2 + $0x42] sm:$0x1] }
 0x34e   : > { %v2416_v36 = vpop.permute.xlu1 %2415  ;;  %v2809_v16 = vmul.f32 %v3341_v20, %v2806_v44  ;;  %v2849_v35 = vmul.f32 %v3341_v20, %v2846_v24 }
 0x34f   : > { %2795 = vrot.lane.b32.xlu0 %v2788_v14, %s3452_s23  ;;  %v6042_v23 = vadd.f32 %v2416_v36, %v5940_v2 }
 0x350   : > { %2793 = vrot.lane.b32.xlu1 %v2787_v19, %s3452_s23  ;;  %v2418_v32 = vpop.permute.xlu0 %2417 }
 0x351   : > { %v6046_v39 = vadd.f32 %v2418_v32, %v5945_v37 }
 0x352   : > { %v2434_v27 = vpop.permute.xlu1 %2433 }
 0x353   : > { %2813 = vrot.lane.b32.xlu0 %v2807_v45, %s3452_s23  ;;  %v2442_v42 = vadd.f32 %v2434_v27, %v5955_v10  ;;  %v2829_v10 = vmul.f32 %v3341_v20, %v2826_v48 }
 0x354   : > { %2797 = vrot.lane.b32.xlu1 %v2789_v18, %s3452_s23  ;;  %v2436_v2 = vpop.permute.xlu0 %2435 }
 0x355   : > { %v2443_v11 = vadd.f32 %v2436_v2, %v5959_v30 }
 0x356   : > { %v2438_v37 = vpop.permute.xlu1 %2437 }
 0x357   : > { %2817 = vrot.lane.b32.xlu0 %v2809_v16, %s3452_s23  ;;  %v2444_v26 = vadd.f32 %v2438_v37, %v5967_v61 }
 0x358   : > { %2815 = vrot.lane.b32.xlu1 %v2808_v58, %s3452_s23  ;;  %v2454_v6 = vpop.permute.xlu0 %2453 }
 0x359   : > { %v2462_v40 = vadd.f32 %v2454_v6, %v5970_v8 }
 0x35a   : > { %v2456_v30 = vpop.permute.xlu1 %2455 }
 0x35b   : > { %2835 = vrot.lane.b32.xlu0 %v2828_v52, %s3452_s23  ;;  %v2463_v13 = vadd.f32 %v2456_v30, %v5978_v49 }
 0x35c   : > { %2833 = vrot.lane.b32.xlu1 %v2827_v7, %s3452_s23  ;;  %v2458_v33 = vpop.permute.xlu0 %2457 }
 0x35d   : > { %v2464_v61 = vadd.f32 %v2458_v33, %v5981_v29  ;;  %v2867_v29 = vmul.f32 %v6010_v41, %v2866_v3 }
 0x35e   : > { %v2474_v8 = vpop.permute.xlu1 %2473 }
 0x35f   : > { %2853 = vrot.lane.b32.xlu0 %v2847_v25, %s3452_s23  ;;  %v2482_v62 = vadd.f32 %v2474_v8, %v5989_v34  ;;  %v2869_v34 = vmul.f32 %v3341_v20, %v2866_v3 }
 0x360   : > { %2837 = vrot.lane.b32.xlu1 %v2829_v10, %s3452_s23  ;;  %v2476_v60 = vpop.permute.xlu0 %2475 }
 0x361   : > { %v2483_v51 = vadd.f32 %v2476_v60, %v5992_v31 }
 0x362   : > { %v2478_v49 = vpop.permute.xlu1 %2477 }
 0x363   : > { %2857 = vrot.lane.b32.xlu0 %v2849_v35, %s3452_s23  ;;  %v2484_v0 = vadd.f32 %v2478_v49, %v5998_v59 }
 0x364   : > { %2855 = vrot.lane.b32.xlu1 %v2848_v57, %s3452_s23  ;;  %v2494_v22 = vpop.permute.xlu0 %2493 }
 0x365   : > { %v2502_v55 = vadd.f32 %v2494_v22, %v6002_v53 }
 0x366   : > { %v2496_v31 = vpop.permute.xlu1 %2495 }
 0x367   : > { %2875 = vrot.lane.b32.xlu0 %v2868_v63, %s3452_s23  ;;  %v2503_v21 = vadd.f32 %v2496_v31, %v6008_v1 }
 0x368   : > { %2873 = vrot.lane.b32.xlu1 %v2867_v29, %s3452_s23  ;;  %v2498_v5 = vpop.permute.xlu0 %2497 }
 0x369   : > { %v2504_v17 = vadd.f32 %v2498_v5, %v6014_v4 }
 0x36a   : > { %v2514_v41 = vpop.permute.xlu1 %2513 }
 0x36b   : > { %v2522_v59 = vadd.f32 %v2514_v41, %v6023_v28 }
 0x36c   : > { %2877 = vrot.lane.b32.xlu1 %v2869_v34, %s3452_s23  ;;  %v2516_v47 = vpop.permute.xlu0 %2515  ;;  %s2885_s23 = sld [smem:[#allocation7]] }
 0x36d   : > { %v2523_v56 = vadd.f32 %v2516_v47, %v6026_v38 }
 0x36e   : > { %v2518_v53 = vpop.permute.xlu1 %2517 }
 0x36f   : > { %v2524_v43 = vadd.f32 %v2518_v53, %v6032_v9 }
 0x370   : > { %v2534_v50 = vpop.permute.xlu0 %2533 }
 0x371   : > { %v2542_v46 = vadd.f32 %v2534_v50, %v6036_v12 }
 0x374   : > { %v2538_v19 = vpop.permute.xlu0 %2537 }
 0x375   : > { %v2544_v4 = vadd.f32 %v2538_v19, %v6046_v39 }
 0x376   : > { %v2536_v54 = vpop.permute.xlu1 %2535 }
 0x377   : > { %v2543_v1 = vadd.f32 %v2536_v54, %v6042_v23 }
 0x379   : > { %v2556_v18 = vpop.permute.xlu0 %2555 }
 0x37a   : > { %v2554_v15 = vpop.permute.xlu1 %2553  ;;  %v6088_v28 = vadd.f32 %v2556_v18, %v2443_v11  ;;  %v2902_v18 = vstv %s3238_s11 }
 0x37b   : > { %v6086_v14 = vadd.f32 %v2554_v15, %v2442_v42 }
 0x37d   : > { %v2574_v36 = vpop.permute.xlu0 %2573 }
 0x37e   : > { %v2558_v44 = vpop.permute.xlu1 %2557  ;;  %v6092_v9 = vadd.f32 %v2574_v36, %v2462_v40 }
 0x37f   : > { %v6090_v38 = vadd.f32 %v2558_v44, %v2444_v26 }
 0x381   : > { %v2578_v45 = vpop.permute.xlu0 %2577 }
 0x382   : > { %v2576_v32 = vpop.permute.xlu1 %2575  ;;  %v6096_v23 = vadd.f32 %v2578_v45, %v2464_v61 }
 0x383   : > { %v6094_v12 = vadd.f32 %v2576_v32, %v2463_v13 }
 0x385   : > { %v2596_v16 = vpop.permute.xlu0 %2595 }
 0x386   : > { %v2594_v20 = vpop.permute.xlu1 %2593  ;;  %v6100_v27 = vadd.f32 %v2596_v16, %v2483_v51 }
 0x387   : > { %v6098_v39 = vadd.f32 %v2594_v20, %v2482_v62 }
 0x389   : > { %v2614_v2 = vpop.permute.xlu0 %2613 }
 0x38a   : > { %v2598_v58 = vpop.permute.xlu1 %2597  ;;  %v6104_v48 = vadd.f32 %v2614_v2, %v2502_v55 }
 0x38b   : > { %v6102_v42 = vadd.f32 %v2598_v58, %v2484_v0 }
 0x38d   : > { %v2618_v7 = vpop.permute.xlu0 %2617 }
 0x38e   : > { %v2616_v11 = vpop.permute.xlu1 %2615  ;;  %v6108_v26 = vadd.f32 %v2618_v7, %v2504_v17 }
 0x38f   : > { %v6106_v37 = vadd.f32 %v2616_v11, %v2503_v21  ;;  %v2886_v21 = vstv %s2885_s23 }
 0x391   : > { %v2636_v40 = vpop.permute.xlu0 %2635 }
 0x392   : > { %v2634_v6 = vpop.permute.xlu1 %2633  ;;  %v6112_v10 = vadd.f32 %v2636_v40, %v2523_v56 }
 0x393   : > { %v6110_v52 = vadd.f32 %v2634_v6, %v2522_v59 }
 0x395   : > { %v2654_v13 = vpop.permute.xlu0 %2653 }
 0x396   : > { %v2638_v24 = vpop.permute.xlu1 %2637  ;;  %v2662_v34 = vadd.f32 %v2654_v13, %v2542_v46  ;;  %v2917_v13 = vstv %s3242_s18 }
 0x397   : > { %v6114_v30 = vadd.f32 %v2638_v24, %v2524_v43 }
 0x399   : > { %v2658_v25 = vpop.permute.xlu0 %2657 }
 0x39a   : > { %v2656_v33 = vpop.permute.xlu1 %2655  ;;  %v2664_v59 = vadd.f32 %v2658_v25, %v2544_v4 }
 0x39b   : > { %v2663_v41 = vadd.f32 %v2656_v33, %v2543_v1 }
 0x39d   : > { %v2676_v35 = vpop.permute.xlu0 %2675 }
 0x39e   : > { %v2674_v61 = vpop.permute.xlu1 %2673  ;;  %v2683_v1 = vadd.f32 %v2676_v35, %v6088_v28 }
 0x39f   : > { %v2682_v19 = vadd.f32 %v2674_v61, %v6086_v14 }
 0x3a1   : > { %v2694_v57 = vpop.permute.xlu0 %2693 }
 0x3a2   : > { %v2678_v8 = vpop.permute.xlu1 %2677  ;;  %v2702_v28 = vadd.f32 %v2694_v57, %v6092_v9 }
 0x3a3   : > { %v2684_v16 = vadd.f32 %v2678_v8, %v6090_v38 }
 0x3a5   : > { %v6116_v60 = vpop.permute.xlu0 %2697 }
 0x3a6   : > { %v2696_v62 = vpop.permute.xlu1 %2695  ;;  %v2704_v8 = vadd.f32 %v6116_v60, %v6096_v23 }
 0x3a7   : > { %v2703_v61 = vadd.f32 %v2696_v62, %v6094_v12 }
 0x3a9   : > { %v6120_v51 = vpop.permute.xlu0 %2715 }
 0x3aa   : > { %v6118_v3 = vpop.permute.xlu1 %2713  ;;  %v2723_v60 = vadd.f32 %v6120_v51, %v6100_v27 }
 0x3ab   : > { %v2722_v62 = vadd.f32 %v6118_v3, %v6098_v39 }
 0x3ad   : > { %v6124_v29 = vpop.permute.xlu0 %2733 }
 0x3ae   : > { %v6122_v49 = vpop.permute.xlu1 %2717  ;;  %v2742_v51 = vadd.f32 %v6124_v29, %v6104_v48 }
 0x3af   : > { %v2724_v3 = vadd.f32 %v6122_v49, %v6102_v42 }
 0x3b1   : > { %v6128_v22 = vpop.permute.xlu0 %2737 }
 0x3b2   : > { %v6126_v0 = vpop.permute.xlu1 %2735 }
 0x3b5   : > { %v6133_v55 = vpop.permute.xlu0 %2755 }
 0x3b6   : > { %v6131_v63 = vpop.permute.xlu1 %2753 }
 0x3b9   : > { %v2774_v5 = vpop.permute.xlu0 %2773 }
 0x3ba   : > { %v6136_v31 = vpop.permute.xlu1 %2757  ;;  %v2782_v17 = vadd.f32 %v2774_v5, %v2662_v34 }
 0x3bc   : > { %v2887_v47 = vadd.f32 %v2886_v21, %v2782_v17 }
 0x3bd   : > { %v2778_v43 = vpop.permute.xlu0 %2777 }
 0x3be   : > { %v2776_v56 = vpop.permute.xlu1 %2775  ;;  %v2890_v50 = vmax.f32 %v2887_v47, 0.0  ;;  %v2784_v54 = vadd.f32 %v2778_v43, %v2664_v59  ;;  %v2932_v43 = vstv %s3246_s16 }
 0x3bf   : > { %v2783_v53 = vadd.f32 %v2776_v56, %v2663_v41 }
 0x3c0   : > { %v2893_v4 = vmin.f32 %v2890_v50, 1.0  ;;  %v2889_v15 = vadd.f32 %v2886_v21, %v2784_v54 }
 0x3c1   : > { %v2888_v46 = vadd.f32 %v2886_v21, %v2783_v53  ;;  %v2796_v45 = vpop.permute.xlu0 %2795 }
 0x3c2   : > { %v2794_v44 = vpop.permute.xlu1 %2793  ;;  %2897 = vst.msk [vmem:[%s6142_s24] sm:$0xff] %vm2896_vm3, %v2893_v4  ;;  %v2892_v14 = vmax.f32 %v2889_v15, 0.0  ;;  %v2803_v20 = vadd.f32 %v2796_v45, %v2683_v1  ;;  %v2947_v45 = vstv %s3250_s29 }
 0x3c3   : > { %v2891_v36 = vmax.f32 %v2888_v46, 0.0  ;;  %v2802_v32 = vadd.f32 %v2794_v44, %v2682_v19 }
 0x3c4   : > { %v2895_v11 = vmin.f32 %v2892_v14, 1.0  ;;  %v2904_v7 = vadd.f32 %v2902_v18, %v2803_v20  ;;  %v2743_v20 = vadd.f32 %v6126_v0, %v6106_v37  ;;  %v2762_v37 = vadd.f32 %v6131_v63, %v6110_v52 }
 0x3c5   : > { %v2894_v58 = vmin.f32 %v2891_v36, 1.0  ;;  %v2903_v2 = vadd.f32 %v2902_v18, %v2802_v32  ;;  %v2814_v33 = vpop.permute.xlu0 %2813  ;;  %v2764_v63 = vadd.f32 %v6136_v31, %v6114_v30 }
 0x3c6   : > { %v2798_v6 = vpop.permute.xlu1 %2797  ;;  %2900 = vst.msk [vmem:[%s6142_s24 + $0x10] sm:$0x1] %vm2899_vm4, %v2895_v11  ;;  %v2907_v38 = vmax.f32 %v2904_v7, 0.0  ;;  %v2822_v25 = vadd.f32 %v2814_v33, %v2702_v28 }
 0x3c7   : > { %2898 = vst.msk [vmem:[%s6142_s24 + $0x8] sm:$0xff] %vm2896_vm3, %v2894_v58  ;;  %v2906_v40 = vmax.f32 %v2903_v2, 0.0  ;;  %v2804_v24 = vadd.f32 %v2798_v6, %v2684_v16  ;;  %v2744_v16 = vadd.f32 %v6128_v22, %v6108_v26  ;;  %v2763_v26 = vadd.f32 %v6133_v55, %v6112_v10 }
 0x3c8   : > { %v2910_v57 = vmin.f32 %v2907_v38, 1.0  ;;  %v2918_v34 = vadd.f32 %v2917_v13, %v2822_v25  ;;  %v2962_v38 = vstv %s3254_s10 }
 0x3c9   : > { %v2909_v35 = vmin.f32 %v2906_v40, 1.0  ;;  %v2905_v9 = vadd.f32 %v2902_v18, %v2804_v24  ;;  %v2818_v41 = vpop.permute.xlu0 %2817 }
 0x3ca   : > { %v2816_v21 = vpop.permute.xlu1 %2815  ;;  %3240 = vst.msk [vmem:[%s6142_s24 + $0x20] sm:$0xff] %vm2896_vm3, %v2910_v57  ;;  %v2921_v59 = vmax.f32 %v2918_v34, 0.0  ;;  %v2824_v12 = vadd.f32 %v2818_v41, %v2704_v8 }
 0x3cb   : > { %3239 = vst.msk [vmem:[%s6142_s24 + $0x18] sm:$0xff] %vm2896_vm3, %v2909_v35  ;;  %v2908_v5 = vmax.f32 %v2905_v9, 0.0  ;;  %v2823_v17 = vadd.f32 %v2816_v21, %v2703_v61 }
 0x3cc   : > { %v2924_v56 = vmin.f32 %v2921_v59, 1.0  ;;  %v2920_v53 = vadd.f32 %v2917_v13, %v2824_v12 }
 0x3cd   : > { %v2911_v47 = vmin.f32 %v2908_v5, 1.0  ;;  %v2919_v23 = vadd.f32 %v2917_v13, %v2823_v17  ;;  %v2836_v46 = vpop.permute.xlu0 %2835 }
 0x3ce   : > { %v2834_v50 = vpop.permute.xlu1 %2833  ;;  %3243 = vst.msk [vmem:[%s6142_s24 + $0x30] sm:$0xff] %vm2896_vm3, %v2924_v56  ;;  %v2923_v1 = vmax.f32 %v2920_v53, 0.0  ;;  %v2843_v39 = vadd.f32 %v2836_v46, %v2723_v60 }
 0x3cf   : > { %3241 = vst.msk [vmem:[%s6142_s24 + $0x28] sm:$0x1] %vm2899_vm4, %v2911_v47  ;;  %v2922_v54 = vmax.f32 %v2919_v23, 0.0  ;;  %v2842_v19 = vadd.f32 %v2834_v50, %v2722_v62 }
 0x3d0   : > { %v2926_v15 = vmin.f32 %v2923_v1, 1.0  ;;  %v2934_v18 = vadd.f32 %v2932_v43, %v2843_v39 }
 0x3d1   : > { %v2925_v4 = vmin.f32 %v2922_v54, 1.0  ;;  %v2933_v27 = vadd.f32 %v2932_v43, %v2842_v19  ;;  %v2854_v14 = vpop.permute.xlu0 %2853 }
 0x3d2   : > { %v2838_v44 = vpop.permute.xlu1 %2837  ;;  %3245 = vst.msk [vmem:[%s6142_s24 + $0x40] sm:$0x1] %vm2899_vm4, %v2926_v15  ;;  %v2937_v42 = vmax.f32 %v2934_v18, 0.0  ;;  %v2862_v49 = vadd.f32 %v2854_v14, %v2742_v51 }
 0x3d3   : > { %3244 = vst.msk [vmem:[%s6142_s24 + $0x38] sm:$0xff] %vm2896_vm3, %v2925_v4  ;;  %v2936_v36 = vmax.f32 %v2933_v27, 0.0  ;;  %v2844_v32 = vadd.f32 %v2838_v44, %v2724_v3 }
 0x3d4   : > { %v2940_v58 = vmin.f32 %v2937_v42, 1.0  ;;  %v2948_v2 = vadd.f32 %v2947_v45, %v2862_v49 }
 0x3d5   : > { %v2939_v48 = vmin.f32 %v2936_v36, 1.0  ;;  %v2935_v29 = vadd.f32 %v2932_v43, %v2844_v32  ;;  %v2858_v6 = vpop.permute.xlu0 %2857 }
 0x3d6   : > { %v2856_v28 = vpop.permute.xlu1 %2855  ;;  %3248 = vst.msk [vmem:[%s6142_s24 + $0x50] sm:$0xff] %vm2896_vm3, %v2940_v58  ;;  %v2951_v40 = vmax.f32 %v2948_v2, 0.0  ;;  %v2864_v24 = vadd.f32 %v2858_v6, %v2744_v16 }
 0x3d7   : > { %3247 = vst.msk [vmem:[%s6142_s24 + $0x48] sm:$0xff] %vm2896_vm3, %v2939_v48  ;;  %v2938_v11 = vmax.f32 %v2935_v29, 0.0  ;;  %v2863_v7 = vadd.f32 %v2856_v28, %v2743_v20 }
 0x3d8   : > { %v2954_v22 = vmin.f32 %v2951_v40, 1.0  ;;  %v2950_v33 = vadd.f32 %v2947_v45, %v2864_v24 }
 0x3d9   : > { %v2941_v0 = vmin.f32 %v2938_v11, 1.0  ;;  %v2949_v13 = vadd.f32 %v2947_v45, %v2863_v7  ;;  %v2876_v9 = vpop.permute.xlu0 %2875 }
 0x3da   : > { %v2874_v25 = vpop.permute.xlu1 %2873  ;;  %3251 = vst.msk [vmem:[%s6142_s24 + $0x60] sm:$0xff] %vm2896_vm3, %v2954_v22  ;;  %v2953_v8 = vmax.f32 %v2950_v33, 0.0  ;;  %v2883_v52 = vadd.f32 %v2876_v9, %v2763_v26 }
 0x3db   : > { %3249 = vst.msk [vmem:[%s6142_s24 + $0x58] sm:$0x1] %vm2899_vm4, %v2941_v0  ;;  %v2952_v61 = vmax.f32 %v2949_v13, 0.0  ;;  %v2882_v35 = vadd.f32 %v2874_v25, %v2762_v37 }
 0x3dc   : > { %v2956_v57 = vmin.f32 %v2953_v8, 1.0  ;;  %v2964_v34 = vadd.f32 %v2962_v38, %v2883_v52 }
 0x3dd   : > { %v2955_v10 = vmin.f32 %v2952_v61, 1.0  ;;  %v2963_v55 = vadd.f32 %v2962_v38, %v2882_v35 }
 0x3de   : > { %v2878_v21 = vpop.permute.xlu1 %2877  ;;  %3253 = vst.msk [vmem:[%s6142_s24 + $0x70] sm:$0x1] %vm2899_vm4, %v2956_v57  ;;  %v2967_v41 = vmax.f32 %v2964_v34, 0.0 }
 0x3df   : > { %3252 = vst.msk [vmem:[%s6142_s24 + $0x68] sm:$0xff] %vm2896_vm3, %v2955_v10  ;;  %v2966_v5 = vmax.f32 %v2963_v55, 0.0  ;;  %v2884_v17 = vadd.f32 %v2878_v21, %v2764_v63 }
 0x3e0   : > { %v2970_v62 = vmin.f32 %v2967_v41, 1.0 }
 0x3e1   : > { %v2969_v59 = vmin.f32 %v2966_v5, 1.0  ;;  %v2965_v12 = vadd.f32 %v2962_v38, %v2884_v17 }
 0x3e2   : > { %3256 = vst.msk [vmem:[%s6142_s24 + $0x80] sm:$0xff] %vm2896_vm3, %v2970_v62 }
 0x3e3   : > { %3255 = vst.msk [vmem:[%s6142_s24 + $0x78] sm:$0xff] %vm2896_vm3, %v2969_v59  ;;  %v2968_v30 = vmax.f32 %v2965_v12, 0.0 }
 0x3e5   : > { %v2971_v31 = vmin.f32 %v2968_v30, 1.0 }
 0x3e7   : > { %3257 = vst.msk [vmem:[%s6142_s24 + $0x88] sm:$0x1] %vm2899_vm4, %v2971_v31 }
 0x3e8 PF: > { %p15_p11 = scmp.ge.s32.totalorder %s3495_s17, 4   ;;  %s6724_s12 = smov %s3434_s13 }
 0x3e9   : > { %s6725_s13 = smov %s3438_s14  ;;  %s6726_s14 = smov %s3505_s20 }
 0x3ea   : > { %s6727_s15 = smov %s3495_s17  ;;  %17 = sbr.rel (!%p15_p11) target bundleno = 7 (0x7), region = 89 }
 0x3f1   :  { %2997 = vsyncpa [#allocation4], 1 }
 0x3f2   :  { %2999 = vsyncpa [#allocation4 + $0x1], 1 }
 0x3f3   :  { %3000 = vsyncpa [#allocation5], 1 }
 0x3f4   :  { %3002 = vsyncpa [#allocation5 + $0x1], 1 }
 0x3f5   :  { %3003 = vsyncpa [#allocation6], 1 }
 0x3f6   :  { %3005 = vsyncpa [#allocation6 + $0x1], 1 }

</bundles_post_ra>
